<compile_context>
chip_gen: v7x
topology: tpu7x:2x2x1
jax: 0.10.0
libtpu: 0.0.40
codegen_flags: <defaults>
</compile_context>

<pallas_src>
import math
import numpy as np
import jax
import jax.numpy as jnp
from jax.experimental import pallas as pl
from jax.experimental.pallas import tpu as pltpu

# ----------------------------- configuration -------------------------------
DIM = 32            # embedding dim
HEAD_NUM = 4        # attention heads
HEAD_DIM = DIM // HEAD_NUM
FF_HIDDEN = 2048    # FeedForward default hidden_dim
FF_CHUNK = 512      # static chunking of the FF hidden dim
ENC_VOCAB = 50
DEC_VOCAB = 60
VOCAB_PAD = 128     # lane-dense padded vocab for the final projection
N_LAYERS = 6
LN_EPS = 1e-5
BF16 = jnp.bfloat16


# --------------------------- in-kernel helpers ------------------------------
def _add_ln(x, res, g, b):
    """residual add + LayerNorm over the last dim (PyTorch nn.LayerNorm)."""
    y = x + res
    mu = jnp.mean(y, axis=-1, keepdims=True)
    var = jnp.mean(jnp.square(y - mu), axis=-1, keepdims=True)
    return (y - mu) * jax.lax.rsqrt(var + LN_EPS) * g + b


def _mha_core(q, k, v, wo, mask, B, Sq, Skv):
    """Multi-head attention core.

    q: (B*Sq, D) bf16, k/v: (B*Skv, D) bf16, wo: (D, D) bf16,
    mask: (Sq, Skv) f32 additive mask or None.  Returns (B*Sq, D) f32.
    1/sqrt(HEAD_DIM) is already folded into the Q projection weights.
    """
    q3 = q.reshape(B, Sq, DIM)
    k3 = k.reshape(B, Skv, DIM)
    v3 = v.reshape(B, Skv, DIM)
    # Head split via a leading-axis (head-major) stack -> one batched einsum
    # per MHA instead of a per-head Python loop; no lane-splitting reshapes.
    qh = jnp.concatenate(
        [q3[:, :, h * HEAD_DIM:(h + 1) * HEAD_DIM] for h in range(HEAD_NUM)], axis=0)
    kh = jnp.concatenate(
        [k3[:, :, h * HEAD_DIM:(h + 1) * HEAD_DIM] for h in range(HEAD_NUM)], axis=0)
    vh = jnp.concatenate(
        [v3[:, :, h * HEAD_DIM:(h + 1) * HEAD_DIM] for h in range(HEAD_NUM)], axis=0)

    s = jnp.einsum('bqd,bkd->bqk', qh, kh,
                   preferred_element_type=jnp.float32)        # (H*B, Sq, Skv) f32
    if mask is not None:
        s = s + mask                                          # broadcast over H*B
    s = s - jnp.max(s, axis=-1, keepdims=True)
    e = jnp.exp(s)
    p = (e * pl.reciprocal(jnp.sum(e, axis=-1, keepdims=True),
                           approx=True)).astype(BF16)
    ctx = jnp.einsum('bqk,bkd->bqd', p, vh,
                     preferred_element_type=jnp.float32)      # (H*B, Sq, Hd) f32

    # concat(heads) @ Wo  ==  sum_h ctx_h @ Wo[h*Hd:(h+1)*Hd, :]
    out = jnp.zeros((B * Sq, DIM), jnp.float32)
    for h in range(HEAD_NUM):                                 # static, 4 iterations
        ctx_h = ctx[h * B:(h + 1) * B].reshape(B * Sq, HEAD_DIM).astype(BF16)
        out = out + jnp.dot(ctx_h, wo[h * HEAD_DIM:(h + 1) * HEAD_DIM, :],
                            preferred_element_type=jnp.float32)
    return out


def _ff(x2, w1_ref, b1_ref, w2_ref, b2_ref):
    """FeedForward with the 2048-wide hidden dim processed in static chunks.

    x2: (B*S, D) bf16.  Returns (B*S, D) f32.
    """
    n = x2.shape[0]
    acc = jnp.zeros((n, DIM), jnp.float32)
    for c in range(0, FF_HIDDEN, FF_CHUNK):                   # static, 4 chunks
        w1c = w1_ref[0, :, c:c + FF_CHUNK]                    # (D, C) bf16
        b1c = b1_ref[0, :, c:c + FF_CHUNK]                    # (1, C) f32
        h = jnp.maximum(
            jnp.dot(x2, w1c, preferred_element_type=jnp.float32) + b1c, 0.0)
        w2c = w2_ref[0, c:c + FF_CHUNK, :]                    # (C, D) bf16
        acc = acc + jnp.dot(h.astype(BF16), w2c,
                            preferred_element_type=jnp.float32)
    return acc + b2_ref[0]


# ------------------------------ encoder kernel ------------------------------
def encoder_kernel(x_ref, wqkv_ref, wo_ref, ln1g_ref, ln1b_ref,
                   w1_ref, b1_ref, w2_ref, b2_ref, ln2g_ref, ln2b_ref,
                   o_ref, x_sc):
    l = pl.program_id(0)
    B, S, D = x_ref.shape

    @pl.when(l == 0)
    def _():
        x_sc[...] = x_ref[...]

    x = x_sc[...]                                             # (B, S, D) f32

    # ---- self-attention (fused QKV projection) ----
    x2 = x.reshape(B * S, D).astype(BF16)                     # hoisted cast
    qkv = jnp.dot(x2, wqkv_ref[0],
                  preferred_element_type=jnp.float32).astype(BF16)   # (BS, 3D)
    attn = _mha_core(qkv[:, :D], qkv[:, D:2 * D], qkv[:, 2 * D:],
                     wo_ref[0], None, B, S, S).reshape(B, S, D)
    x = _add_ln(attn, x, ln1g_ref[0], ln1b_ref[0])

    # ---- feed forward ----
    x2 = x.reshape(B * S, D).astype(BF16)
    f = _ff(x2, w1_ref, b1_ref, w2_ref, b2_ref).reshape(B, S, D)
    x = _add_ln(f, x, ln2g_ref[0], ln2b_ref[0])

    x_sc[...] = x

    @pl.when(l == pl.num_programs(0) - 1)
    def _():
        o_ref[...] = x


# ------------------------------ decoder kernel ------------------------------
def decoder_kernel(y_ref, enc_ref, mask_ref,
                   swqkv_ref, swo_ref, ln1g_ref, ln1b_ref,
                   cwq_ref, cwkv_ref, cwo_ref, ln2g_ref, ln2b_ref,
                   w1_ref, b1_ref, w2_ref, b2_ref, ln3g_ref, ln3b_ref,
                   outw_ref, outb_ref,
                   o_ref, y_sc):
    l = pl.program_id(0)
    B, Sd, D = y_ref.shape
    Se = enc_ref.shape[1]

    @pl.when(l == 0)
    def _():
        y_sc[...] = y_ref[...]

    y = y_sc[...]                                             # (B, Sd, D) f32
    mask = mask_ref[...]                                      # (Sd, Sd) f32

    # ---- masked self-attention (fused QKV) ----
    y2 = y.reshape(B * Sd, D).astype(BF16)
    qkv = jnp.dot(y2, swqkv_ref[0],
                  preferred_element_type=jnp.float32).astype(BF16)
    attn = _mha_core(qkv[:, :D], qkv[:, D:2 * D], qkv[:, 2 * D:],
                     swo_ref[0], mask, B, Sd, Sd).reshape(B, Sd, D)
    y = _add_ln(attn, y, ln1g_ref[0], ln1b_ref[0])

    # ---- cross-attention (Q from decoder, fused K/V from encoder output) ----
    y2 = y.reshape(B * Sd, D).astype(BF16)
    q = jnp.dot(y2, cwq_ref[0],
                preferred_element_type=jnp.float32).astype(BF16)
    enc2 = enc_ref[...].reshape(B * Se, D).astype(BF16)
    kv = jnp.dot(enc2, cwkv_ref[0],
                 preferred_element_type=jnp.float32).astype(BF16)     # (B*Se, 2D)
    cross = _mha_core(q, kv[:, :D], kv[:, D:], cwo_ref[0], None,
                      B, Sd, Se).reshape(B, Sd, D)
    y = _add_ln(cross, y, ln2g_ref[0], ln2b_ref[0])

    # ---- feed forward ----
    y2 = y.reshape(B * Sd, D).astype(BF16)
    f = _ff(y2, w1_ref, b1_ref, w2_ref, b2_ref).reshape(B, Sd, D)
    y = _add_ln(f, y, ln3g_ref[0], ln3b_ref[0])

    y_sc[...] = y

    # ---- final vocab projection on the last layer (lane-padded to 128) ----
    @pl.when(l == pl.num_programs(0) - 1)
    def _():
        yf = y.reshape(B * Sd, D).astype(BF16)
        logits = jnp.dot(yf, outw_ref[...],
                         preferred_element_type=jnp.float32) + outb_ref[...]
        o_ref[...] = logits.reshape(B, Sd, VOCAB_PAD)


# ------------------------------ kernel wrappers ------------------------------
def _resident_spec(arr):
    zeros = (0,) * arr.ndim
    return pl.BlockSpec(arr.shape, lambda l: zeros)


def _layer_spec(arr):
    zeros = (0,) * (arr.ndim - 1)
    return pl.BlockSpec((1,) + arr.shape[1:], lambda l: (l,) + zeros)


def encoder_call(x_enc, p):
    B, Se, _ = x_enc.shape
    stacks = (p["e_wqkv"], p["e_wo"], p["e_ln1g"], p["e_ln1b"],
              p["e_w1"], p["e_b1"], p["e_w2"], p["e_b2"],
              p["e_ln2g"], p["e_ln2b"])
    grid_spec = pltpu.PrefetchScalarGridSpec(
        num_scalar_prefetch=0,
        grid=(N_LAYERS,),
        in_specs=[_resident_spec(x_enc)] + [_layer_spec(a) for a in stacks],
        out_specs=pl.BlockSpec((B, Se, DIM), lambda l: (0, 0, 0)),
        scratch_shapes=[pltpu.VMEM((B, Se, DIM), jnp.float32)],
    )
    return pl.pallas_call(
        encoder_kernel,
        grid_spec=grid_spec,
        out_shape=jax.ShapeDtypeStruct((B, Se, DIM), jnp.float32),
        compiler_params=pltpu.CompilerParams(
            dimension_semantics=("arbitrary",),
            vmem_limit_bytes=32 * 1024 * 1024),
    )(x_enc, *stacks)


def decoder_call(x_dec, enc_out, mask, p):
    B, Sd, _ = x_dec.shape
    stacks = (p["d_swqkv"], p["d_swo"], p["d_ln1g"], p["d_ln1b"],
              p["d_cwq"], p["d_cwkv"], p["d_cwo"], p["d_ln2g"], p["d_ln2b"],
              p["d_w1"], p["d_b1"], p["d_w2"], p["d_b2"],
              p["d_ln3g"], p["d_ln3b"])
    grid_spec = pltpu.PrefetchScalarGridSpec(
        num_scalar_prefetch=0,
        grid=(N_LAYERS,),
        in_specs=([_resident_spec(x_dec), _resident_spec(enc_out),
                   _resident_spec(mask)]
                  + [_layer_spec(a) for a in stacks]
                  + [_resident_spec(p["out_w"]), _resident_spec(p["out_b"])]),
        out_specs=pl.BlockSpec((B, Sd, VOCAB_PAD), lambda l: (0, 0, 0)),
        scratch_shapes=[pltpu.VMEM((B, Sd, DIM), jnp.float32)],
    )
    logits = pl.pallas_call(
        decoder_kernel,
        grid_spec=grid_spec,
        out_shape=jax.ShapeDtypeStruct((B, Sd, VOCAB_PAD), jnp.float32),
        compiler_params=pltpu.CompilerParams(
            dimension_semantics=("arbitrary",),
            vmem_limit_bytes=32 * 1024 * 1024),
    )(x_dec, enc_out, mask, *stacks, p["out_w"], p["out_b"])
    return logits[:, :, :DEC_VOCAB]


# --------------------------- parameter construction -------------------------
def _uniform(key, shape, bound):
    return jax.random.uniform(key, shape, jnp.float32, -bound, bound)


def init_params(key):
    ks = iter(jax.random.split(key, 40))
    nxt = lambda: next(ks)
    inv_d = 1.0 / math.sqrt(DIM)
    inv_h = 1.0 / math.sqrt(FF_HIDDEN)
    scale = 1.0 / math.sqrt(HEAD_DIM)

    def self_attn_stack():
        # (in, out) orientation, bf16, 1/sqrt(head_dim) folded into the Q block.
        wq = _uniform(nxt(), (N_LAYERS, DIM, DIM), inv_d) * scale
        wk = _uniform(nxt(), (N_LAYERS, DIM, DIM), inv_d)
        wv = _uniform(nxt(), (N_LAYERS, DIM, DIM), inv_d)
        wqkv = jnp.concatenate([wq, wk, wv], axis=-1).astype(BF16)   # (L, D, 3D)
        wo = _uniform(nxt(), (N_LAYERS, DIM, DIM), inv_d).astype(BF16)
        return wqkv, wo

    def cross_attn_stack():
        wq = (_uniform(nxt(), (N_LAYERS, DIM, DIM), inv_d) * scale).astype(BF16)
        wk = _uniform(nxt(), (N_LAYERS, DIM, DIM), inv_d)
        wv = _uniform(nxt(), (N_LAYERS, DIM, DIM), inv_d)
        wkv = jnp.concatenate([wk, wv], axis=-1).astype(BF16)        # (L, D, 2D)
        wo = _uniform(nxt(), (N_LAYERS, DIM, DIM), inv_d).astype(BF16)
        return wq, wkv, wo

    def ln_stack():
        return (jnp.ones((N_LAYERS, 1, DIM), jnp.float32),
                jnp.zeros((N_LAYERS, 1, DIM), jnp.float32))

    def ff_stack():
        w1 = _uniform(nxt(), (N_LAYERS, DIM, FF_HIDDEN), inv_d).astype(BF16)
        b1 = _uniform(nxt(), (N_LAYERS, 1, FF_HIDDEN), inv_d)
        w2 = _uniform(nxt(), (N_LAYERS, FF_HIDDEN, DIM), inv_h).astype(BF16)
        b2 = _uniform(nxt(), (N_LAYERS, 1, DIM), inv_h)
        return w1, b1, w2, b2

    p = {}
    p["enc_embed"] = jax.random.normal(nxt(), (ENC_VOCAB, DIM), jnp.float32)
    p["dec_embed"] = jax.random.normal(nxt(), (DEC_VOCAB, DIM), jnp.float32)

    p["e_wqkv"], p["e_wo"] = self_attn_stack()
    p["e_ln1g"], p["e_ln1b"] = ln_stack()
    p["e_w1"], p["e_b1"], p["e_w2"], p["e_b2"] = ff_stack()
    p["e_ln2g"], p["e_ln2b"] = ln_stack()

    p["d_swqkv"], p["d_swo"] = self_attn_stack()
    p["d_ln1g"], p["d_ln1b"] = ln_stack()
    p["d_cwq"], p["d_cwkv"], p["d_cwo"] = cross_attn_stack()
    p["d_ln2g"], p["d_ln2b"] = ln_stack()
    p["d_w1"], p["d_b1"], p["d_w2"], p["d_b2"] = ff_stack()
    p["d_ln3g"], p["d_ln3b"] = ln_stack()

    # final vocab projection, lane-padded from DEC_VOCAB -> VOCAB_PAD
    w = _uniform(nxt(), (DIM, DEC_VOCAB), inv_d)
    b = _uniform(nxt(), (DEC_VOCAB,), inv_d)
    p["out_w"] = (jnp.zeros((DIM, VOCAB_PAD), jnp.float32)
                  .at[:, :DEC_VOCAB].set(w).astype(BF16))
    p["out_b"] = jnp.zeros((1, VOCAB_PAD), jnp.float32).at[0, :DEC_VOCAB].set(b)
    return p


# ---------------------------- positional encoding ---------------------------
def positional_encoding(dim, max_len=5000):
    position = np.arange(max_len, dtype=np.float32)[:, None]
    div_term = np.exp(np.arange(0, dim, 2, dtype=np.float32)
                      * (-math.log(10000.0) / dim))
    pe = np.zeros((max_len, 1, dim), np.float32)
    pe[:, 0, 0::2] = np.sin(position * div_term)
    pe[:, 0, 1::2] = np.cos(position * div_term)
    return jnp.asarray(pe)


PE_TABLE = positional_encoding(DIM)


def apply_pe(x):
    # Matches the PyTorch module exactly: x + pe[:x.size(0)] with pe of shape
    # (max_len, 1, dim) and x of shape (B, S, D) -> the positional slice is
    # indexed by the *batch* axis and broadcast over seq.
    return x + PE_TABLE[: x.shape[0]]


# -------------------------------- model glue --------------------------------
@jax.jit
def transformer_forward(params, enc_input, dec_input, mask):
    # Embedding lookup (gather) + PE + scale kept as plain-JAX glue; the
    # 6-layer encoder and 6-layer decoder (+ vocab head) each run as a single
    # layer-gridded, weight-pipelined Pallas call.
    x = jnp.take(params["enc_embed"], enc_input, axis=0) * (DIM ** 0.5)
    x = apply_pe(x)
    y = jnp.take(params["dec_embed"], dec_input, axis=0) * (DIM ** 0.5)
    y = apply_pe(y)
    enc_out = encoder_call(x, params)
    return decoder_call(y, enc_out, mask, params)


# ----------------------------------- main -----------------------------------
if __name__ == "__main__":
    key = jax.random.PRNGKey(0)
    k_params, k_enc, k_dec = jax.random.split(key, 3)

    params = init_params(k_params)

    B, Se, Sd = 2, 8, 8
    enc_input = jax.random.randint(k_enc, (B, Se), 0, ENC_VOCAB, dtype=jnp.int32)
    dec_input = jax.random.randint(k_dec, (B, Sd), 0, DEC_VOCAB, dtype=jnp.int32)

    # additive causal mask (0 on/below diagonal, large-negative above)
    causal = jnp.tril(jnp.ones((Sd, Sd), jnp.float32))
    mask = jnp.where(causal > 0, 0.0, -1e9).astype(jnp.float32)

    out = transformer_forward(params, enc_input, dec_input, mask)
    out = jax.block_until_ready(out)
    assert out.shape == (B, Sd, DEC_VOCAB), out.shape
    assert bool(jnp.all(jnp.isfinite(out)))
    print("KERNEL_OK")
</pallas_src>

<mosaic_0001>
module attributes {stable_mosaic.version = 11 : i64} {
  func.func @encoder_kernel(%arg0: i32, %arg1: memref<2x8x32xf32, #tpu.memory_space<vmem>>, %arg2: memref<1x32x96xbf16, #tpu.memory_space<vmem>>, %arg3: memref<1x32x32xbf16, #tpu.memory_space<vmem>>, %arg4: memref<1x1x32xf32, #tpu.memory_space<vmem>>, %arg5: memref<1x1x32xf32, #tpu.memory_space<vmem>>, %arg6: memref<1x32x2048xbf16, #tpu.memory_space<vmem>>, %arg7: memref<1x1x2048xf32, #tpu.memory_space<vmem>>, %arg8: memref<1x2048x32xbf16, #tpu.memory_space<vmem>>, %arg9: memref<1x1x32xf32, #tpu.memory_space<vmem>>, %arg10: memref<1x1x32xf32, #tpu.memory_space<vmem>>, %arg11: memref<1x1x32xf32, #tpu.memory_space<vmem>>, %arg12: memref<2x8x32xf32, #tpu.memory_space<vmem>>, %arg13: memref<2x8x32xf32, #tpu.memory_space<vmem>>) attributes {dimension_semantics = [#tpu.dimension_semantics<arbitrary>], iteration_bounds = array<i64: 6>, scalar_prefetch = 0 : i64, scratch_operands = 1 : i64, tpu.core_type = #tpu.core_type<tc>, window_params = [{pipeline_mode = #tpu.pipeline_mode<synchronous>, transform_indices = @transform_0, window_bounds = array<i64: 2, 8, 32>}, {transform_indices = @transform_1, window_bounds = array<i64: 1, 32, 96>}, {transform_indices = @transform_2, window_bounds = array<i64: 1, 32, 32>}, {transform_indices = @transform_3, window_bounds = array<i64: 1, 1, 32>}, {transform_indices = @transform_4, window_bounds = array<i64: 1, 1, 32>}, {transform_indices = @transform_5, window_bounds = array<i64: 1, 32, 2048>}, {transform_indices = @transform_6, window_bounds = array<i64: 1, 1, 2048>}, {transform_indices = @transform_7, window_bounds = array<i64: 1, 2048, 32>}, {transform_indices = @transform_8, window_bounds = array<i64: 1, 1, 32>}, {transform_indices = @transform_9, window_bounds = array<i64: 1, 1, 32>}, {transform_indices = @transform_10, window_bounds = array<i64: 1, 1, 32>}, {pipeline_mode = #tpu.pipeline_mode<synchronous>, transform_indices = @transform_11, window_bounds = array<i64: 2, 8, 32>}]} {
    %c0_i32 = arith.constant 0 : i32
    %0 = arith.cmpi eq, %arg0, %c0_i32 : i32
    %1 = arith.extui %0 : i1 to i32
    %c0_i32_0 = arith.constant 0 : i32
    %2 = arith.cmpi ne, %1, %c0_i32_0 : i32
    scf.if %2 {
      %c0_93 = arith.constant 0 : index
      %c0_94 = arith.constant 0 : index
      %c0_95 = arith.constant 0 : index
      %198 = vector.load %arg1[%c0_93, %c0_94, %c0_95] : memref<2x8x32xf32, #tpu.memory_space<vmem>>, vector<2x8x32xf32>
      %c0_96 = arith.constant 0 : index
      %c0_97 = arith.constant 0 : index
      %c0_98 = arith.constant 0 : index
      %199 = vector.load %arg13[%c0_96, %c0_97, %c0_98] : memref<2x8x32xf32, #tpu.memory_space<vmem>>, vector<2x8x32xf32>
      tpu.vector_store %arg13[%c0_96, %c0_97, %c0_98], %198 {strides = array<i32>} : memref<2x8x32xf32, #tpu.memory_space<vmem>>, vector<2x8x32xf32>,
    } else {
    }
    %c0 = arith.constant 0 : index
    %c0_1 = arith.constant 0 : index
    %c0_2 = arith.constant 0 : index
    %3 = vector.load %arg13[%c0, %c0_1, %c0_2] : memref<2x8x32xf32, #tpu.memory_space<vmem>>, vector<2x8x32xf32>
    %4 = vector.shape_cast %3 : vector<2x8x32xf32> to vector<16x32xf32>
    %5 = arith.truncf %4 : vector<16x32xf32> to vector<16x32xbf16>
    %c0_3 = arith.constant 0 : index
    %c0_4 = arith.constant 0 : index
    %c0_5 = arith.constant 0 : index
    %6 = vector.load %arg2[%c0_3, %c0_4, %c0_5] : memref<1x32x96xbf16, #tpu.memory_space<vmem>>, vector<1x32x96xbf16>
    %7 = vector.shape_cast %6 : vector<1x32x96xbf16> to vector<32x96xbf16>
    %cst = arith.constant dense<0.000000e+00> : vector<16x96xf32>
    %8 = tpu.matmul %5, %7, %cst {dimension_numbers = #tpu.dot_dimension_numbers<[1], [0], [0], [1], [0, 0, 1, 1], [], []>} : vector<16x32xbf16>, vector<32x96xbf16>, vector<16x96xf32> -> vector<16x96xf32>
    %9 = arith.truncf %8 : vector<16x96xf32> to vector<16x96xbf16>
    %10 = vector.extract_strided_slice %9 {offsets = [0, 0], sizes = [16, 32], strides = [1, 1]} : vector<16x96xbf16> to vector<16x32xbf16>
    %11 = vector.extract_strided_slice %9 {offsets = [0, 32], sizes = [16, 32], strides = [1, 1]} : vector<16x96xbf16> to vector<16x32xbf16>
    %12 = vector.extract_strided_slice %9 {offsets = [0, 64], sizes = [16, 32], strides = [1, 1]} : vector<16x96xbf16> to vector<16x32xbf16>
    %c0_6 = arith.constant 0 : index
    %c0_7 = arith.constant 0 : index
    %c0_8 = arith.constant 0 : index
    %13 = vector.load %arg3[%c0_6, %c0_7, %c0_8] : memref<1x32x32xbf16, #tpu.memory_space<vmem>>, vector<1x32x32xbf16>
    %14 = vector.shape_cast %13 : vector<1x32x32xbf16> to vector<32x32xbf16>
    %15 = vector.shape_cast %10 : vector<16x32xbf16> to vector<2x8x32xbf16>
    %16 = vector.shape_cast %11 : vector<16x32xbf16> to vector<2x8x32xbf16>
    %17 = vector.shape_cast %12 : vector<16x32xbf16> to vector<2x8x32xbf16>
    %18 = vector.extract_strided_slice %15 {offsets = [0, 0, 0], sizes = [2, 8, 8], strides = [1, 1, 1]} : vector<2x8x32xbf16> to vector<2x8x8xbf16>
    %19 = vector.extract_strided_slice %15 {offsets = [0, 0, 8], sizes = [2, 8, 8], strides = [1, 1, 1]} : vector<2x8x32xbf16> to vector<2x8x8xbf16>
    %20 = vector.extract_strided_slice %15 {offsets = [0, 0, 16], sizes = [2, 8, 8], strides = [1, 1, 1]} : vector<2x8x32xbf16> to vector<2x8x8xbf16>
    %21 = vector.extract_strided_slice %15 {offsets = [0, 0, 24], sizes = [2, 8, 8], strides = [1, 1, 1]} : vector<2x8x32xbf16> to vector<2x8x8xbf16>
    %22 = tpu.concatenate %18, %19, %20, %21 in 0 : vector<2x8x8xbf16>, vector<2x8x8xbf16>, vector<2x8x8xbf16>, vector<2x8x8xbf16> -> vector<8x8x8xbf16>
    %23 = vector.extract_strided_slice %16 {offsets = [0, 0, 0], sizes = [2, 8, 8], strides = [1, 1, 1]} : vector<2x8x32xbf16> to vector<2x8x8xbf16>
    %24 = vector.extract_strided_slice %16 {offsets = [0, 0, 8], sizes = [2, 8, 8], strides = [1, 1, 1]} : vector<2x8x32xbf16> to vector<2x8x8xbf16>
    %25 = vector.extract_strided_slice %16 {offsets = [0, 0, 16], sizes = [2, 8, 8], strides = [1, 1, 1]} : vector<2x8x32xbf16> to vector<2x8x8xbf16>
    %26 = vector.extract_strided_slice %16 {offsets = [0, 0, 24], sizes = [2, 8, 8], strides = [1, 1, 1]} : vector<2x8x32xbf16> to vector<2x8x8xbf16>
    %27 = tpu.concatenate %23, %24, %25, %26 in 0 : vector<2x8x8xbf16>, vector<2x8x8xbf16>, vector<2x8x8xbf16>, vector<2x8x8xbf16> -> vector<8x8x8xbf16>
    %28 = vector.extract_strided_slice %17 {offsets = [0, 0, 0], sizes = [2, 8, 8], strides = [1, 1, 1]} : vector<2x8x32xbf16> to vector<2x8x8xbf16>
    %29 = vector.extract_strided_slice %17 {offsets = [0, 0, 8], sizes = [2, 8, 8], strides = [1, 1, 1]} : vector<2x8x32xbf16> to vector<2x8x8xbf16>
    %30 = vector.extract_strided_slice %17 {offsets = [0, 0, 16], sizes = [2, 8, 8], strides = [1, 1, 1]} : vector<2x8x32xbf16> to vector<2x8x8xbf16>
    %31 = vector.extract_strided_slice %17 {offsets = [0, 0, 24], sizes = [2, 8, 8], strides = [1, 1, 1]} : vector<2x8x32xbf16> to vector<2x8x8xbf16>
    %32 = tpu.concatenate %28, %29, %30, %31 in 0 : vector<2x8x8xbf16>, vector<2x8x8xbf16>, vector<2x8x8xbf16>, vector<2x8x8xbf16> -> vector<8x8x8xbf16>
    "tpu.trace_start"() <{level = 10 : i32, message = "bqd,bkd->bqk"}> : () -> ()
    %cst_9 = arith.constant dense<0.000000e+00> : vector<8x8x8xf32>
    %33 = tpu.matmul %22, %27, %cst_9 {dimension_numbers = #tpu.dot_dimension_numbers<[2], [2], [1], [1], [0, 0, 0, 1, 1, 1], [0], [0]>} : vector<8x8x8xbf16>, vector<8x8x8xbf16>, vector<8x8x8xf32> -> vector<8x8x8xf32>
    "tpu.trace_stop"() : () -> ()
    %cst_10 = arith.constant dense<0xFF800000> : vector<8x8xf32>
    %34 = vector.multi_reduction <maximumf>, %33, %cst_10 [2] : vector<8x8x8xf32> to vector<8x8xf32>
    %35 = vector.shape_cast %34 : vector<8x8xf32> to vector<8x8x1xf32>
    %36 = vector.broadcast %35 : vector<8x8x1xf32> to vector<8x8x8xf32>
    %37 = arith.subf %33, %36 : vector<8x8x8xf32>
    %38 = math.exp %37 : vector<8x8x8xf32>
    %cst_11 = arith.constant dense<0.000000e+00> : vector<8x8xf32>
    %39 = vector.multi_reduction <add>, %38, %cst_11 [2] : vector<8x8x8xf32> to vector<8x8xf32>
    %40 = vector.shape_cast %39 : vector<8x8xf32> to vector<8x8x1xf32>
    %41 = tpu.reciprocal %40 {approx = true} : vector<8x8x1xf32> -> vector<8x8x1xf32>
    %42 = vector.broadcast %41 : vector<8x8x1xf32> to vector<8x8x8xf32>
    %43 = arith.mulf %38, %42 : vector<8x8x8xf32>
    %44 = arith.truncf %43 : vector<8x8x8xf32> to vector<8x8x8xbf16>
    "tpu.trace_start"() <{level = 10 : i32, message = "bqk,bkd->bqd"}> : () -> ()
    %cst_12 = arith.constant dense<0.000000e+00> : vector<8x8x8xf32>
    %45 = tpu.matmul %44, %32, %cst_12 {dimension_numbers = #tpu.dot_dimension_numbers<[2], [1], [1], [2], [0, 0, 0, 1, 1, 2], [0], [0]>} : vector<8x8x8xbf16>, vector<8x8x8xbf16>, vector<8x8x8xf32> -> vector<8x8x8xf32>
    %cst_13 = arith.constant 0.000000e+00 : f32
    "tpu.trace_stop"() : () -> ()
    %46 = vector.broadcast %cst_13 : f32 to vector<16x32xf32>
    %47 = vector.extract_strided_slice %45 {offsets = [0, 0, 0], sizes = [2, 8, 8], strides = [1, 1, 1]} : vector<8x8x8xf32> to vector<2x8x8xf32>
    %48 = vector.shape_cast %47 : vector<2x8x8xf32> to vector<16x8xf32>
    %49 = arith.truncf %48 : vector<16x8xf32> to vector<16x8xbf16>
    %50 = vector.extract_strided_slice %14 {offsets = [0, 0], sizes = [8, 32], strides = [1, 1]} : vector<32x32xbf16> to vector<8x32xbf16>
    %cst_14 = arith.constant dense<0.000000e+00> : vector<16x32xf32>
    %51 = tpu.matmul %49, %50, %cst_14 {dimension_numbers = #tpu.dot_dimension_numbers<[1], [0], [0], [1], [0, 0, 1, 1], [], []>} : vector<16x8xbf16>, vector<8x32xbf16>, vector<16x32xf32> -> vector<16x32xf32>
    %52 = arith.addf %46, %51 : vector<16x32xf32>
    %53 = vector.extract_strided_slice %45 {offsets = [2, 0, 0], sizes = [2, 8, 8], strides = [1, 1, 1]} : vector<8x8x8xf32> to vector<2x8x8xf32>
    %54 = vector.shape_cast %53 : vector<2x8x8xf32> to vector<16x8xf32>
    %55 = arith.truncf %54 : vector<16x8xf32> to vector<16x8xbf16>
    %56 = vector.extract_strided_slice %14 {offsets = [8, 0], sizes = [8, 32], strides = [1, 1]} : vector<32x32xbf16> to vector<8x32xbf16>
    %cst_15 = arith.constant dense<0.000000e+00> : vector<16x32xf32>
    %57 = tpu.matmul %55, %56, %cst_15 {dimension_numbers = #tpu.dot_dimension_numbers<[1], [0], [0], [1], [0, 0, 1, 1], [], []>} : vector<16x8xbf16>, vector<8x32xbf16>, vector<16x32xf32> -> vector<16x32xf32>
    %58 = arith.addf %52, %57 : vector<16x32xf32>
    %59 = vector.extract_strided_slice %45 {offsets = [4, 0, 0], sizes = [2, 8, 8], strides = [1, 1, 1]} : vector<8x8x8xf32> to vector<2x8x8xf32>
    %60 = vector.shape_cast %59 : vector<2x8x8xf32> to vector<16x8xf32>
    %61 = arith.truncf %60 : vector<16x8xf32> to vector<16x8xbf16>
    %62 = vector.extract_strided_slice %14 {offsets = [16, 0], sizes = [8, 32], strides = [1, 1]} : vector<32x32xbf16> to vector<8x32xbf16>
    %cst_16 = arith.constant dense<0.000000e+00> : vector<16x32xf32>
    %63 = tpu.matmul %61, %62, %cst_16 {dimension_numbers = #tpu.dot_dimension_numbers<[1], [0], [0], [1], [0, 0, 1, 1], [], []>} : vector<16x8xbf16>, vector<8x32xbf16>, vector<16x32xf32> -> vector<16x32xf32>
    %64 = arith.addf %58, %63 : vector<16x32xf32>
    %65 = vector.extract_strided_slice %45 {offsets = [6, 0, 0], sizes = [2, 8, 8], strides = [1, 1, 1]} : vector<8x8x8xf32> to vector<2x8x8xf32>
    %66 = vector.shape_cast %65 : vector<2x8x8xf32> to vector<16x8xf32>
    %67 = arith.truncf %66 : vector<16x8xf32> to vector<16x8xbf16>
    %68 = vector.extract_strided_slice %14 {offsets = [24, 0], sizes = [8, 32], strides = [1, 1]} : vector<32x32xbf16> to vector<8x32xbf16>
    %cst_17 = arith.constant dense<0.000000e+00> : vector<16x32xf32>
    %69 = tpu.matmul %67, %68, %cst_17 {dimension_numbers = #tpu.dot_dimension_numbers<[1], [0], [0], [1], [0, 0, 1, 1], [], []>} : vector<16x8xbf16>, vector<8x32xbf16>, vector<16x32xf32> -> vector<16x32xf32>
    %70 = arith.addf %64, %69 : vector<16x32xf32>
    %71 = vector.shape_cast %70 : vector<16x32xf32> to vector<2x8x32xf32>
    %c0_18 = arith.constant 0 : index
    %c0_19 = arith.constant 0 : index
    %c0_20 = arith.constant 0 : index
    %72 = vector.load %arg4[%c0_18, %c0_19, %c0_20] : memref<1x1x32xf32, #tpu.memory_space<vmem>>, vector<1x1x32xf32>
    %73 = vector.shape_cast %72 : vector<1x1x32xf32> to vector<1x32xf32>
    %c0_21 = arith.constant 0 : index
    %c0_22 = arith.constant 0 : index
    %c0_23 = arith.constant 0 : index
    %74 = vector.load %arg5[%c0_21, %c0_22, %c0_23] : memref<1x1x32xf32, #tpu.memory_space<vmem>>, vector<1x1x32xf32>
    %75 = vector.shape_cast %74 : vector<1x1x32xf32> to vector<1x32xf32>
    %76 = arith.addf %71, %3 : vector<2x8x32xf32>
    %cst_24 = arith.constant dense<0.000000e+00> : vector<2x8xf32>
    %77 = vector.multi_reduction <add>, %76, %cst_24 [2] : vector<2x8x32xf32> to vector<2x8xf32>
    %78 = vector.shape_cast %77 : vector<2x8xf32> to vector<2x8x1xf32>
    %cst_25 = arith.constant 3.200000e+01 : f32
    %79 = vector.broadcast %cst_25 : f32 to vector<2x8x1xf32>
    %80 = arith.divf %78, %79 : vector<2x8x1xf32>
    %81 = vector.broadcast %80 : vector<2x8x1xf32> to vector<2x8x32xf32>
    %82 = arith.subf %76, %81 : vector<2x8x32xf32>
    %83 = arith.mulf %82, %82 : vector<2x8x32xf32>
    %cst_26 = arith.constant dense<0.000000e+00> : vector<2x8xf32>
    %84 = vector.multi_reduction <add>, %83, %cst_26 [2] : vector<2x8x32xf32> to vector<2x8xf32>
    %85 = vector.shape_cast %84 : vector<2x8xf32> to vector<2x8x1xf32>
    %cst_27 = arith.constant 3.200000e+01 : f32
    %86 = vector.broadcast %cst_27 : f32 to vector<2x8x1xf32>
    %87 = arith.divf %85, %86 : vector<2x8x1xf32>
    %88 = vector.broadcast %80 : vector<2x8x1xf32> to vector<2x8x32xf32>
    %89 = arith.subf %76, %88 : vector<2x8x32xf32>
    %cst_28 = arith.constant 9.99999974E-6 : f32
    %90 = vector.broadcast %cst_28 : f32 to vector<2x8x1xf32>
    %91 = arith.addf %87, %90 : vector<2x8x1xf32>
    %92 = math.rsqrt %91 : vector<2x8x1xf32>
    %93 = vector.broadcast %92 : vector<2x8x1xf32> to vector<2x8x32xf32>
    %94 = arith.mulf %89, %93 : vector<2x8x32xf32>
    %95 = vector.shape_cast %73 : vector<1x32xf32> to vector<1x1x32xf32>
    %96 = vector.broadcast %95 : vector<1x1x32xf32> to vector<2x8x32xf32>
    %97 = arith.mulf %94, %96 : vector<2x8x32xf32>
    %98 = vector.shape_cast %75 : vector<1x32xf32> to vector<1x1x32xf32>
    %99 = vector.broadcast %98 : vector<1x1x32xf32> to vector<2x8x32xf32>
    %100 = arith.addf %97, %99 : vector<2x8x32xf32>
    %101 = vector.shape_cast %100 : vector<2x8x32xf32> to vector<16x32xf32>
    %102 = arith.truncf %101 : vector<16x32xf32> to vector<16x32xbf16>
    %cst_29 = arith.constant 0.000000e+00 : f32
    %103 = vector.broadcast %cst_29 : f32 to vector<16x32xf32>
    %c0_30 = arith.constant 0 : index
    %c0_31 = arith.constant 0 : index
    %c0_32 = arith.constant 0 : index
    %104 = vector.load %arg6[%c0_30, %c0_31, %c0_32] : memref<1x32x2048xbf16, #tpu.memory_space<vmem>>, vector<1x32x512xbf16>
    %105 = vector.shape_cast %104 : vector<1x32x512xbf16> to vector<32x512xbf16>
    %c0_33 = arith.constant 0 : index
    %c0_34 = arith.constant 0 : index
    %c0_35 = arith.constant 0 : index
    %106 = vector.load %arg7[%c0_33, %c0_34, %c0_35] : memref<1x1x2048xf32, #tpu.memory_space<vmem>>, vector<1x1x512xf32>
    %107 = vector.shape_cast %106 : vector<1x1x512xf32> to vector<1x512xf32>
    %cst_36 = arith.constant dense<0.000000e+00> : vector<16x512xf32>
    %108 = tpu.matmul %102, %105, %cst_36 {dimension_numbers = #tpu.dot_dimension_numbers<[1], [0], [0], [1], [0, 0, 1, 1], [], []>} : vector<16x32xbf16>, vector<32x512xbf16>, vector<16x512xf32> -> vector<16x512xf32>
    %109 = vector.broadcast %107 : vector<1x512xf32> to vector<16x512xf32>
    %110 = arith.addf %108, %109 : vector<16x512xf32>
    %cst_37 = arith.constant 0.000000e+00 : f32
    %111 = vector.broadcast %cst_37 : f32 to vector<16x512xf32>
    %112 = arith.maximumf %110, %111 : vector<16x512xf32>
    %c0_38 = arith.constant 0 : index
    %c0_39 = arith.constant 0 : index
    %c0_40 = arith.constant 0 : index
    %113 = vector.load %arg8[%c0_38, %c0_39, %c0_40] : memref<1x2048x32xbf16, #tpu.memory_space<vmem>>, vector<1x512x32xbf16>
    %114 = vector.shape_cast %113 : vector<1x512x32xbf16> to vector<512x32xbf16>
    %115 = arith.truncf %112 : vector<16x512xf32> to vector<16x512xbf16>
    %cst_41 = arith.constant dense<0.000000e+00> : vector<16x32xf32>
    %116 = tpu.matmul %115, %114, %cst_41 {dimension_numbers = #tpu.dot_dimension_numbers<[1], [0], [0], [1], [0, 0, 1, 1], [], []>} : vector<16x512xbf16>, vector<512x32xbf16>, vector<16x32xf32> -> vector<16x32xf32>
    %117 = arith.addf %103, %116 : vector<16x32xf32>
    %c0_42 = arith.constant 0 : index
    %c0_43 = arith.constant 0 : index
    %c512 = arith.constant 512 : index
    %118 = vector.load %arg6[%c0_42, %c0_43, %c512] : memref<1x32x2048xbf16, #tpu.memory_space<vmem>>, vector<1x32x512xbf16>
    %119 = vector.shape_cast %118 : vector<1x32x512xbf16> to vector<32x512xbf16>
    %c0_44 = arith.constant 0 : index
    %c0_45 = arith.constant 0 : index
    %c512_46 = arith.constant 512 : index
    %120 = vector.load %arg7[%c0_44, %c0_45, %c512_46] : memref<1x1x2048xf32, #tpu.memory_space<vmem>>, vector<1x1x512xf32>
    %121 = vector.shape_cast %120 : vector<1x1x512xf32> to vector<1x512xf32>
    %cst_47 = arith.constant dense<0.000000e+00> : vector<16x512xf32>
    %122 = tpu.matmul %102, %119, %cst_47 {dimension_numbers = #tpu.dot_dimension_numbers<[1], [0], [0], [1], [0, 0, 1, 1], [], []>} : vector<16x32xbf16>, vector<32x512xbf16>, vector<16x512xf32> -> vector<16x512xf32>
    %123 = vector.broadcast %121 : vector<1x512xf32> to vector<16x512xf32>
    %124 = arith.addf %122, %123 : vector<16x512xf32>
    %cst_48 = arith.constant 0.000000e+00 : f32
    %125 = vector.broadcast %cst_48 : f32 to vector<16x512xf32>
    %126 = arith.maximumf %124, %125 : vector<16x512xf32>
    %c0_49 = arith.constant 0 : index
    %c512_50 = arith.constant 512 : index
    %c0_51 = arith.constant 0 : index
    %127 = vector.load %arg8[%c0_49, %c512_50, %c0_51] : memref<1x2048x32xbf16, #tpu.memory_space<vmem>>, vector<1x512x32xbf16>
    %128 = vector.shape_cast %127 : vector<1x512x32xbf16> to vector<512x32xbf16>
    %129 = arith.truncf %126 : vector<16x512xf32> to vector<16x512xbf16>
    %cst_52 = arith.constant dense<0.000000e+00> : vector<16x32xf32>
    %130 = tpu.matmul %129, %128, %cst_52 {dimension_numbers = #tpu.dot_dimension_numbers<[1], [0], [0], [1], [0, 0, 1, 1], [], []>} : vector<16x512xbf16>, vector<512x32xbf16>, vector<16x32xf32> -> vector<16x32xf32>
    %131 = arith.addf %117, %130 : vector<16x32xf32>
    %c0_53 = arith.constant 0 : index
    %c0_54 = arith.constant 0 : index
    %c1024 = arith.constant 1024 : index
    %132 = vector.load %arg6[%c0_53, %c0_54, %c1024] : memref<1x32x2048xbf16, #tpu.memory_space<vmem>>, vector<1x32x512xbf16>
    %133 = vector.shape_cast %132 : vector<1x32x512xbf16> to vector<32x512xbf16>
    %c0_55 = arith.constant 0 : index
    %c0_56 = arith.constant 0 : index
    %c1024_57 = arith.constant 1024 : index
    %134 = vector.load %arg7[%c0_55, %c0_56, %c1024_57] : memref<1x1x2048xf32, #tpu.memory_space<vmem>>, vector<1x1x512xf32>
    %135 = vector.shape_cast %134 : vector<1x1x512xf32> to vector<1x512xf32>
    %cst_58 = arith.constant dense<0.000000e+00> : vector<16x512xf32>
    %136 = tpu.matmul %102, %133, %cst_58 {dimension_numbers = #tpu.dot_dimension_numbers<[1], [0], [0], [1], [0, 0, 1, 1], [], []>} : vector<16x32xbf16>, vector<32x512xbf16>, vector<16x512xf32> -> vector<16x512xf32>
    %137 = vector.broadcast %135 : vector<1x512xf32> to vector<16x512xf32>
    %138 = arith.addf %136, %137 : vector<16x512xf32>
    %cst_59 = arith.constant 0.000000e+00 : f32
    %139 = vector.broadcast %cst_59 : f32 to vector<16x512xf32>
    %140 = arith.maximumf %138, %139 : vector<16x512xf32>
    %c0_60 = arith.constant 0 : index
    %c1024_61 = arith.constant 1024 : index
    %c0_62 = arith.constant 0 : index
    %141 = vector.load %arg8[%c0_60, %c1024_61, %c0_62] : memref<1x2048x32xbf16, #tpu.memory_space<vmem>>, vector<1x512x32xbf16>
    %142 = vector.shape_cast %141 : vector<1x512x32xbf16> to vector<512x32xbf16>
    %143 = arith.truncf %140 : vector<16x512xf32> to vector<16x512xbf16>
    %cst_63 = arith.constant dense<0.000000e+00> : vector<16x32xf32>
    %144 = tpu.matmul %143, %142, %cst_63 {dimension_numbers = #tpu.dot_dimension_numbers<[1], [0], [0], [1], [0, 0, 1, 1], [], []>} : vector<16x512xbf16>, vector<512x32xbf16>, vector<16x32xf32> -> vector<16x32xf32>
    %145 = arith.addf %131, %144 : vector<16x32xf32>
    %c0_64 = arith.constant 0 : index
    %c0_65 = arith.constant 0 : index
    %c1536 = arith.constant 1536 : index
    %146 = vector.load %arg6[%c0_64, %c0_65, %c1536] : memref<1x32x2048xbf16, #tpu.memory_space<vmem>>, vector<1x32x512xbf16>
    %147 = vector.shape_cast %146 : vector<1x32x512xbf16> to vector<32x512xbf16>
    %c0_66 = arith.constant 0 : index
    %c0_67 = arith.constant 0 : index
    %c1536_68 = arith.constant 1536 : index
    %148 = vector.load %arg7[%c0_66, %c0_67, %c1536_68] : memref<1x1x2048xf32, #tpu.memory_space<vmem>>, vector<1x1x512xf32>
    %149 = vector.shape_cast %148 : vector<1x1x512xf32> to vector<1x512xf32>
    %cst_69 = arith.constant dense<0.000000e+00> : vector<16x512xf32>
    %150 = tpu.matmul %102, %147, %cst_69 {dimension_numbers = #tpu.dot_dimension_numbers<[1], [0], [0], [1], [0, 0, 1, 1], [], []>} : vector<16x32xbf16>, vector<32x512xbf16>, vector<16x512xf32> -> vector<16x512xf32>
    %151 = vector.broadcast %149 : vector<1x512xf32> to vector<16x512xf32>
    %152 = arith.addf %150, %151 : vector<16x512xf32>
    %cst_70 = arith.constant 0.000000e+00 : f32
    %153 = vector.broadcast %cst_70 : f32 to vector<16x512xf32>
    %154 = arith.maximumf %152, %153 : vector<16x512xf32>
    %c0_71 = arith.constant 0 : index
    %c1536_72 = arith.constant 1536 : index
    %c0_73 = arith.constant 0 : index
    %155 = vector.load %arg8[%c0_71, %c1536_72, %c0_73] : memref<1x2048x32xbf16, #tpu.memory_space<vmem>>, vector<1x512x32xbf16>
    %156 = vector.shape_cast %155 : vector<1x512x32xbf16> to vector<512x32xbf16>
    %157 = arith.truncf %154 : vector<16x512xf32> to vector<16x512xbf16>
    %cst_74 = arith.constant dense<0.000000e+00> : vector<16x32xf32>
    %158 = tpu.matmul %157, %156, %cst_74 {dimension_numbers = #tpu.dot_dimension_numbers<[1], [0], [0], [1], [0, 0, 1, 1], [], []>} : vector<16x512xbf16>, vector<512x32xbf16>, vector<16x32xf32> -> vector<16x32xf32>
    %159 = arith.addf %145, %158 : vector<16x32xf32>
    %c0_75 = arith.constant 0 : index
    %c0_76 = arith.constant 0 : index
    %c0_77 = arith.constant 0 : index
    %160 = vector.load %arg9[%c0_75, %c0_76, %c0_77] : memref<1x1x32xf32, #tpu.memory_space<vmem>>, vector<1x1x32xf32>
    %161 = vector.shape_cast %160 : vector<1x1x32xf32> to vector<1x32xf32>
    %162 = vector.broadcast %161 : vector<1x32xf32> to vector<16x32xf32>
    %163 = arith.addf %159, %162 : vector<16x32xf32>
    %164 = vector.shape_cast %163 : vector<16x32xf32> to vector<2x8x32xf32>
    %c0_78 = arith.constant 0 : index
    %c0_79 = arith.constant 0 : index
    %c0_80 = arith.constant 0 : index
    %165 = vector.load %arg10[%c0_78, %c0_79, %c0_80] : memref<1x1x32xf32, #tpu.memory_space<vmem>>, vector<1x1x32xf32>
    %166 = vector.shape_cast %165 : vector<1x1x32xf32> to vector<1x32xf32>
    %c0_81 = arith.constant 0 : index
    %c0_82 = arith.constant 0 : index
    %c0_83 = arith.constant 0 : index
    %167 = vector.load %arg11[%c0_81, %c0_82, %c0_83] : memref<1x1x32xf32, #tpu.memory_space<vmem>>, vector<1x1x32xf32>
    %168 = vector.shape_cast %167 : vector<1x1x32xf32> to vector<1x32xf32>
    %169 = arith.addf %164, %100 : vector<2x8x32xf32>
    %cst_84 = arith.constant dense<0.000000e+00> : vector<2x8xf32>
    %170 = vector.multi_reduction <add>, %169, %cst_84 [2] : vector<2x8x32xf32> to vector<2x8xf32>
    %171 = vector.shape_cast %170 : vector<2x8xf32> to vector<2x8x1xf32>
    %cst_85 = arith.constant 3.200000e+01 : f32
    %172 = vector.broadcast %cst_85 : f32 to vector<2x8x1xf32>
    %173 = arith.divf %171, %172 : vector<2x8x1xf32>
    %174 = vector.broadcast %173 : vector<2x8x1xf32> to vector<2x8x32xf32>
    %175 = arith.subf %169, %174 : vector<2x8x32xf32>
    %176 = arith.mulf %175, %175 : vector<2x8x32xf32>
    %cst_86 = arith.constant dense<0.000000e+00> : vector<2x8xf32>
    %177 = vector.multi_reduction <add>, %176, %cst_86 [2] : vector<2x8x32xf32> to vector<2x8xf32>
    %178 = vector.shape_cast %177 : vector<2x8xf32> to vector<2x8x1xf32>
    %cst_87 = arith.constant 3.200000e+01 : f32
    %179 = vector.broadcast %cst_87 : f32 to vector<2x8x1xf32>
    %180 = arith.divf %178, %179 : vector<2x8x1xf32>
    %181 = vector.broadcast %173 : vector<2x8x1xf32> to vector<2x8x32xf32>
    %182 = arith.subf %169, %181 : vector<2x8x32xf32>
    %cst_88 = arith.constant 9.99999974E-6 : f32
    %183 = vector.broadcast %cst_88 : f32 to vector<2x8x1xf32>
    %184 = arith.addf %180, %183 : vector<2x8x1xf32>
    %185 = math.rsqrt %184 : vector<2x8x1xf32>
    %186 = vector.broadcast %185 : vector<2x8x1xf32> to vector<2x8x32xf32>
    %187 = arith.mulf %182, %186 : vector<2x8x32xf32>
    %188 = vector.shape_cast %166 : vector<1x32xf32> to vector<1x1x32xf32>
    %189 = vector.broadcast %188 : vector<1x1x32xf32> to vector<2x8x32xf32>
    %190 = arith.mulf %187, %189 : vector<2x8x32xf32>
    %191 = vector.shape_cast %168 : vector<1x32xf32> to vector<1x1x32xf32>
    %192 = vector.broadcast %191 : vector<1x1x32xf32> to vector<2x8x32xf32>
    %193 = arith.addf %190, %192 : vector<2x8x32xf32>
    %c0_89 = arith.constant 0 : index
    %c0_90 = arith.constant 0 : index
    %c0_91 = arith.constant 0 : index
    %194 = vector.load %arg13[%c0_89, %c0_90, %c0_91] : memref<2x8x32xf32, #tpu.memory_space<vmem>>, vector<2x8x32xf32>
    tpu.vector_store %arg13[%c0_89, %c0_90, %c0_91], %193 {strides = array<i32>} : memref<2x8x32xf32, #tpu.memory_space<vmem>>, vector<2x8x32xf32>,
    %c5_i32 = arith.constant 5 : i32
    %195 = arith.cmpi eq, %arg0, %c5_i32 : i32
    %196 = arith.extui %195 : i1 to i32
    %c0_i32_92 = arith.constant 0 : i32
    %197 = arith.cmpi ne, %196, %c0_i32_92 : i32
    scf.if %197 {
      %c0_93 = arith.constant 0 : index
      %c0_94 = arith.constant 0 : index
      %c0_95 = arith.constant 0 : index
      %198 = vector.load %arg12[%c0_93, %c0_94, %c0_95] : memref<2x8x32xf32, #tpu.memory_space<vmem>>, vector<2x8x32xf32>
      tpu.vector_store %arg12[%c0_93, %c0_94, %c0_95], %193 {strides = array<i32>} : memref<2x8x32xf32, #tpu.memory_space<vmem>>, vector<2x8x32xf32>,
    } else {
    }
    return
  }
  func.func @transform_0(%arg0: i32) -> (i32, i32, i32) {
    %c0_i32 = arith.constant 0 : i32
    %c0_i32_0 = arith.constant 0 : i32
    %c0_i32_1 = arith.constant 0 : i32
    %c0_i32_2 = arith.constant 0 : i32
    return %c0_i32, %c0_i32_0, %c0_i32_1 : i32, i32, i32
  }
  func.func @transform_1(%arg0: i32) -> (i32, i32, i32) {
    %c0_i32 = arith.constant 0 : i32
    %c0_i32_0 = arith.constant 0 : i32
    %c0_i32_1 = arith.constant 0 : i32
    return %arg0, %c0_i32, %c0_i32_0 : i32, i32, i32
  }
  func.func @transform_2(%arg0: i32) -> (i32, i32, i32) {
    %c0_i32 = arith.constant 0 : i32
    %c0_i32_0 = arith.constant 0 : i32
    %c0_i32_1 = arith.constant 0 : i32
    return %arg0, %c0_i32, %c0_i32_0 : i32, i32, i32
  }
  func.func @transform_3(%arg0: i32) -> (i32, i32, i32) {
    %c0_i32 = arith.constant 0 : i32
    %c0_i32_0 = arith.constant 0 : i32
    %c0_i32_1 = arith.constant 0 : i32
    return %arg0, %c0_i32, %c0_i32_0 : i32, i32, i32
  }
  func.func @transform_4(%arg0: i32) -> (i32, i32, i32) {
    %c0_i32 = arith.constant 0 : i32
    %c0_i32_0 = arith.constant 0 : i32
    %c0_i32_1 = arith.constant 0 : i32
    return %arg0, %c0_i32, %c0_i32_0 : i32, i32, i32
  }
  func.func @transform_5(%arg0: i32) -> (i32, i32, i32) {
    %c0_i32 = arith.constant 0 : i32
    %c0_i32_0 = arith.constant 0 : i32
    %c0_i32_1 = arith.constant 0 : i32
    return %arg0, %c0_i32, %c0_i32_0 : i32, i32, i32
  }
  func.func @transform_6(%arg0: i32) -> (i32, i32, i32) {
    %c0_i32 = arith.constant 0 : i32
    %c0_i32_0 = arith.constant 0 : i32
    %c0_i32_1 = arith.constant 0 : i32
    return %arg0, %c0_i32, %c0_i32_0 : i32, i32, i32
  }
  func.func @transform_7(%arg0: i32) -> (i32, i32, i32) {
    %c0_i32 = arith.constant 0 : i32
    %c0_i32_0 = arith.constant 0 : i32
    %c0_i32_1 = arith.constant 0 : i32
    return %arg0, %c0_i32, %c0_i32_0 : i32, i32, i32
  }
  func.func @transform_8(%arg0: i32) -> (i32, i32, i32) {
    %c0_i32 = arith.constant 0 : i32
    %c0_i32_0 = arith.constant 0 : i32
    %c0_i32_1 = arith.constant 0 : i32
    return %arg0, %c0_i32, %c0_i32_0 : i32, i32, i32
  }
  func.func @transform_9(%arg0: i32) -> (i32, i32, i32) {
    %c0_i32 = arith.constant 0 : i32
    %c0_i32_0 = arith.constant 0 : i32
    %c0_i32_1 = arith.constant 0 : i32
    return %arg0, %c0_i32, %c0_i32_0 : i32, i32, i32
  }
  func.func @transform_10(%arg0: i32) -> (i32, i32, i32) {
    %c0_i32 = arith.constant 0 : i32
    %c0_i32_0 = arith.constant 0 : i32
    %c0_i32_1 = arith.constant 0 : i32
    return %arg0, %c0_i32, %c0_i32_0 : i32, i32, i32
  }
  func.func @transform_11(%arg0: i32) -> (i32, i32, i32) {
    %c0_i32 = arith.constant 0 : i32
    %c0_i32_0 = arith.constant 0 : i32
    %c0_i32_1 = arith.constant 0 : i32
    %c0_i32_2 = arith.constant 0 : i32
    return %c0_i32, %c0_i32_0, %c0_i32_1 : i32, i32, i32
  }
}

module attributes {stable_mosaic.version = 11 : i64} {
  func.func @decoder_kernel(%arg0: i32, %arg1: memref<2x8x32xf32, #tpu.memory_space<vmem>>, %arg2: memref<2x8x32xf32, #tpu.memory_space<vmem>>, %arg3: memref<8x8xf32, #tpu.memory_space<vmem>>, %arg4: memref<1x32x96xbf16, #tpu.memory_space<vmem>>, %arg5: memref<1x32x32xbf16, #tpu.memory_space<vmem>>, %arg6: memref<1x1x32xf32, #tpu.memory_space<vmem>>, %arg7: memref<1x1x32xf32, #tpu.memory_space<vmem>>, %arg8: memref<1x32x32xbf16, #tpu.memory_space<vmem>>, %arg9: memref<1x32x64xbf16, #tpu.memory_space<vmem>>, %arg10: memref<1x32x32xbf16, #tpu.memory_space<vmem>>, %arg11: memref<1x1x32xf32, #tpu.memory_space<vmem>>, %arg12: memref<1x1x32xf32, #tpu.memory_space<vmem>>, %arg13: memref<1x32x2048xbf16, #tpu.memory_space<vmem>>, %arg14: memref<1x1x2048xf32, #tpu.memory_space<vmem>>, %arg15: memref<1x2048x32xbf16, #tpu.memory_space<vmem>>, %arg16: memref<1x1x32xf32, #tpu.memory_space<vmem>>, %arg17: memref<1x1x32xf32, #tpu.memory_space<vmem>>, %arg18: memref<1x1x32xf32, #tpu.memory_space<vmem>>, %arg19: memref<32x128xbf16, #tpu.memory_space<vmem>>, %arg20: memref<1x128xf32, #tpu.memory_space<vmem>>, %arg21: memref<2x8x128xf32, #tpu.memory_space<vmem>>, %arg22: memref<2x8x32xf32, #tpu.memory_space<vmem>>) attributes {dimension_semantics = [#tpu.dimension_semantics<arbitrary>], iteration_bounds = array<i64: 6>, scalar_prefetch = 0 : i64, scratch_operands = 1 : i64, tpu.core_type = #tpu.core_type<tc>, window_params = [{pipeline_mode = #tpu.pipeline_mode<synchronous>, transform_indices = @transform_0, window_bounds = array<i64: 2, 8, 32>}, {pipeline_mode = #tpu.pipeline_mode<synchronous>, transform_indices = @transform_1, window_bounds = array<i64: 2, 8, 32>}, {pipeline_mode = #tpu.pipeline_mode<synchronous>, transform_indices = @transform_2, window_bounds = array<i64: 8, 8>}, {transform_indices = @transform_3, window_bounds = array<i64: 1, 32, 96>}, {transform_indices = @transform_4, window_bounds = array<i64: 1, 32, 32>}, {transform_indices = @transform_5, window_bounds = array<i64: 1, 1, 32>}, {transform_indices = @transform_6, window_bounds = array<i64: 1, 1, 32>}, {transform_indices = @transform_7, window_bounds = array<i64: 1, 32, 32>}, {transform_indices = @transform_8, window_bounds = array<i64: 1, 32, 64>}, {transform_indices = @transform_9, window_bounds = array<i64: 1, 32, 32>}, {transform_indices = @transform_10, window_bounds = array<i64: 1, 1, 32>}, {transform_indices = @transform_11, window_bounds = array<i64: 1, 1, 32>}, {transform_indices = @transform_12, window_bounds = array<i64: 1, 32, 2048>}, {transform_indices = @transform_13, window_bounds = array<i64: 1, 1, 2048>}, {transform_indices = @transform_14, window_bounds = array<i64: 1, 2048, 32>}, {transform_indices = @transform_15, window_bounds = array<i64: 1, 1, 32>}, {transform_indices = @transform_16, window_bounds = array<i64: 1, 1, 32>}, {transform_indices = @transform_17, window_bounds = array<i64: 1, 1, 32>}, {pipeline_mode = #tpu.pipeline_mode<synchronous>, transform_indices = @transform_18, window_bounds = array<i64: 32, 128>}, {pipeline_mode = #tpu.pipeline_mode<synchronous>, transform_indices = @transform_19, window_bounds = array<i64: 1, 128>}, {pipeline_mode = #tpu.pipeline_mode<synchronous>, transform_indices = @transform_20, window_bounds = array<i64: 2, 8, 128>}]} {
    %c0_i32 = arith.constant 0 : i32
    %0 = arith.cmpi eq, %arg0, %c0_i32 : i32
    %1 = arith.extui %0 : i1 to i32
    %c0_i32_0 = arith.constant 0 : i32
    %2 = arith.cmpi ne, %1, %c0_i32_0 : i32
    scf.if %2 {
      %c0_129 = arith.constant 0 : index
      %c0_130 = arith.constant 0 : index
      %c0_131 = arith.constant 0 : index
      %305 = vector.load %arg1[%c0_129, %c0_130, %c0_131] : memref<2x8x32xf32, #tpu.memory_space<vmem>>, vector<2x8x32xf32>
      %c0_132 = arith.constant 0 : index
      %c0_133 = arith.constant 0 : index
      %c0_134 = arith.constant 0 : index
      %306 = vector.load %arg22[%c0_132, %c0_133, %c0_134] : memref<2x8x32xf32, #tpu.memory_space<vmem>>, vector<2x8x32xf32>
      tpu.vector_store %arg22[%c0_132, %c0_133, %c0_134], %305 {strides = array<i32>} : memref<2x8x32xf32, #tpu.memory_space<vmem>>, vector<2x8x32xf32>,
    } else {
    }
    %c0 = arith.constant 0 : index
    %c0_1 = arith.constant 0 : index
    %c0_2 = arith.constant 0 : index
    %3 = vector.load %arg22[%c0, %c0_1, %c0_2] : memref<2x8x32xf32, #tpu.memory_space<vmem>>, vector<2x8x32xf32>
    %c0_3 = arith.constant 0 : index
    %c0_4 = arith.constant 0 : index
    %4 = vector.load %arg3[%c0_3, %c0_4] : memref<8x8xf32, #tpu.memory_space<vmem>>, vector<8x8xf32>
    %5 = vector.shape_cast %3 : vector<2x8x32xf32> to vector<16x32xf32>
    %6 = arith.truncf %5 : vector<16x32xf32> to vector<16x32xbf16>
    %c0_5 = arith.constant 0 : index
    %c0_6 = arith.constant 0 : index
    %c0_7 = arith.constant 0 : index
    %7 = vector.load %arg4[%c0_5, %c0_6, %c0_7] : memref<1x32x96xbf16, #tpu.memory_space<vmem>>, vector<1x32x96xbf16>
    %8 = vector.shape_cast %7 : vector<1x32x96xbf16> to vector<32x96xbf16>
    %cst = arith.constant dense<0.000000e+00> : vector<16x96xf32>
    %9 = tpu.matmul %6, %8, %cst {dimension_numbers = #tpu.dot_dimension_numbers<[1], [0], [0], [1], [0, 0, 1, 1], [], []>} : vector<16x32xbf16>, vector<32x96xbf16>, vector<16x96xf32> -> vector<16x96xf32>
    %10 = arith.truncf %9 : vector<16x96xf32> to vector<16x96xbf16>
    %11 = vector.extract_strided_slice %10 {offsets = [0, 0], sizes = [16, 32], strides = [1, 1]} : vector<16x96xbf16> to vector<16x32xbf16>
    %12 = vector.extract_strided_slice %10 {offsets = [0, 32], sizes = [16, 32], strides = [1, 1]} : vector<16x96xbf16> to vector<16x32xbf16>
    %13 = vector.extract_strided_slice %10 {offsets = [0, 64], sizes = [16, 32], strides = [1, 1]} : vector<16x96xbf16> to vector<16x32xbf16>
    %c0_8 = arith.constant 0 : index
    %c0_9 = arith.constant 0 : index
    %c0_10 = arith.constant 0 : index
    %14 = vector.load %arg5[%c0_8, %c0_9, %c0_10] : memref<1x32x32xbf16, #tpu.memory_space<vmem>>, vector<1x32x32xbf16>
    %15 = vector.shape_cast %14 : vector<1x32x32xbf16> to vector<32x32xbf16>
    %16 = vector.shape_cast %11 : vector<16x32xbf16> to vector<2x8x32xbf16>
    %17 = vector.shape_cast %12 : vector<16x32xbf16> to vector<2x8x32xbf16>
    %18 = vector.shape_cast %13 : vector<16x32xbf16> to vector<2x8x32xbf16>
    %19 = vector.extract_strided_slice %16 {offsets = [0, 0, 0], sizes = [2, 8, 8], strides = [1, 1, 1]} : vector<2x8x32xbf16> to vector<2x8x8xbf16>
    %20 = vector.extract_strided_slice %16 {offsets = [0, 0, 8], sizes = [2, 8, 8], strides = [1, 1, 1]} : vector<2x8x32xbf16> to vector<2x8x8xbf16>
    %21 = vector.extract_strided_slice %16 {offsets = [0, 0, 16], sizes = [2, 8, 8], strides = [1, 1, 1]} : vector<2x8x32xbf16> to vector<2x8x8xbf16>
    %22 = vector.extract_strided_slice %16 {offsets = [0, 0, 24], sizes = [2, 8, 8], strides = [1, 1, 1]} : vector<2x8x32xbf16> to vector<2x8x8xbf16>
    %23 = tpu.concatenate %19, %20, %21, %22 in 0 : vector<2x8x8xbf16>, vector<2x8x8xbf16>, vector<2x8x8xbf16>, vector<2x8x8xbf16> -> vector<8x8x8xbf16>
    %24 = vector.extract_strided_slice %17 {offsets = [0, 0, 0], sizes = [2, 8, 8], strides = [1, 1, 1]} : vector<2x8x32xbf16> to vector<2x8x8xbf16>
    %25 = vector.extract_strided_slice %17 {offsets = [0, 0, 8], sizes = [2, 8, 8], strides = [1, 1, 1]} : vector<2x8x32xbf16> to vector<2x8x8xbf16>
    %26 = vector.extract_strided_slice %17 {offsets = [0, 0, 16], sizes = [2, 8, 8], strides = [1, 1, 1]} : vector<2x8x32xbf16> to vector<2x8x8xbf16>
    %27 = vector.extract_strided_slice %17 {offsets = [0, 0, 24], sizes = [2, 8, 8], strides = [1, 1, 1]} : vector<2x8x32xbf16> to vector<2x8x8xbf16>
    %28 = tpu.concatenate %24, %25, %26, %27 in 0 : vector<2x8x8xbf16>, vector<2x8x8xbf16>, vector<2x8x8xbf16>, vector<2x8x8xbf16> -> vector<8x8x8xbf16>
    %29 = vector.extract_strided_slice %18 {offsets = [0, 0, 0], sizes = [2, 8, 8], strides = [1, 1, 1]} : vector<2x8x32xbf16> to vector<2x8x8xbf16>
    %30 = vector.extract_strided_slice %18 {offsets = [0, 0, 8], sizes = [2, 8, 8], strides = [1, 1, 1]} : vector<2x8x32xbf16> to vector<2x8x8xbf16>
    %31 = vector.extract_strided_slice %18 {offsets = [0, 0, 16], sizes = [2, 8, 8], strides = [1, 1, 1]} : vector<2x8x32xbf16> to vector<2x8x8xbf16>
    %32 = vector.extract_strided_slice %18 {offsets = [0, 0, 24], sizes = [2, 8, 8], strides = [1, 1, 1]} : vector<2x8x32xbf16> to vector<2x8x8xbf16>
    %33 = tpu.concatenate %29, %30, %31, %32 in 0 : vector<2x8x8xbf16>, vector<2x8x8xbf16>, vector<2x8x8xbf16>, vector<2x8x8xbf16> -> vector<8x8x8xbf16>
    "tpu.trace_start"() <{level = 10 : i32, message = "bqd,bkd->bqk"}> : () -> ()
    %cst_11 = arith.constant dense<0.000000e+00> : vector<8x8x8xf32>
    %34 = tpu.matmul %23, %28, %cst_11 {dimension_numbers = #tpu.dot_dimension_numbers<[2], [2], [1], [1], [0, 0, 0, 1, 1, 1], [0], [0]>} : vector<8x8x8xbf16>, vector<8x8x8xbf16>, vector<8x8x8xf32> -> vector<8x8x8xf32>
    "tpu.trace_stop"() : () -> ()
    %35 = vector.shape_cast %4 : vector<8x8xf32> to vector<1x8x8xf32>
    %36 = vector.broadcast %35 : vector<1x8x8xf32> to vector<8x8x8xf32>
    %37 = arith.addf %34, %36 : vector<8x8x8xf32>
    %cst_12 = arith.constant dense<0xFF800000> : vector<8x8xf32>
    %38 = vector.multi_reduction <maximumf>, %37, %cst_12 [2] : vector<8x8x8xf32> to vector<8x8xf32>
    %39 = vector.shape_cast %38 : vector<8x8xf32> to vector<8x8x1xf32>
    %40 = vector.broadcast %39 : vector<8x8x1xf32> to vector<8x8x8xf32>
    %41 = arith.subf %37, %40 : vector<8x8x8xf32>
    %42 = math.exp %41 : vector<8x8x8xf32>
    %cst_13 = arith.constant dense<0.000000e+00> : vector<8x8xf32>
    %43 = vector.multi_reduction <add>, %42, %cst_13 [2] : vector<8x8x8xf32> to vector<8x8xf32>
    %44 = vector.shape_cast %43 : vector<8x8xf32> to vector<8x8x1xf32>
    %45 = tpu.reciprocal %44 {approx = true} : vector<8x8x1xf32> -> vector<8x8x1xf32>
    %46 = vector.broadcast %45 : vector<8x8x1xf32> to vector<8x8x8xf32>
    %47 = arith.mulf %42, %46 : vector<8x8x8xf32>
    %48 = arith.truncf %47 : vector<8x8x8xf32> to vector<8x8x8xbf16>
    "tpu.trace_start"() <{level = 10 : i32, message = "bqk,bkd->bqd"}> : () -> ()
    %cst_14 = arith.constant dense<0.000000e+00> : vector<8x8x8xf32>
    %49 = tpu.matmul %48, %33, %cst_14 {dimension_numbers = #tpu.dot_dimension_numbers<[2], [1], [1], [2], [0, 0, 0, 1, 1, 2], [0], [0]>} : vector<8x8x8xbf16>, vector<8x8x8xbf16>, vector<8x8x8xf32> -> vector<8x8x8xf32>
    %cst_15 = arith.constant 0.000000e+00 : f32
    "tpu.trace_stop"() : () -> ()
    %50 = vector.broadcast %cst_15 : f32 to vector<16x32xf32>
    %51 = vector.extract_strided_slice %49 {offsets = [0, 0, 0], sizes = [2, 8, 8], strides = [1, 1, 1]} : vector<8x8x8xf32> to vector<2x8x8xf32>
    %52 = vector.shape_cast %51 : vector<2x8x8xf32> to vector<16x8xf32>
    %53 = arith.truncf %52 : vector<16x8xf32> to vector<16x8xbf16>
    %54 = vector.extract_strided_slice %15 {offsets = [0, 0], sizes = [8, 32], strides = [1, 1]} : vector<32x32xbf16> to vector<8x32xbf16>
    %cst_16 = arith.constant dense<0.000000e+00> : vector<16x32xf32>
    %55 = tpu.matmul %53, %54, %cst_16 {dimension_numbers = #tpu.dot_dimension_numbers<[1], [0], [0], [1], [0, 0, 1, 1], [], []>} : vector<16x8xbf16>, vector<8x32xbf16>, vector<16x32xf32> -> vector<16x32xf32>
    %56 = arith.addf %50, %55 : vector<16x32xf32>
    %57 = vector.extract_strided_slice %49 {offsets = [2, 0, 0], sizes = [2, 8, 8], strides = [1, 1, 1]} : vector<8x8x8xf32> to vector<2x8x8xf32>
    %58 = vector.shape_cast %57 : vector<2x8x8xf32> to vector<16x8xf32>
    %59 = arith.truncf %58 : vector<16x8xf32> to vector<16x8xbf16>
    %60 = vector.extract_strided_slice %15 {offsets = [8, 0], sizes = [8, 32], strides = [1, 1]} : vector<32x32xbf16> to vector<8x32xbf16>
    %cst_17 = arith.constant dense<0.000000e+00> : vector<16x32xf32>
    %61 = tpu.matmul %59, %60, %cst_17 {dimension_numbers = #tpu.dot_dimension_numbers<[1], [0], [0], [1], [0, 0, 1, 1], [], []>} : vector<16x8xbf16>, vector<8x32xbf16>, vector<16x32xf32> -> vector<16x32xf32>
    %62 = arith.addf %56, %61 : vector<16x32xf32>
    %63 = vector.extract_strided_slice %49 {offsets = [4, 0, 0], sizes = [2, 8, 8], strides = [1, 1, 1]} : vector<8x8x8xf32> to vector<2x8x8xf32>
    %64 = vector.shape_cast %63 : vector<2x8x8xf32> to vector<16x8xf32>
    %65 = arith.truncf %64 : vector<16x8xf32> to vector<16x8xbf16>
    %66 = vector.extract_strided_slice %15 {offsets = [16, 0], sizes = [8, 32], strides = [1, 1]} : vector<32x32xbf16> to vector<8x32xbf16>
    %cst_18 = arith.constant dense<0.000000e+00> : vector<16x32xf32>
    %67 = tpu.matmul %65, %66, %cst_18 {dimension_numbers = #tpu.dot_dimension_numbers<[1], [0], [0], [1], [0, 0, 1, 1], [], []>} : vector<16x8xbf16>, vector<8x32xbf16>, vector<16x32xf32> -> vector<16x32xf32>
    %68 = arith.addf %62, %67 : vector<16x32xf32>
    %69 = vector.extract_strided_slice %49 {offsets = [6, 0, 0], sizes = [2, 8, 8], strides = [1, 1, 1]} : vector<8x8x8xf32> to vector<2x8x8xf32>
    %70 = vector.shape_cast %69 : vector<2x8x8xf32> to vector<16x8xf32>
    %71 = arith.truncf %70 : vector<16x8xf32> to vector<16x8xbf16>
    %72 = vector.extract_strided_slice %15 {offsets = [24, 0], sizes = [8, 32], strides = [1, 1]} : vector<32x32xbf16> to vector<8x32xbf16>
    %cst_19 = arith.constant dense<0.000000e+00> : vector<16x32xf32>
    %73 = tpu.matmul %71, %72, %cst_19 {dimension_numbers = #tpu.dot_dimension_numbers<[1], [0], [0], [1], [0, 0, 1, 1], [], []>} : vector<16x8xbf16>, vector<8x32xbf16>, vector<16x32xf32> -> vector<16x32xf32>
    %74 = arith.addf %68, %73 : vector<16x32xf32>
    %75 = vector.shape_cast %74 : vector<16x32xf32> to vector<2x8x32xf32>
    %c0_20 = arith.constant 0 : index
    %c0_21 = arith.constant 0 : index
    %c0_22 = arith.constant 0 : index
    %76 = vector.load %arg6[%c0_20, %c0_21, %c0_22] : memref<1x1x32xf32, #tpu.memory_space<vmem>>, vector<1x1x32xf32>
    %77 = vector.shape_cast %76 : vector<1x1x32xf32> to vector<1x32xf32>
    %c0_23 = arith.constant 0 : index
    %c0_24 = arith.constant 0 : index
    %c0_25 = arith.constant 0 : index
    %78 = vector.load %arg7[%c0_23, %c0_24, %c0_25] : memref<1x1x32xf32, #tpu.memory_space<vmem>>, vector<1x1x32xf32>
    %79 = vector.shape_cast %78 : vector<1x1x32xf32> to vector<1x32xf32>
    %80 = arith.addf %75, %3 : vector<2x8x32xf32>
    %cst_26 = arith.constant dense<0.000000e+00> : vector<2x8xf32>
    %81 = vector.multi_reduction <add>, %80, %cst_26 [2] : vector<2x8x32xf32> to vector<2x8xf32>
    %82 = vector.shape_cast %81 : vector<2x8xf32> to vector<2x8x1xf32>
    %cst_27 = arith.constant 3.200000e+01 : f32
    %83 = vector.broadcast %cst_27 : f32 to vector<2x8x1xf32>
    %84 = arith.divf %82, %83 : vector<2x8x1xf32>
    %85 = vector.broadcast %84 : vector<2x8x1xf32> to vector<2x8x32xf32>
    %86 = arith.subf %80, %85 : vector<2x8x32xf32>
    %87 = arith.mulf %86, %86 : vector<2x8x32xf32>
    %cst_28 = arith.constant dense<0.000000e+00> : vector<2x8xf32>
    %88 = vector.multi_reduction <add>, %87, %cst_28 [2] : vector<2x8x32xf32> to vector<2x8xf32>
    %89 = vector.shape_cast %88 : vector<2x8xf32> to vector<2x8x1xf32>
    %cst_29 = arith.constant 3.200000e+01 : f32
    %90 = vector.broadcast %cst_29 : f32 to vector<2x8x1xf32>
    %91 = arith.divf %89, %90 : vector<2x8x1xf32>
    %92 = vector.broadcast %84 : vector<2x8x1xf32> to vector<2x8x32xf32>
    %93 = arith.subf %80, %92 : vector<2x8x32xf32>
    %cst_30 = arith.constant 9.99999974E-6 : f32
    %94 = vector.broadcast %cst_30 : f32 to vector<2x8x1xf32>
    %95 = arith.addf %91, %94 : vector<2x8x1xf32>
    %96 = math.rsqrt %95 : vector<2x8x1xf32>
    %97 = vector.broadcast %96 : vector<2x8x1xf32> to vector<2x8x32xf32>
    %98 = arith.mulf %93, %97 : vector<2x8x32xf32>
    %99 = vector.shape_cast %77 : vector<1x32xf32> to vector<1x1x32xf32>
    %100 = vector.broadcast %99 : vector<1x1x32xf32> to vector<2x8x32xf32>
    %101 = arith.mulf %98, %100 : vector<2x8x32xf32>
    %102 = vector.shape_cast %79 : vector<1x32xf32> to vector<1x1x32xf32>
    %103 = vector.broadcast %102 : vector<1x1x32xf32> to vector<2x8x32xf32>
    %104 = arith.addf %101, %103 : vector<2x8x32xf32>
    %105 = vector.shape_cast %104 : vector<2x8x32xf32> to vector<16x32xf32>
    %106 = arith.truncf %105 : vector<16x32xf32> to vector<16x32xbf16>
    %c0_31 = arith.constant 0 : index
    %c0_32 = arith.constant 0 : index
    %c0_33 = arith.constant 0 : index
    %107 = vector.load %arg8[%c0_31, %c0_32, %c0_33] : memref<1x32x32xbf16, #tpu.memory_space<vmem>>, vector<1x32x32xbf16>
    %108 = vector.shape_cast %107 : vector<1x32x32xbf16> to vector<32x32xbf16>
    %cst_34 = arith.constant dense<0.000000e+00> : vector<16x32xf32>
    %109 = tpu.matmul %106, %108, %cst_34 {dimension_numbers = #tpu.dot_dimension_numbers<[1], [0], [0], [1], [0, 0, 1, 1], [], []>} : vector<16x32xbf16>, vector<32x32xbf16>, vector<16x32xf32> -> vector<16x32xf32>
    %110 = arith.truncf %109 : vector<16x32xf32> to vector<16x32xbf16>
    %c0_35 = arith.constant 0 : index
    %c0_36 = arith.constant 0 : index
    %c0_37 = arith.constant 0 : index
    %111 = vector.load %arg2[%c0_35, %c0_36, %c0_37] : memref<2x8x32xf32, #tpu.memory_space<vmem>>, vector<2x8x32xf32>
    %112 = vector.shape_cast %111 : vector<2x8x32xf32> to vector<16x32xf32>
    %113 = arith.truncf %112 : vector<16x32xf32> to vector<16x32xbf16>
    %c0_38 = arith.constant 0 : index
    %c0_39 = arith.constant 0 : index
    %c0_40 = arith.constant 0 : index
    %114 = vector.load %arg9[%c0_38, %c0_39, %c0_40] : memref<1x32x64xbf16, #tpu.memory_space<vmem>>, vector<1x32x64xbf16>
    %115 = vector.shape_cast %114 : vector<1x32x64xbf16> to vector<32x64xbf16>
    %cst_41 = arith.constant dense<0.000000e+00> : vector<16x64xf32>
    %116 = tpu.matmul %113, %115, %cst_41 {dimension_numbers = #tpu.dot_dimension_numbers<[1], [0], [0], [1], [0, 0, 1, 1], [], []>} : vector<16x32xbf16>, vector<32x64xbf16>, vector<16x64xf32> -> vector<16x64xf32>
    %117 = arith.truncf %116 : vector<16x64xf32> to vector<16x64xbf16>
    %118 = vector.extract_strided_slice %117 {offsets = [0, 0], sizes = [16, 32], strides = [1, 1]} : vector<16x64xbf16> to vector<16x32xbf16>
    %119 = vector.extract_strided_slice %117 {offsets = [0, 32], sizes = [16, 32], strides = [1, 1]} : vector<16x64xbf16> to vector<16x32xbf16>
    %c0_42 = arith.constant 0 : index
    %c0_43 = arith.constant 0 : index
    %c0_44 = arith.constant 0 : index
    %120 = vector.load %arg10[%c0_42, %c0_43, %c0_44] : memref<1x32x32xbf16, #tpu.memory_space<vmem>>, vector<1x32x32xbf16>
    %121 = vector.shape_cast %120 : vector<1x32x32xbf16> to vector<32x32xbf16>
    %122 = vector.shape_cast %110 : vector<16x32xbf16> to vector<2x8x32xbf16>
    %123 = vector.shape_cast %118 : vector<16x32xbf16> to vector<2x8x32xbf16>
    %124 = vector.shape_cast %119 : vector<16x32xbf16> to vector<2x8x32xbf16>
    %125 = vector.extract_strided_slice %122 {offsets = [0, 0, 0], sizes = [2, 8, 8], strides = [1, 1, 1]} : vector<2x8x32xbf16> to vector<2x8x8xbf16>
    %126 = vector.extract_strided_slice %122 {offsets = [0, 0, 8], sizes = [2, 8, 8], strides = [1, 1, 1]} : vector<2x8x32xbf16> to vector<2x8x8xbf16>
    %127 = vector.extract_strided_slice %122 {offsets = [0, 0, 16], sizes = [2, 8, 8], strides = [1, 1, 1]} : vector<2x8x32xbf16> to vector<2x8x8xbf16>
    %128 = vector.extract_strided_slice %122 {offsets = [0, 0, 24], sizes = [2, 8, 8], strides = [1, 1, 1]} : vector<2x8x32xbf16> to vector<2x8x8xbf16>
    %129 = tpu.concatenate %125, %126, %127, %128 in 0 : vector<2x8x8xbf16>, vector<2x8x8xbf16>, vector<2x8x8xbf16>, vector<2x8x8xbf16> -> vector<8x8x8xbf16>
    %130 = vector.extract_strided_slice %123 {offsets = [0, 0, 0], sizes = [2, 8, 8], strides = [1, 1, 1]} : vector<2x8x32xbf16> to vector<2x8x8xbf16>
    %131 = vector.extract_strided_slice %123 {offsets = [0, 0, 8], sizes = [2, 8, 8], strides = [1, 1, 1]} : vector<2x8x32xbf16> to vector<2x8x8xbf16>
    %132 = vector.extract_strided_slice %123 {offsets = [0, 0, 16], sizes = [2, 8, 8], strides = [1, 1, 1]} : vector<2x8x32xbf16> to vector<2x8x8xbf16>
    %133 = vector.extract_strided_slice %123 {offsets = [0, 0, 24], sizes = [2, 8, 8], strides = [1, 1, 1]} : vector<2x8x32xbf16> to vector<2x8x8xbf16>
    %134 = tpu.concatenate %130, %131, %132, %133 in 0 : vector<2x8x8xbf16>, vector<2x8x8xbf16>, vector<2x8x8xbf16>, vector<2x8x8xbf16> -> vector<8x8x8xbf16>
    %135 = vector.extract_strided_slice %124 {offsets = [0, 0, 0], sizes = [2, 8, 8], strides = [1, 1, 1]} : vector<2x8x32xbf16> to vector<2x8x8xbf16>
    %136 = vector.extract_strided_slice %124 {offsets = [0, 0, 8], sizes = [2, 8, 8], strides = [1, 1, 1]} : vector<2x8x32xbf16> to vector<2x8x8xbf16>
    %137 = vector.extract_strided_slice %124 {offsets = [0, 0, 16], sizes = [2, 8, 8], strides = [1, 1, 1]} : vector<2x8x32xbf16> to vector<2x8x8xbf16>
    %138 = vector.extract_strided_slice %124 {offsets = [0, 0, 24], sizes = [2, 8, 8], strides = [1, 1, 1]} : vector<2x8x32xbf16> to vector<2x8x8xbf16>
    %139 = tpu.concatenate %135, %136, %137, %138 in 0 : vector<2x8x8xbf16>, vector<2x8x8xbf16>, vector<2x8x8xbf16>, vector<2x8x8xbf16> -> vector<8x8x8xbf16>
    "tpu.trace_start"() <{level = 10 : i32, message = "bqd,bkd->bqk"}> : () -> ()
    %cst_45 = arith.constant dense<0.000000e+00> : vector<8x8x8xf32>
    %140 = tpu.matmul %129, %134, %cst_45 {dimension_numbers = #tpu.dot_dimension_numbers<[2], [2], [1], [1], [0, 0, 0, 1, 1, 1], [0], [0]>} : vector<8x8x8xbf16>, vector<8x8x8xbf16>, vector<8x8x8xf32> -> vector<8x8x8xf32>
    "tpu.trace_stop"() : () -> ()
    %cst_46 = arith.constant dense<0xFF800000> : vector<8x8xf32>
    %141 = vector.multi_reduction <maximumf>, %140, %cst_46 [2] : vector<8x8x8xf32> to vector<8x8xf32>
    %142 = vector.shape_cast %141 : vector<8x8xf32> to vector<8x8x1xf32>
    %143 = vector.broadcast %142 : vector<8x8x1xf32> to vector<8x8x8xf32>
    %144 = arith.subf %140, %143 : vector<8x8x8xf32>
    %145 = math.exp %144 : vector<8x8x8xf32>
    %cst_47 = arith.constant dense<0.000000e+00> : vector<8x8xf32>
    %146 = vector.multi_reduction <add>, %145, %cst_47 [2] : vector<8x8x8xf32> to vector<8x8xf32>
    %147 = vector.shape_cast %146 : vector<8x8xf32> to vector<8x8x1xf32>
    %148 = tpu.reciprocal %147 {approx = true} : vector<8x8x1xf32> -> vector<8x8x1xf32>
    %149 = vector.broadcast %148 : vector<8x8x1xf32> to vector<8x8x8xf32>
    %150 = arith.mulf %145, %149 : vector<8x8x8xf32>
    %151 = arith.truncf %150 : vector<8x8x8xf32> to vector<8x8x8xbf16>
    "tpu.trace_start"() <{level = 10 : i32, message = "bqk,bkd->bqd"}> : () -> ()
    %cst_48 = arith.constant dense<0.000000e+00> : vector<8x8x8xf32>
    %152 = tpu.matmul %151, %139, %cst_48 {dimension_numbers = #tpu.dot_dimension_numbers<[2], [1], [1], [2], [0, 0, 0, 1, 1, 2], [0], [0]>} : vector<8x8x8xbf16>, vector<8x8x8xbf16>, vector<8x8x8xf32> -> vector<8x8x8xf32>
    %cst_49 = arith.constant 0.000000e+00 : f32
    "tpu.trace_stop"() : () -> ()
    %153 = vector.broadcast %cst_49 : f32 to vector<16x32xf32>
    %154 = vector.extract_strided_slice %152 {offsets = [0, 0, 0], sizes = [2, 8, 8], strides = [1, 1, 1]} : vector<8x8x8xf32> to vector<2x8x8xf32>
    %155 = vector.shape_cast %154 : vector<2x8x8xf32> to vector<16x8xf32>
    %156 = arith.truncf %155 : vector<16x8xf32> to vector<16x8xbf16>
    %157 = vector.extract_strided_slice %121 {offsets = [0, 0], sizes = [8, 32], strides = [1, 1]} : vector<32x32xbf16> to vector<8x32xbf16>
    %cst_50 = arith.constant dense<0.000000e+00> : vector<16x32xf32>
    %158 = tpu.matmul %156, %157, %cst_50 {dimension_numbers = #tpu.dot_dimension_numbers<[1], [0], [0], [1], [0, 0, 1, 1], [], []>} : vector<16x8xbf16>, vector<8x32xbf16>, vector<16x32xf32> -> vector<16x32xf32>
    %159 = arith.addf %153, %158 : vector<16x32xf32>
    %160 = vector.extract_strided_slice %152 {offsets = [2, 0, 0], sizes = [2, 8, 8], strides = [1, 1, 1]} : vector<8x8x8xf32> to vector<2x8x8xf32>
    %161 = vector.shape_cast %160 : vector<2x8x8xf32> to vector<16x8xf32>
    %162 = arith.truncf %161 : vector<16x8xf32> to vector<16x8xbf16>
    %163 = vector.extract_strided_slice %121 {offsets = [8, 0], sizes = [8, 32], strides = [1, 1]} : vector<32x32xbf16> to vector<8x32xbf16>
    %cst_51 = arith.constant dense<0.000000e+00> : vector<16x32xf32>
    %164 = tpu.matmul %162, %163, %cst_51 {dimension_numbers = #tpu.dot_dimension_numbers<[1], [0], [0], [1], [0, 0, 1, 1], [], []>} : vector<16x8xbf16>, vector<8x32xbf16>, vector<16x32xf32> -> vector<16x32xf32>
    %165 = arith.addf %159, %164 : vector<16x32xf32>
    %166 = vector.extract_strided_slice %152 {offsets = [4, 0, 0], sizes = [2, 8, 8], strides = [1, 1, 1]} : vector<8x8x8xf32> to vector<2x8x8xf32>
    %167 = vector.shape_cast %166 : vector<2x8x8xf32> to vector<16x8xf32>
    %168 = arith.truncf %167 : vector<16x8xf32> to vector<16x8xbf16>
    %169 = vector.extract_strided_slice %121 {offsets = [16, 0], sizes = [8, 32], strides = [1, 1]} : vector<32x32xbf16> to vector<8x32xbf16>
    %cst_52 = arith.constant dense<0.000000e+00> : vector<16x32xf32>
    %170 = tpu.matmul %168, %169, %cst_52 {dimension_numbers = #tpu.dot_dimension_numbers<[1], [0], [0], [1], [0, 0, 1, 1], [], []>} : vector<16x8xbf16>, vector<8x32xbf16>, vector<16x32xf32> -> vector<16x32xf32>
    %171 = arith.addf %165, %170 : vector<16x32xf32>
    %172 = vector.extract_strided_slice %152 {offsets = [6, 0, 0], sizes = [2, 8, 8], strides = [1, 1, 1]} : vector<8x8x8xf32> to vector<2x8x8xf32>
    %173 = vector.shape_cast %172 : vector<2x8x8xf32> to vector<16x8xf32>
    %174 = arith.truncf %173 : vector<16x8xf32> to vector<16x8xbf16>
    %175 = vector.extract_strided_slice %121 {offsets = [24, 0], sizes = [8, 32], strides = [1, 1]} : vector<32x32xbf16> to vector<8x32xbf16>
    %cst_53 = arith.constant dense<0.000000e+00> : vector<16x32xf32>
    %176 = tpu.matmul %174, %175, %cst_53 {dimension_numbers = #tpu.dot_dimension_numbers<[1], [0], [0], [1], [0, 0, 1, 1], [], []>} : vector<16x8xbf16>, vector<8x32xbf16>, vector<16x32xf32> -> vector<16x32xf32>
    %177 = arith.addf %171, %176 : vector<16x32xf32>
    %178 = vector.shape_cast %177 : vector<16x32xf32> to vector<2x8x32xf32>
    %c0_54 = arith.constant 0 : index
    %c0_55 = arith.constant 0 : index
    %c0_56 = arith.constant 0 : index
    %179 = vector.load %arg11[%c0_54, %c0_55, %c0_56] : memref<1x1x32xf32, #tpu.memory_space<vmem>>, vector<1x1x32xf32>
    %180 = vector.shape_cast %179 : vector<1x1x32xf32> to vector<1x32xf32>
    %c0_57 = arith.constant 0 : index
    %c0_58 = arith.constant 0 : index
    %c0_59 = arith.constant 0 : index
    %181 = vector.load %arg12[%c0_57, %c0_58, %c0_59] : memref<1x1x32xf32, #tpu.memory_space<vmem>>, vector<1x1x32xf32>
    %182 = vector.shape_cast %181 : vector<1x1x32xf32> to vector<1x32xf32>
    %183 = arith.addf %178, %104 : vector<2x8x32xf32>
    %cst_60 = arith.constant dense<0.000000e+00> : vector<2x8xf32>
    %184 = vector.multi_reduction <add>, %183, %cst_60 [2] : vector<2x8x32xf32> to vector<2x8xf32>
    %185 = vector.shape_cast %184 : vector<2x8xf32> to vector<2x8x1xf32>
    %cst_61 = arith.constant 3.200000e+01 : f32
    %186 = vector.broadcast %cst_61 : f32 to vector<2x8x1xf32>
    %187 = arith.divf %185, %186 : vector<2x8x1xf32>
    %188 = vector.broadcast %187 : vector<2x8x1xf32> to vector<2x8x32xf32>
    %189 = arith.subf %183, %188 : vector<2x8x32xf32>
    %190 = arith.mulf %189, %189 : vector<2x8x32xf32>
    %cst_62 = arith.constant dense<0.000000e+00> : vector<2x8xf32>
    %191 = vector.multi_reduction <add>, %190, %cst_62 [2] : vector<2x8x32xf32> to vector<2x8xf32>
    %192 = vector.shape_cast %191 : vector<2x8xf32> to vector<2x8x1xf32>
    %cst_63 = arith.constant 3.200000e+01 : f32
    %193 = vector.broadcast %cst_63 : f32 to vector<2x8x1xf32>
    %194 = arith.divf %192, %193 : vector<2x8x1xf32>
    %195 = vector.broadcast %187 : vector<2x8x1xf32> to vector<2x8x32xf32>
    %196 = arith.subf %183, %195 : vector<2x8x32xf32>
    %cst_64 = arith.constant 9.99999974E-6 : f32
    %197 = vector.broadcast %cst_64 : f32 to vector<2x8x1xf32>
    %198 = arith.addf %194, %197 : vector<2x8x1xf32>
    %199 = math.rsqrt %198 : vector<2x8x1xf32>
    %200 = vector.broadcast %199 : vector<2x8x1xf32> to vector<2x8x32xf32>
    %201 = arith.mulf %196, %200 : vector<2x8x32xf32>
    %202 = vector.shape_cast %180 : vector<1x32xf32> to vector<1x1x32xf32>
    %203 = vector.broadcast %202 : vector<1x1x32xf32> to vector<2x8x32xf32>
    %204 = arith.mulf %201, %203 : vector<2x8x32xf32>
    %205 = vector.shape_cast %182 : vector<1x32xf32> to vector<1x1x32xf32>
    %206 = vector.broadcast %205 : vector<1x1x32xf32> to vector<2x8x32xf32>
    %207 = arith.addf %204, %206 : vector<2x8x32xf32>
    %208 = vector.shape_cast %207 : vector<2x8x32xf32> to vector<16x32xf32>
    %209 = arith.truncf %208 : vector<16x32xf32> to vector<16x32xbf16>
    %cst_65 = arith.constant 0.000000e+00 : f32
    %210 = vector.broadcast %cst_65 : f32 to vector<16x32xf32>
    %c0_66 = arith.constant 0 : index
    %c0_67 = arith.constant 0 : index
    %c0_68 = arith.constant 0 : index
    %211 = vector.load %arg13[%c0_66, %c0_67, %c0_68] : memref<1x32x2048xbf16, #tpu.memory_space<vmem>>, vector<1x32x512xbf16>
    %212 = vector.shape_cast %211 : vector<1x32x512xbf16> to vector<32x512xbf16>
    %c0_69 = arith.constant 0 : index
    %c0_70 = arith.constant 0 : index
    %c0_71 = arith.constant 0 : index
    %213 = vector.load %arg14[%c0_69, %c0_70, %c0_71] : memref<1x1x2048xf32, #tpu.memory_space<vmem>>, vector<1x1x512xf32>
    %214 = vector.shape_cast %213 : vector<1x1x512xf32> to vector<1x512xf32>
    %cst_72 = arith.constant dense<0.000000e+00> : vector<16x512xf32>
    %215 = tpu.matmul %209, %212, %cst_72 {dimension_numbers = #tpu.dot_dimension_numbers<[1], [0], [0], [1], [0, 0, 1, 1], [], []>} : vector<16x32xbf16>, vector<32x512xbf16>, vector<16x512xf32> -> vector<16x512xf32>
    %216 = vector.broadcast %214 : vector<1x512xf32> to vector<16x512xf32>
    %217 = arith.addf %215, %216 : vector<16x512xf32>
    %cst_73 = arith.constant 0.000000e+00 : f32
    %218 = vector.broadcast %cst_73 : f32 to vector<16x512xf32>
    %219 = arith.maximumf %217, %218 : vector<16x512xf32>
    %c0_74 = arith.constant 0 : index
    %c0_75 = arith.constant 0 : index
    %c0_76 = arith.constant 0 : index
    %220 = vector.load %arg15[%c0_74, %c0_75, %c0_76] : memref<1x2048x32xbf16, #tpu.memory_space<vmem>>, vector<1x512x32xbf16>
    %221 = vector.shape_cast %220 : vector<1x512x32xbf16> to vector<512x32xbf16>
    %222 = arith.truncf %219 : vector<16x512xf32> to vector<16x512xbf16>
    %cst_77 = arith.constant dense<0.000000e+00> : vector<16x32xf32>
    %223 = tpu.matmul %222, %221, %cst_77 {dimension_numbers = #tpu.dot_dimension_numbers<[1], [0], [0], [1], [0, 0, 1, 1], [], []>} : vector<16x512xbf16>, vector<512x32xbf16>, vector<16x32xf32> -> vector<16x32xf32>
    %224 = arith.addf %210, %223 : vector<16x32xf32>
    %c0_78 = arith.constant 0 : index
    %c0_79 = arith.constant 0 : index
    %c512 = arith.constant 512 : index
    %225 = vector.load %arg13[%c0_78, %c0_79, %c512] : memref<1x32x2048xbf16, #tpu.memory_space<vmem>>, vector<1x32x512xbf16>
    %226 = vector.shape_cast %225 : vector<1x32x512xbf16> to vector<32x512xbf16>
    %c0_80 = arith.constant 0 : index
    %c0_81 = arith.constant 0 : index
    %c512_82 = arith.constant 512 : index
    %227 = vector.load %arg14[%c0_80, %c0_81, %c512_82] : memref<1x1x2048xf32, #tpu.memory_space<vmem>>, vector<1x1x512xf32>
    %228 = vector.shape_cast %227 : vector<1x1x512xf32> to vector<1x512xf32>
    %cst_83 = arith.constant dense<0.000000e+00> : vector<16x512xf32>
    %229 = tpu.matmul %209, %226, %cst_83 {dimension_numbers = #tpu.dot_dimension_numbers<[1], [0], [0], [1], [0, 0, 1, 1], [], []>} : vector<16x32xbf16>, vector<32x512xbf16>, vector<16x512xf32> -> vector<16x512xf32>
    %230 = vector.broadcast %228 : vector<1x512xf32> to vector<16x512xf32>
    %231 = arith.addf %229, %230 : vector<16x512xf32>
    %cst_84 = arith.constant 0.000000e+00 : f32
    %232 = vector.broadcast %cst_84 : f32 to vector<16x512xf32>
    %233 = arith.maximumf %231, %232 : vector<16x512xf32>
    %c0_85 = arith.constant 0 : index
    %c512_86 = arith.constant 512 : index
    %c0_87 = arith.constant 0 : index
    %234 = vector.load %arg15[%c0_85, %c512_86, %c0_87] : memref<1x2048x32xbf16, #tpu.memory_space<vmem>>, vector<1x512x32xbf16>
    %235 = vector.shape_cast %234 : vector<1x512x32xbf16> to vector<512x32xbf16>
    %236 = arith.truncf %233 : vector<16x512xf32> to vector<16x512xbf16>
    %cst_88 = arith.constant dense<0.000000e+00> : vector<16x32xf32>
    %237 = tpu.matmul %236, %235, %cst_88 {dimension_numbers = #tpu.dot_dimension_numbers<[1], [0], [0], [1], [0, 0, 1, 1], [], []>} : vector<16x512xbf16>, vector<512x32xbf16>, vector<16x32xf32> -> vector<16x32xf32>
    %238 = arith.addf %224, %237 : vector<16x32xf32>
    %c0_89 = arith.constant 0 : index
    %c0_90 = arith.constant 0 : index
    %c1024 = arith.constant 1024 : index
    %239 = vector.load %arg13[%c0_89, %c0_90, %c1024] : memref<1x32x2048xbf16, #tpu.memory_space<vmem>>, vector<1x32x512xbf16>
    %240 = vector.shape_cast %239 : vector<1x32x512xbf16> to vector<32x512xbf16>
    %c0_91 = arith.constant 0 : index
    %c0_92 = arith.constant 0 : index
    %c1024_93 = arith.constant 1024 : index
    %241 = vector.load %arg14[%c0_91, %c0_92, %c1024_93] : memref<1x1x2048xf32, #tpu.memory_space<vmem>>, vector<1x1x512xf32>
    %242 = vector.shape_cast %241 : vector<1x1x512xf32> to vector<1x512xf32>
    %cst_94 = arith.constant dense<0.000000e+00> : vector<16x512xf32>
    %243 = tpu.matmul %209, %240, %cst_94 {dimension_numbers = #tpu.dot_dimension_numbers<[1], [0], [0], [1], [0, 0, 1, 1], [], []>} : vector<16x32xbf16>, vector<32x512xbf16>, vector<16x512xf32> -> vector<16x512xf32>
    %244 = vector.broadcast %242 : vector<1x512xf32> to vector<16x512xf32>
    %245 = arith.addf %243, %244 : vector<16x512xf32>
    %cst_95 = arith.constant 0.000000e+00 : f32
    %246 = vector.broadcast %cst_95 : f32 to vector<16x512xf32>
    %247 = arith.maximumf %245, %246 : vector<16x512xf32>
    %c0_96 = arith.constant 0 : index
    %c1024_97 = arith.constant 1024 : index
    %c0_98 = arith.constant 0 : index
    %248 = vector.load %arg15[%c0_96, %c1024_97, %c0_98] : memref<1x2048x32xbf16, #tpu.memory_space<vmem>>, vector<1x512x32xbf16>
    %249 = vector.shape_cast %248 : vector<1x512x32xbf16> to vector<512x32xbf16>
    %250 = arith.truncf %247 : vector<16x512xf32> to vector<16x512xbf16>
    %cst_99 = arith.constant dense<0.000000e+00> : vector<16x32xf32>
    %251 = tpu.matmul %250, %249, %cst_99 {dimension_numbers = #tpu.dot_dimension_numbers<[1], [0], [0], [1], [0, 0, 1, 1], [], []>} : vector<16x512xbf16>, vector<512x32xbf16>, vector<16x32xf32> -> vector<16x32xf32>
    %252 = arith.addf %238, %251 : vector<16x32xf32>
    %c0_100 = arith.constant 0 : index
    %c0_101 = arith.constant 0 : index
    %c1536 = arith.constant 1536 : index
    %253 = vector.load %arg13[%c0_100, %c0_101, %c1536] : memref<1x32x2048xbf16, #tpu.memory_space<vmem>>, vector<1x32x512xbf16>
    %254 = vector.shape_cast %253 : vector<1x32x512xbf16> to vector<32x512xbf16>
    %c0_102 = arith.constant 0 : index
    %c0_103 = arith.constant 0 : index
    %c1536_104 = arith.constant 1536 : index
    %255 = vector.load %arg14[%c0_102, %c0_103, %c1536_104] : memref<1x1x2048xf32, #tpu.memory_space<vmem>>, vector<1x1x512xf32>
    %256 = vector.shape_cast %255 : vector<1x1x512xf32> to vector<1x512xf32>
    %cst_105 = arith.constant dense<0.000000e+00> : vector<16x512xf32>
    %257 = tpu.matmul %209, %254, %cst_105 {dimension_numbers = #tpu.dot_dimension_numbers<[1], [0], [0], [1], [0, 0, 1, 1], [], []>} : vector<16x32xbf16>, vector<32x512xbf16>, vector<16x512xf32> -> vector<16x512xf32>
    %258 = vector.broadcast %256 : vector<1x512xf32> to vector<16x512xf32>
    %259 = arith.addf %257, %258 : vector<16x512xf32>
    %cst_106 = arith.constant 0.000000e+00 : f32
    %260 = vector.broadcast %cst_106 : f32 to vector<16x512xf32>
    %261 = arith.maximumf %259, %260 : vector<16x512xf32>
    %c0_107 = arith.constant 0 : index
    %c1536_108 = arith.constant 1536 : index
    %c0_109 = arith.constant 0 : index
    %262 = vector.load %arg15[%c0_107, %c1536_108, %c0_109] : memref<1x2048x32xbf16, #tpu.memory_space<vmem>>, vector<1x512x32xbf16>
    %263 = vector.shape_cast %262 : vector<1x512x32xbf16> to vector<512x32xbf16>
    %264 = arith.truncf %261 : vector<16x512xf32> to vector<16x512xbf16>
    %cst_110 = arith.constant dense<0.000000e+00> : vector<16x32xf32>
    %265 = tpu.matmul %264, %263, %cst_110 {dimension_numbers = #tpu.dot_dimension_numbers<[1], [0], [0], [1], [0, 0, 1, 1], [], []>} : vector<16x512xbf16>, vector<512x32xbf16>, vector<16x32xf32> -> vector<16x32xf32>
    %266 = arith.addf %252, %265 : vector<16x32xf32>
    %c0_111 = arith.constant 0 : index
    %c0_112 = arith.constant 0 : index
    %c0_113 = arith.constant 0 : index
    %267 = vector.load %arg16[%c0_111, %c0_112, %c0_113] : memref<1x1x32xf32, #tpu.memory_space<vmem>>, vector<1x1x32xf32>
    %268 = vector.shape_cast %267 : vector<1x1x32xf32> to vector<1x32xf32>
    %269 = vector.broadcast %268 : vector<1x32xf32> to vector<16x32xf32>
    %270 = arith.addf %266, %269 : vector<16x32xf32>
    %271 = vector.shape_cast %270 : vector<16x32xf32> to vector<2x8x32xf32>
    %c0_114 = arith.constant 0 : index
    %c0_115 = arith.constant 0 : index
    %c0_116 = arith.constant 0 : index
    %272 = vector.load %arg17[%c0_114, %c0_115, %c0_116] : memref<1x1x32xf32, #tpu.memory_space<vmem>>, vector<1x1x32xf32>
    %273 = vector.shape_cast %272 : vector<1x1x32xf32> to vector<1x32xf32>
    %c0_117 = arith.constant 0 : index
    %c0_118 = arith.constant 0 : index
    %c0_119 = arith.constant 0 : index
    %274 = vector.load %arg18[%c0_117, %c0_118, %c0_119] : memref<1x1x32xf32, #tpu.memory_space<vmem>>, vector<1x1x32xf32>
    %275 = vector.shape_cast %274 : vector<1x1x32xf32> to vector<1x32xf32>
    %276 = arith.addf %271, %207 : vector<2x8x32xf32>
    %cst_120 = arith.constant dense<0.000000e+00> : vector<2x8xf32>
    %277 = vector.multi_reduction <add>, %276, %cst_120 [2] : vector<2x8x32xf32> to vector<2x8xf32>
    %278 = vector.shape_cast %277 : vector<2x8xf32> to vector<2x8x1xf32>
    %cst_121 = arith.constant 3.200000e+01 : f32
    %279 = vector.broadcast %cst_121 : f32 to vector<2x8x1xf32>
    %280 = arith.divf %278, %279 : vector<2x8x1xf32>
    %281 = vector.broadcast %280 : vector<2x8x1xf32> to vector<2x8x32xf32>
    %282 = arith.subf %276, %281 : vector<2x8x32xf32>
    %283 = arith.mulf %282, %282 : vector<2x8x32xf32>
    %cst_122 = arith.constant dense<0.000000e+00> : vector<2x8xf32>
    %284 = vector.multi_reduction <add>, %283, %cst_122 [2] : vector<2x8x32xf32> to vector<2x8xf32>
    %285 = vector.shape_cast %284 : vector<2x8xf32> to vector<2x8x1xf32>
    %cst_123 = arith.constant 3.200000e+01 : f32
    %286 = vector.broadcast %cst_123 : f32 to vector<2x8x1xf32>
    %287 = arith.divf %285, %286 : vector<2x8x1xf32>
    %288 = vector.broadcast %280 : vector<2x8x1xf32> to vector<2x8x32xf32>
    %289 = arith.subf %276, %288 : vector<2x8x32xf32>
    %cst_124 = arith.constant 9.99999974E-6 : f32
    %290 = vector.broadcast %cst_124 : f32 to vector<2x8x1xf32>
    %291 = arith.addf %287, %290 : vector<2x8x1xf32>
    %292 = math.rsqrt %291 : vector<2x8x1xf32>
    %293 = vector.broadcast %292 : vector<2x8x1xf32> to vector<2x8x32xf32>
    %294 = arith.mulf %289, %293 : vector<2x8x32xf32>
    %295 = vector.shape_cast %273 : vector<1x32xf32> to vector<1x1x32xf32>
    %296 = vector.broadcast %295 : vector<1x1x32xf32> to vector<2x8x32xf32>
    %297 = arith.mulf %294, %296 : vector<2x8x32xf32>
    %298 = vector.shape_cast %275 : vector<1x32xf32> to vector<1x1x32xf32>
    %299 = vector.broadcast %298 : vector<1x1x32xf32> to vector<2x8x32xf32>
    %300 = arith.addf %297, %299 : vector<2x8x32xf32>
    %c0_125 = arith.constant 0 : index
    %c0_126 = arith.constant 0 : index
    %c0_127 = arith.constant 0 : index
    %301 = vector.load %arg22[%c0_125, %c0_126, %c0_127] : memref<2x8x32xf32, #tpu.memory_space<vmem>>, vector<2x8x32xf32>
    tpu.vector_store %arg22[%c0_125, %c0_126, %c0_127], %300 {strides = array<i32>} : memref<2x8x32xf32, #tpu.memory_space<vmem>>, vector<2x8x32xf32>,
    %c5_i32 = arith.constant 5 : i32
    %302 = arith.cmpi eq, %arg0, %c5_i32 : i32
    %303 = arith.extui %302 : i1 to i32
    %c0_i32_128 = arith.constant 0 : i32
    %304 = arith.cmpi ne, %303, %c0_i32_128 : i32
    scf.if %304 {
      %305 = vector.shape_cast %300 : vector<2x8x32xf32> to vector<16x32xf32>
      %306 = arith.truncf %305 : vector<16x32xf32> to vector<16x32xbf16>
      %c0_129 = arith.constant 0 : index
      %c0_130 = arith.constant 0 : index
      %307 = vector.load %arg19[%c0_129, %c0_130] : memref<32x128xbf16, #tpu.memory_space<vmem>>, vector<32x128xbf16>
      %cst_131 = arith.constant dense<0.000000e+00> : vector<16x128xf32>
      %308 = tpu.matmul %306, %307, %cst_131 {dimension_numbers = #tpu.dot_dimension_numbers<[1], [0], [0], [1], [0, 0, 1, 1], [], []>} : vector<16x32xbf16>, vector<32x128xbf16>, vector<16x128xf32> -> vector<16x128xf32>
      %c0_132 = arith.constant 0 : index
      %c0_133 = arith.constant 0 : index
      %309 = vector.load %arg20[%c0_132, %c0_133] : memref<1x128xf32, #tpu.memory_space<vmem>>, vector<1x128xf32>
      %310 = vector.broadcast %309 : vector<1x128xf32> to vector<16x128xf32>
      %311 = arith.addf %308, %310 : vector<16x128xf32>
      %312 = vector.shape_cast %311 : vector<16x128xf32> to vector<2x8x128xf32>
      %c0_134 = arith.constant 0 : index
      %c0_135 = arith.constant 0 : index
      %c0_136 = arith.constant 0 : index
      %313 = vector.load %arg21[%c0_134, %c0_135, %c0_136] : memref<2x8x128xf32, #tpu.memory_space<vmem>>, vector<2x8x128xf32>
      tpu.vector_store %arg21[%c0_134, %c0_135, %c0_136], %312 {strides = array<i32>} : memref<2x8x128xf32, #tpu.memory_space<vmem>>, vector<2x8x128xf32>,
    } else {
    }
    return
  }
  func.func @transform_0(%arg0: i32) -> (i32, i32, i32) {
    %c0_i32 = arith.constant 0 : i32
    %c0_i32_0 = arith.constant 0 : i32
    %c0_i32_1 = arith.constant 0 : i32
    %c0_i32_2 = arith.constant 0 : i32
    return %c0_i32, %c0_i32_0, %c0_i32_1 : i32, i32, i32
  }
  func.func @transform_1(%arg0: i32) -> (i32, i32, i32) {
    %c0_i32 = arith.constant 0 : i32
    %c0_i32_0 = arith.constant 0 : i32
    %c0_i32_1 = arith.constant 0 : i32
    %c0_i32_2 = arith.constant 0 : i32
    return %c0_i32, %c0_i32_0, %c0_i32_1 : i32, i32, i32
  }
  func.func @transform_2(%arg0: i32) -> (i32, i32) {
    %c0_i32 = arith.constant 0 : i32
    %c0_i32_0 = arith.constant 0 : i32
    %c0_i32_1 = arith.constant 0 : i32
    return %c0_i32, %c0_i32_0 : i32, i32
  }
  func.func @transform_3(%arg0: i32) -> (i32, i32, i32) {
    %c0_i32 = arith.constant 0 : i32
    %c0_i32_0 = arith.constant 0 : i32
    %c0_i32_1 = arith.constant 0 : i32
    return %arg0, %c0_i32, %c0_i32_0 : i32, i32, i32
  }
  func.func @transform_4(%arg0: i32) -> (i32, i32, i32) {
    %c0_i32 = arith.constant 0 : i32
    %c0_i32_0 = arith.constant 0 : i32
    %c0_i32_1 = arith.constant 0 : i32
    return %arg0, %c0_i32, %c0_i32_0 : i32, i32, i32
  }
  func.func @transform_5(%arg0: i32) -> (i32, i32, i32) {
    %c0_i32 = arith.constant 0 : i32
    %c0_i32_0 = arith.constant 0 : i32
    %c0_i32_1 = arith.constant 0 : i32
    return %arg0, %c0_i32, %c0_i32_0 : i32, i32, i32
  }
  func.func @transform_6(%arg0: i32) -> (i32, i32, i32) {
    %c0_i32 = arith.constant 0 : i32
    %c0_i32_0 = arith.constant 0 : i32
    %c0_i32_1 = arith.constant 0 : i32
    return %arg0, %c0_i32, %c0_i32_0 : i32, i32, i32
  }
  func.func @transform_7(%arg0: i32) -> (i32, i32, i32) {
    %c0_i32 = arith.constant 0 : i32
    %c0_i32_0 = arith.constant 0 : i32
    %c0_i32_1 = arith.constant 0 : i32
    return %arg0, %c0_i32, %c0_i32_0 : i32, i32, i32
  }
  func.func @transform_8(%arg0: i32) -> (i32, i32, i32) {
    %c0_i32 = arith.constant 0 : i32
    %c0_i32_0 = arith.constant 0 : i32
    %c0_i32_1 = arith.constant 0 : i32
    return %arg0, %c0_i32, %c0_i32_0 : i32, i32, i32
  }
  func.func @transform_9(%arg0: i32) -> (i32, i32, i32) {
    %c0_i32 = arith.constant 0 : i32
    %c0_i32_0 = arith.constant 0 : i32
    %c0_i32_1 = arith.constant 0 : i32
    return %arg0, %c0_i32, %c0_i32_0 : i32, i32, i32
  }
  func.func @transform_10(%arg0: i32) -> (i32, i32, i32) {
    %c0_i32 = arith.constant 0 : i32
    %c0_i32_0 = arith.constant 0 : i32
    %c0_i32_1 = arith.constant 0 : i32
    return %arg0, %c0_i32, %c0_i32_0 : i32, i32, i32
  }
  func.func @transform_11(%arg0: i32) -> (i32, i32, i32) {
    %c0_i32 = arith.constant 0 : i32
    %c0_i32_0 = arith.constant 0 : i32
    %c0_i32_1 = arith.constant 0 : i32
    return %arg0, %c0_i32, %c0_i32_0 : i32, i32, i32
  }
  func.func @transform_12(%arg0: i32) -> (i32, i32, i32) {
    %c0_i32 = arith.constant 0 : i32
    %c0_i32_0 = arith.constant 0 : i32
    %c0_i32_1 = arith.constant 0 : i32
    return %arg0, %c0_i32, %c0_i32_0 : i32, i32, i32
  }
  func.func @transform_13(%arg0: i32) -> (i32, i32, i32) {
    %c0_i32 = arith.constant 0 : i32
    %c0_i32_0 = arith.constant 0 : i32
    %c0_i32_1 = arith.constant 0 : i32
    return %arg0, %c0_i32, %c0_i32_0 : i32, i32, i32
  }
  func.func @transform_14(%arg0: i32) -> (i32, i32, i32) {
    %c0_i32 = arith.constant 0 : i32
    %c0_i32_0 = arith.constant 0 : i32
    %c0_i32_1 = arith.constant 0 : i32
    return %arg0, %c0_i32, %c0_i32_0 : i32, i32, i32
  }
  func.func @transform_15(%arg0: i32) -> (i32, i32, i32) {
    %c0_i32 = arith.constant 0 : i32
    %c0_i32_0 = arith.constant 0 : i32
    %c0_i32_1 = arith.constant 0 : i32
    return %arg0, %c0_i32, %c0_i32_0 : i32, i32, i32
  }
  func.func @transform_16(%arg0: i32) -> (i32, i32, i32) {
    %c0_i32 = arith.constant 0 : i32
    %c0_i32_0 = arith.constant 0 : i32
    %c0_i32_1 = arith.constant 0 : i32
    return %arg0, %c0_i32, %c0_i32_0 : i32, i32, i32
  }
  func.func @transform_17(%arg0: i32) -> (i32, i32, i32) {
    %c0_i32 = arith.constant 0 : i32
    %c0_i32_0 = arith.constant 0 : i32
    %c0_i32_1 = arith.constant 0 : i32
    return %arg0, %c0_i32, %c0_i32_0 : i32, i32, i32
  }
  func.func @transform_18(%arg0: i32) -> (i32, i32) {
    %c0_i32 = arith.constant 0 : i32
    %c0_i32_0 = arith.constant 0 : i32
    %c0_i32_1 = arith.constant 0 : i32
    return %c0_i32, %c0_i32_0 : i32, i32
  }
  func.func @transform_19(%arg0: i32) -> (i32, i32) {
    %c0_i32 = arith.constant 0 : i32
    %c0_i32_0 = arith.constant 0 : i32
    %c0_i32_1 = arith.constant 0 : i32
    return %c0_i32, %c0_i32_0 : i32, i32
  }
  func.func @transform_20(%arg0: i32) -> (i32, i32, i32) {
    %c0_i32 = arith.constant 0 : i32
    %c0_i32_0 = arith.constant 0 : i32
    %c0_i32_1 = arith.constant 0 : i32
    %c0_i32_2 = arith.constant 0 : i32
    return %c0_i32, %c0_i32_0, %c0_i32_1 : i32, i32, i32
  }
}

</mosaic_0001>

<bundles_post_ra>
// kernel: transformer_forward.2
= control target key start
LH: loop header
LB: loop body
LE: loop exit
PB: predicated region body
PF: predicated region fallthrough
CT: control target
= control target key end

     0   :  { %s4790_s17 = smov 0   ;;  %s5357_s0 = inlined_call_operand.vmem [shape: f32[2,8,32], index: 0, kind: input, shape index: {}]   ;;  %s5358_s1 = inlined_call_operand.vmem [shape: bf16[6,32,96], index: 1, kind: input, shape index: {}]   ;;  %s5359_s2 = inlined_call_operand.vmem [shape: bf16[6,32,32], index: 2, kind: input, shape index: {}]   ;;  %s5360_s3 = inlined_call_operand.vmem [shape: f32[6,1,32], index: 3, kind: input, shape index: {}]   ;;  %s5361_s4 = inlined_call_operand.vmem [shape: f32[6,1,32], index: 4, kind: input, shape index: {}]   ;;  %s5362_s5 = inlined_call_operand.vmem [shape: bf16[6,32,2048], index: 5, kind: input, shape index: {}]   ;;  %s5363_s6 = inlined_call_operand.vmem [shape: f32[6,1,2048], index: 6, kind: input, shape index: {}]   ;;  %s5364_s7 = inlined_call_operand.vmem [shape: bf16[6,2048,32], index: 7, kind: input, shape index: {}]   ;;  %s5365_s8 = inlined_call_operand.vmem [shape: f32[6,1,32], index: 8, kind: input, shape index: {}]   ;;  %s5366_s9 = inlined_call_operand.vmem [shape: f32[6,1,32], index: 9, kind: input, shape index: {}]   ;;  %s5367_s10 = inlined_call_operand.vmem [shape: f32[6,1,32], index: 10, kind: input, shape index: {}]   ;;  %s5368_s11 = inlined_call_operand.vmem [shape: f32[2,8,32], index: 11, kind: output, shape index: {}]  }
   0x1   :  { %5370 = sst [smem:[#allocation4_spill]] %s5358_s1 }
   0x2   :  { %5371 = sst [smem:[#allocation5_spill]] %s5359_s2 }
   0x3 LB: > { %5372 = sst [smem:[#allocation3_spill]] %s4720_s17  ;;  %s4796_s18 = sadd.s32 4294967295, %s4720_s17   ;;  %s4720_s17 = sphi %s4790_s17, %s21_s17  }
   0x4   : > { %p3955_p0 = scmp.ge.s32.totalorder %s4720_s17, 1  ;;  %p411_p1 = scmp.lt.s32.totalorder %s4720_s17, 7 }
   0x6   : > { %p412_p2 = pnand %p3955_p0, %p411_p1 }
   0x7   : > { %p480_p3 = scmp.lt.s32.totalorder (!%p412_p2), %s4796_s18, 5  ;;  %s5373_s1 = sld [smem:[#allocation4_spill]] (!%p412_p2) }
   0x8   : > { %415 = sbr.rel (%p412_p2) target bundleno = 3090 (0xc12), region = 64  ;;  %s5374_s2 = sld [smem:[#allocation5_spill]] (!%p412_p2) }
   0x9   : > { %p3965_p4 = scmp.ne.s32.totalorder (!%p412_p2), %s4796_s18, 0 }
   0xf   : > { %s4802_s19 = scalar_select %p480_p3, %s4796_s18, 5 }
  0x10   : > { %523 = sbr.rel (%p3965_p4) target bundleno = 23 (0x17), region = 68  ;;  %v524_v0 = vld [vmem:[%s5357_s0] sm:$0xff] (!%p3965_p4)  ;;  %vm526_vm0 = vcmask (!%p3965_p4), 261120   ;;  %v525_v1 = vld [vmem:[%s5357_s0 + $0x8] sm:$0xff] (!%p3965_p4) }
  0x11   : > { %s4173_s20 = sshll.u32 %s4802_s19, 4  ;;  %s4175_s14 = sshll.u32 %s4802_s19, 8  ;;  %527 = vst.msk [vmem:[#allocation2] sm:$0xff] (!%p3965_p4), %vm526_vm0, %v524_v0  ;;  %528 = vst.msk [vmem:[#allocation2 + $0x8] sm:$0xff] (!%p3965_p4), %vm526_vm0, %v525_v1 }
  0x12   : > { %s484_s26 = scalar_lea.vmem %s5373_s1, %s4173_s20  ;;  %s4815_s29 = scalar_lea.vmem %s5374_s2, %s4173_s20 }
  0x13   : > { %s4825_s17 = scalar_lea.vmem %s5362_s5, %s4175_s14  ;;  %s4830_s24 = scalar_lea.vmem %s5363_s6, %s4173_s20 }
  0x14   : > { %s4176_s25 = sshll.u32 %s4802_s19, 10  ;;  %s512_s28 = scalar_lea.vmem %s5365_s8, %s4802_s19 }
  0x15   : > { %s4840_s30 = scalar_lea.vmem %s5364_s7, %s4176_s25  ;;  %s515_s14 = scalar_lea.vmem %s5366_s9, %s4802_s19 }
  0x16   : > { %s518_s21 = scalar_lea.vmem %s5367_s10, %s4802_s19 }
  0x17 PF: > { %v4542_v2 = vld [vmem:[%s484_s26] sm:$0xff]   ;;  %v4722_v3 = vmov 0.0   ;;  %v4543_v4 = vld [vmem:[%s484_s26 + $0x8] sm:$0xff]   ;;  %vm4723_vm1 = vmmov 0   ;;  %vm548_vm2 = vcmask 261120   ;;  %s4724_s2 = smov 112   ;;  %s5375_s15 = scalar_lea.vmem %s5360_s3, %s4802_s19 }
  0x18   : > { %4398 = vmatprep.subr.bf16.mxu0 %v4722_v3  ;;  %4406 = vmatprep.subr.bf16.mxu1 %v4722_v3  ;;  %v529_v5 = vld [vmem:[#allocation2] sm:$0xff]  ;;  %v530_v6 = vld [vmem:[#allocation2 + $0x8] sm:$0xff]  ;;  %s4725_s26 = smov 120   ;;  %s4726_s13 = smov 104   ;;  %vm617_vm3 = vcmask 64512   ;;  %vm1113_vm4 = vcmask 1043456  }
  0x19   : > { %4399 = vmatpush3.bf16.msra.mxu0 %v4542_v2  ;;  %4402 = vmatprep.mubr.msk.bf16.mxu0 %vm4723_vm1, %v4722_v3  ;;  %v531_v7 = vpack.c.bf16 %v530_v6, %v529_v5  ;;  %s4727_s25 = smov 96   ;;  %s4728_s27 = smov 64  }
  0x1a   : > { %4400 = vmatprep.subr.bf16.mxu0 %v4722_v3  ;;  %4408 = vmatprep.mubr.msk.bf16.mxu1 %vm4723_vm1, %v4722_v3  ;;  %s5376_s22 = scalar_lea.vmem %s5361_s4, %s4802_s19  ;;  %p4170_p5 = scmp.ne.s32.totalorder %s4796_s18, 5 }
  0x1d   : > { %4401 = vmatpush3.bf16.msra.mxu0 %v4543_v4 }
  0x1e   : > { %4412 = vmatprep.subr.bf16.mxu0 %v4722_v3 }
  0x20   : > { %4403 = vmatmul.mubr.msk.bf16.vlgmr.msra.gmra.mrb[0].mxu0 %vm548_vm2, %v531_v7 }
  0x21   : > { %4414 = vmatprep.mubr.msk.bf16.mxu0 %vm4723_vm1, %v4722_v3 }
  0xf3   : > { %v586_v8 = vpop.f32.mrb[0].mxu0 }
  0xf4   : > { %v4177_v9 = vpack.c.bf16 %v586_v8, %v586_v8  ;;  %v4404_v10 = vpop.f32.mrb[1].mxu0 }
  0xf5   : > { %v589_v11 = vpop.f32.mrb[2].mxu0 }
  0xf6   : > { %607 = vrot.lane.b32.xlu1 %v4177_v9, %s4724_s2  ;;  %603 = vrot.lane.b32.xlu0 %v4177_v9, %s4725_s26  ;;  %v4405_v12 = vpop.f32.mrb[3].mxu0  ;;  %v4868_v13 = vpack.c.bf16 %v589_v11, %v589_v11 }
  0xfa   : > { %609 = vrot.lane.b32.xlu1 %v4868_v13, %s4724_s2  ;;  %605 = vrot.lane.b32.xlu0 %v4868_v13, %s4725_s26 }
  0xfe   : > { %613 = vrot.lane.b32.xlu1 %v4868_v13, %s4726_s13  ;;  %611 = vrot.lane.b32.xlu0 %v4177_v9, %s4726_s13 }
 0x102   : > { %664 = vrot.lane.b32.xlu1 %v4868_v13, %s4727_s25  ;;  %615 = vrot.lane.b32.xlu0 %v4177_v9, %s4727_s25 }
 0x168   : > { %v608_v14 = vpop.permute.xlu1 %607  ;;  %v604_v15 = vpop.permute.xlu0 %603 }
 0x169   : > { %v4874_v16 = vcombine.low %v604_v15, %v604_v15  ;;  %v4877_v19 = vcombine.low %v608_v14, %v608_v14 }
 0x16b   : > { %714 = vrot.lane.b32.xlu0 %v4874_v16, %s4727_s25 }
 0x16c   : > { %v610_v17 = vpop.permute.xlu1 %609  ;;  %v606_v18 = vpop.permute.xlu0 %605 }
 0x16d   : > { %v4879_v20 = vcombine.low %v606_v18, %v606_v18  ;;  %v4883_v23 = vcombine.low %v610_v17, %v610_v17 }
 0x16f   : > { %814 = vrot.lane.b32.xlu0 %v4877_v19, %s4727_s25  ;;  %764 = vrot.lane.b32.xlu1 %v4879_v20, %s4727_s25 }
 0x170   : > { %v614_v21 = vpop.permute.xlu1 %613  ;;  %v612_v22 = vpop.permute.xlu0 %611 }
 0x171   : > { %v4885_v24 = vcombine.low %v612_v22, %v612_v22  ;;  %v4889_v27 = vcombine.low %v614_v21, %v614_v21 }
 0x173   : > { %864 = vrot.lane.b32.xlu1 %v4883_v23, %s4727_s25  ;;  %914 = vrot.lane.b32.xlu0 %v4885_v24, %s4727_s25 }
 0x174   : > { %v665_v25 = vpop.permute.xlu1 %664  ;;  %v616_v26 = vpop.permute.xlu0 %615 }
 0x175   : > { %v670_v28 = vsel %vm617_vm3, %v665_v25, 0  ;;  %v622_v29 = vsel %vm617_vm3, %v616_v26, 0 }
 0x176   : > { %4407 = vmatpush3.bf16.xpose.msra.mxu1 %v622_v29  ;;  %4413 = vmatpush3.bf16.xpose.msra.mxu0 %v670_v28 }
 0x177   : > { %964 = vrot.lane.b32.xlu1 %v4889_v27, %s4727_s25  ;;  %4418 = vmatprep.subr.bf16.mxu1 %v4722_v3 }
 0x178   : > { %4424 = vmatprep.subr.bf16.mxu0 %v4722_v3 }
 0x17b   : > { %1108 = vrot.lane.b32.xlu1 %v4177_v9, %s4728_s27 }
 0x17d   : > { %4409 = vmatmul.mubr.msk.bf16.vlgmr.msra.gmra.mrb[0].mxu1 %vm617_vm3, %v4177_v9  ;;  %4415 = vmatmul.mubr.msk.bf16.vlgmr.msra.gmra.mrb[4].mxu0 %vm617_vm3, %v4868_v13 }
 0x17e   : > { %4420 = vmatprep.mubr.msk.bf16.mxu1 %vm4723_vm1, %v4722_v3  ;;  %4426 = vmatprep.mubr.msk.bf16.mxu0 %vm4723_vm1, %v4722_v3 }
 0x1dd   : > { %v715_v30 = vpop.permute.xlu0 %714 }
 0x1de   : > { %v720_v31 = vsel %vm617_vm3, %v715_v30, 0 }
 0x1df   : > { %4419 = vmatpush3.bf16.xpose.msra.mxu1 %v720_v31 }
 0x1e0   : > { %4430 = vmatprep.subr.bf16.mxu1 %v4722_v3 }
 0x1e1   : > { %v765_v32 = vpop.permute.xlu1 %764  ;;  %v815_v34 = vpop.permute.xlu0 %814 }
 0x1e2   : > { %v770_v33 = vsel %vm617_vm3, %v765_v32, 0  ;;  %v820_v35 = vsel %vm617_vm3, %v815_v34, 0 }
 0x1e3   : > { %4425 = vmatpush3.bf16.xpose.msra.mxu0 %v770_v33 }
 0x1e4   : > { %4436 = vmatprep.subr.bf16.mxu0 %v4722_v3 }
 0x1e5   : > { %v865_v36 = vpop.permute.xlu1 %864  ;;  %v915_v38 = vpop.permute.xlu0 %914 }
 0x1e6   : > { %4421 = vmatmul.mubr.msk.bf16.vlgmr.msra.gmra.mrb[4].mxu1 %vm617_vm3, %v604_v15  ;;  %v870_v37 = vsel %vm617_vm3, %v865_v36, 0  ;;  %v920_v40 = vsel %vm617_vm3, %v915_v38, 0 }
 0x1e7   : > { %4431 = vmatpush3.bf16.xpose.msra.mxu1 %v820_v35  ;;  %4432 = vmatprep.mubr.msk.bf16.mxu1 %vm4723_vm1, %v4722_v3 }
 0x1e8   : > { %4442 = vmatprep.subr.bf16.mxu1 %v4722_v3 }
 0x1e9   : > { %v965_v39 = vpop.permute.xlu1 %964 }
 0x1ea   : > { %4427 = vmatmul.mubr.msk.bf16.vlgmr.msra.gmra.mrb[8].mxu0 %vm617_vm3, %v606_v18  ;;  %v970_v41 = vsel %vm617_vm3, %v965_v39, 0 }
 0x1eb   : > { %4437 = vmatpush3.bf16.xpose.msra.mxu0 %v870_v37  ;;  %4438 = vmatprep.mubr.msk.bf16.mxu0 %vm4723_vm1, %v4722_v3 }
 0x1ec   : > { %4448 = vmatprep.subr.bf16.mxu0 %v4722_v3 }
 0x1ed   : > { %v1109_v42 = vpop.permute.xlu1 %1108 }
 0x1ee   : > { %4433 = vmatmul.mubr.msk.bf16.vlgmr.msra.gmra.mrb[8].mxu1 %vm617_vm3, %v608_v14  ;;  %v1115_v43 = vsel %vm1113_vm4, %v1109_v42, 0 }
 0x1ef   : > { %4443 = vmatpush3.bf16.xpose.msra.mxu1 %v920_v40  ;;  %4444 = vmatprep.mubr.msk.bf16.mxu1 %vm4723_vm1, %v4722_v3 }
 0x1f0   : > { %4454 = vmatprep.subr.bf16.mxu1 %v4722_v3 }
 0x1f2   : > { %4439 = vmatmul.mubr.msk.bf16.vlgmr.msra.gmra.mrb[12].mxu0 %vm617_vm3, %v610_v17 }
 0x1f3   : > { %4449 = vmatpush3.bf16.xpose.msra.mxu0 %v970_v41  ;;  %4450 = vmatprep.mubr.msk.bf16.mxu0 %vm4723_vm1, %v4722_v3 }
 0x1f4   : > { %4460 = vmatprep.subr.bf16.mxu0 %v4722_v3 }
 0x1f6   : > { %4445 = vmatmul.mubr.msk.bf16.vlgmr.msra.gmra.mrb[12].mxu1 %vm617_vm3, %v612_v22 }
 0x1f7   : > { %4455 = vmatpush3.bf16.msra.mxu1 %v1115_v43  ;;  %4456 = vmatprep.mubr.msk.bf16.mxu1 %vm4723_vm1, %v4722_v3 }
 0x1f8   : > { %4466 = vmatprep.subr.bf16.mxu1 %v4722_v3 }
 0x1fa   : > { %4451 = vmatmul.mubr.msk.bf16.vlgmr.msra.gmra.mrb[16].mxu0 %vm617_vm3, %v614_v21 }
 0x1fb   : > { %4462 = vmatprep.mubr.msk.bf16.mxu0 %vm4723_vm1, %v4722_v3 }
 0x250   : > { %v658_v44 = vpop.f32.mrb[0].mxu1  ;;  %v706_v45 = vpop.f32.mrb[4].mxu0 }
 0x251   : > { %v4410_v46 = vpop.f32.mrb[1].mxu1  ;;  %v4416_v47 = vpop.f32.mrb[5].mxu0  ;;  %v1012_v48 = vsel %vm617_vm3, %v658_v44, -inf  ;;  %v1015_v49 = vsel %vm617_vm3, %v706_v45, -inf }
 0x252   : > { %1013 = vmax.xlane.f32.xlu0 %v1012_v48  ;;  %v661_v50 = vpop.f32.mrb[2].mxu1  ;;  %1016 = vmax.xlane.f32.xlu1 %v1015_v49  ;;  %v709_v51 = vpop.f32.mrb[6].mxu0 }
 0x253   : > { %v4411_v52 = vpop.f32.mrb[3].mxu1  ;;  %v4417_v53 = vpop.f32.mrb[7].mxu0 }
 0x2b9   : > { %v756_v54 = vpop.f32.mrb[4].mxu1 }
 0x2ba   : > { %v4422_v55 = vpop.f32.mrb[5].mxu1  ;;  %v1018_v56 = vsel %vm617_vm3, %v756_v54, -inf }
 0x2bb   : > { %1019 = vmax.xlane.f32.xlu0 %v1018_v56  ;;  %v759_v57 = vpop.f32.mrb[6].mxu1 }
 0x2bc   : > { %v4423_v58 = vpop.f32.mrb[7].mxu1 }
 0x2bd   : > { %v806_v59 = vpop.f32.mrb[8].mxu0 }
 0x2be   : > { %v4428_v60 = vpop.f32.mrb[9].mxu0  ;;  %v1021_v61 = vsel %vm617_vm3, %v806_v59, -inf }
 0x2bf   : > { %1022 = vmax.xlane.f32.xlu0 %v1021_v61  ;;  %v809_v62 = vpop.f32.mrb[10].mxu0 }
 0x2c0   : > { %v4429_v63 = vpop.f32.mrb[11].mxu0 }
 0x2c1   : > { %v4940_v0 = vpop.f32.mrb[8].mxu1 }
 0x2c2   : > { %v4434_v1 = vpop.f32.mrb[9].mxu1  ;;  %v1024_v2 = vsel %vm617_vm3, %v4940_v0, -inf }
 0x2c3   : > { %v859_v4 = vpop.f32.mrb[10].mxu1  ;;  %1025 = vmax.xlane.f32.xlu1 %v1024_v2 }
 0x2c4   : > { %v4435_v5 = vpop.f32.mrb[11].mxu1 }
 0x2c5   : > { %v4944_v6 = vpop.f32.mrb[12].mxu0 }
 0x2c6   : > { %v4440_v7 = vpop.f32.mrb[13].mxu0  ;;  %v1027_v8 = vsel %vm617_vm3, %v4944_v6, -inf }
 0x2c7   : > { %1028 = vmax.xlane.f32.xlu0 %v1027_v8  ;;  %v909_v9 = vpop.f32.mrb[14].mxu0 }
 0x2c8   : > { %v4441_v10 = vpop.f32.mrb[15].mxu0 }
 0x2c9   : > { %v956_v11 = vpop.f32.mrb[12].mxu1 }
 0x2ca   : > { %v4446_v12 = vpop.f32.mrb[13].mxu1  ;;  %v1030_v14 = vsel %vm617_vm3, %v956_v11, -inf }
 0x2cb   : > { %v959_v15 = vpop.f32.mrb[14].mxu1  ;;  %1031 = vmax.xlane.f32.xlu1 %v1030_v14 }
 0x2cc   : > { %v4447_v17 = vpop.f32.mrb[15].mxu1 }
 0x2cd   : > { %v1006_v18 = vpop.f32.mrb[16].mxu0 }
 0x2ce   : > { %v4452_v21 = vpop.f32.mrb[17].mxu0  ;;  %v1033_v22 = vsel %vm617_vm3, %v1006_v18, -inf }
 0x2cf   : > { %1034 = vmax.xlane.f32.xlu0 %v1033_v22  ;;  %v1009_v25 = vpop.f32.mrb[18].mxu0 }
 0x2d0   : > { %v4453_v26 = vpop.f32.mrb[19].mxu0 }
 0x2dc   : > { %1205 = vrot.lane.b32.xlu1 %v4874_v16, %s4728_s27 }
 0x2df   : > { %v1014_v28 = vpop.xlane.xlu0 %1013  ;;  %v1017_v29 = vpop.xlane.xlu1 %1016 }
 0x2e0   : > { %1253 = vrot.lane.b32.xlu1 %v4879_v20, %s4728_s27  ;;  %v1036_v30 = vsub.f32 %v658_v44, %v1014_v28  ;;  %v1037_v31 = vsub.f32 %v706_v45, %v1017_v29 }
 0x2e2   : > { %v1044_v32 = vmul.f32 1.442695, %v1036_v30  ;;  %v1046_v33 = vmul.f32 1.442695, %v1037_v31 }
 0x2e4   : > { %4672 = vpow2.f32 %v1044_v32 }
 0x2e5   : > { %1157 = vrot.lane.b32.xlu0 %v4868_v13, %s4728_s27  ;;  %4674 = vpow2.f32 %v1046_v33 }
 0x2ee   : > { %v4673_v34 = vpop.eup %4672 }
 0x2ef   : > { %v4675_v35 = vpop.eup %4674  ;;  %v1060_v36 = vsel %vm617_vm3, %v4673_v34, 0.0 }
 0x2f0   : > { %v1063_v16 = vsel %vm617_vm3, %v4675_v35, 0.0 }
 0x304   : > { %1061 = vadd.xlane.f32.xlu1 %v1060_v36  ;;  %1064 = vadd.xlane.f32.xlu0 %v1063_v16 }
 0x348   : > { %v1020_v20 = vpop.xlane.xlu0 %1019 }
 0x349   : > { %v1038_v37 = vsub.f32 %v756_v54, %v1020_v20 }
 0x34b   : > { %v1048_v38 = vmul.f32 1.442695, %v1038_v37 }
 0x34c   : > { %v1023_v13 = vpop.xlane.xlu0 %1022 }
 0x34d   : > { %4676 = vpow2.f32 %v1048_v38  ;;  %v1039_v39 = vsub.f32 %v806_v59, %v1023_v13 }
 0x34f   : > { %v1050_v40 = vmul.f32 1.442695, %v1039_v39 }
 0x350   : > { %v1026_v49 = vpop.xlane.xlu1 %1025 }
 0x351   : > { %4678 = vpow2.f32 %v1050_v40  ;;  %v1040_v50 = vsub.f32 %v4940_v0, %v1026_v49 }
 0x353   : > { %v1052_v53 = vmul.f32 1.442695, %v1040_v50  ;;  %v595_v50 = vld [vmem:[%s4815_s29 + $0x4] sm:$0xf] }
 0x354   : > { %v1029_v42 = vpop.xlane.xlu0 %1028 }
 0x355   : > { %v1041_v52 = vsub.f32 %v4944_v6, %v1029_v42  ;;  %4680 = vpow2.f32 %v1052_v53 }
 0x357   : > { %v4958_v41 = vpop.eup %4676  ;;  %v1054_v55 = vmul.f32 1.442695, %v1041_v52 }
 0x358   : > { %v1066_v43 = vsel %vm617_vm3, %v4958_v41, 0.0  ;;  %v1032_v51 = vpop.xlane.xlu1 %1031 }
 0x359   : > { %1067 = vadd.xlane.f32.xlu1 %v1066_v43  ;;  %v1042_v54 = vsub.f32 %v956_v11, %v1032_v51  ;;  %4682 = vpow2.f32 %v1054_v55  ;;  %v1499_v51 = vsel %vm1113_vm4, %v595_v50, 0  ;;  %v4712_v50 = vld [vmem:[#allocation2] sm:$0xff] }
 0x35b   : > { %v4962_v44 = vpop.eup %4678  ;;  %v1056_v56 = vmul.f32 1.442695, %v1042_v54 }
 0x35c   : > { %v1035_v45 = vpop.xlane.xlu0 %1034  ;;  %v1069_v46 = vsel %vm617_vm3, %v4962_v44, 0.0  ;;  %v1206_v59 = vpop.permute.xlu1 %1205 }
 0x35d   : > { %1070 = vadd.xlane.f32.xlu0 %v1069_v46  ;;  %v1043_v57 = vsub.f32 %v1006_v18, %v1035_v45  ;;  %4684 = vpow2.f32 %v1056_v56  ;;  %v1211_v12 = vsel %vm1113_vm4, %v1206_v59, 0 }
 0x35f   : > { %v1058_v58 = vmul.f32 1.442695, %v1043_v57 }
 0x360   : > { %v1158_v47 = vpop.permute.xlu0 %1157  ;;  %v1254_v60 = vpop.permute.xlu1 %1253 }
 0x361   : > { %v1163_v48 = vsel %vm1113_vm4, %v1158_v47, 0  ;;  %4686 = vpow2.f32 %v1058_v58  ;;  %v1259_v14 = vsel %vm1113_vm4, %v1254_v60, 0  ;;  %v594_v47 = vld [vmem:[%s4815_s29] sm:$0xf] }
 0x362   : > { %4461 = vmatpush3.bf16.msra.mxu0 %v1163_v48  ;;  %v1546_v49 = vsel %vm1113_vm4, %v594_v47, 0 }
 0x363   : > { %4472 = vmatprep.subr.bf16.mxu0 %v4722_v3 }
 0x36a   : > { %1349 = vrot.lane.b32.xlu1 %v4883_v23, %s4728_s27  ;;  %v4974_v23 = vpop.eup %4680 }
 0x36b   : > { %v1072_v61 = vsel %vm617_vm3, %v4974_v23, 0.0 }
 0x373   : > { %1301 = vrot.lane.b32.xlu0 %v4877_v19, %s4728_s27  ;;  %v4976_v19 = vpop.eup %4682 }
 0x374   : > { %v4980_v62 = vpop.eup %4684  ;;  %v1075_v2 = vsel %vm617_vm3, %v4976_v19, 0.0 }
 0x375   : > { %v1078_v1 = vsel %vm617_vm3, %v4980_v62, 0.0  ;;  %v4986_v4 = vpop.eup %4686 }
 0x376   : > { %v1081_v5 = vsel %vm617_vm3, %v4986_v4, 0.0 }
 0x38e   : > { %1073 = vadd.xlane.f32.xlu1 %v1072_v61 }
 0x391   : > { %v1062_v63 = vpop.xlane.xlu1 %1061  ;;  %v1065_v0 = vpop.xlane.xlu0 %1064 }
 0x392   : > { %4688 = vrcp.f32 %v1062_v63  ;;  %1079 = vadd.xlane.f32.xlu1 %v1078_v1  ;;  %1076 = vadd.xlane.f32.xlu0 %v1075_v2 }
 0x393   : > { %4690 = vrcp.f32 %v1065_v0  ;;  %v596_v0 = vld [vmem:[%s4815_s29 + $0x8] sm:$0xf] }
 0x396   : > { %1082 = vadd.xlane.f32.xlu0 %v1081_v5 }
 0x39c   : > { %v4689_v6 = vpop.eup %4688 }
 0x39d   : > { %v4691_v7 = vpop.eup %4690  ;;  %v1092_v8 = vmul.f32 %v4689_v6, %v4673_v34  ;;  %v1594_v6 = vsel %vm1113_vm4, %v596_v0, 0  ;;  %v1737_v0 = vld [vmem:[%s4825_s17] sm:$0xff] }
 0x39e   : > { %v1093_v9 = vmul.f32 %v4691_v7, %v4675_v35 }
 0x39f   : > { %v1100_v10 = vpack.c.bf16 %v1092_v8, %v1092_v8 }
 0x3a0   : > { %v1101_v11 = vpack.c.bf16 %v1093_v9, %v1093_v9 }
 0x3a1   : > { %4457 = vmatmul.mubr.msk.bf16.vlgmr.msra.gmra.mrb[16].mxu1 %vm617_vm3, %v1100_v10 }
 0x3a2   : > { %4463 = vmatmul.mubr.msk.bf16.vlgmr.msra.gmra.mrb[20].mxu0 %vm617_vm3, %v1101_v11  ;;  %4467 = vmatpush3.bf16.msra.mxu1 %v1211_v12 }
 0x3a3   : > { %4473 = vmatpush3.bf16.msra.mxu0 %v1259_v14  ;;  %1445 = vrot.lane.b32.xlu1 %v4889_v27, %s4728_s27 }
 0x3a4   : > { %4468 = vmatprep.mubr.msk.bf16.mxu1 %vm4723_vm1, %v4722_v3  ;;  %4478 = vmatprep.subr.bf16.mxu1 %v4722_v3 }
 0x3a5   : > { %4474 = vmatprep.mubr.msk.bf16.mxu0 %vm4723_vm1, %v4722_v3  ;;  %4484 = vmatprep.subr.bf16.mxu0 %v4722_v3 }
 0x3ac   : > { %1397 = vrot.lane.b32.xlu0 %v4885_v24, %s4728_s27 }
 0x3e6   : > { %v1068_v15 = vpop.xlane.xlu1 %1067 }
 0x3e7   : > { %4692 = vrcp.f32 %v1068_v15 }
 0x3ea   : > { %v1071_v17 = vpop.xlane.xlu0 %1070  ;;  %v1350_v29 = vpop.permute.xlu1 %1349 }
 0x3eb   : > { %4694 = vrcp.f32 %v1071_v17  ;;  %v1355_v30 = vsel %vm1113_vm4, %v1350_v29, 0 }
 0x3ee   : > { %v1302_v21 = vpop.permute.xlu0 %1301 }
 0x3ef   : > { %v1307_v28 = vsel %vm1113_vm4, %v1302_v21, 0 }
 0x3f1   : > { %v4693_v18 = vpop.eup %4692 }
 0x3f2   : > { %v1094_v27 = vmul.f32 %v4693_v18, %v4958_v41 }
 0x3f4   : > { %v1102_v22 = vpack.c.bf16 %v1094_v27, %v1094_v27 }
 0x3f5   : > { %v4695_v25 = vpop.eup %4694 }
 0x3f6   : > { %v1095_v26 = vmul.f32 %v4695_v25, %v4962_v44  ;;  %4469 = vmatmul.mubr.msk.bf16.vlgmr.msra.gmra.mrb[20].mxu1 %vm617_vm3, %v1102_v22 }
 0x3f7   : > { %4479 = vmatpush3.bf16.msra.mxu1 %v1307_v28  ;;  %4480 = vmatprep.mubr.msk.bf16.mxu1 %vm4723_vm1, %v4722_v3 }
 0x3f8   : > { %v1103_v24 = vpack.c.bf16 %v1095_v26, %v1095_v26  ;;  %4490 = vmatprep.subr.bf16.mxu1 %v4722_v3 }
 0x3fa   : > { %4475 = vmatmul.mubr.msk.bf16.vlgmr.msra.gmra.mrb[24].mxu0 %vm617_vm3, %v1103_v24 }
 0x3fb   : > { %4485 = vmatpush3.bf16.msra.mxu0 %v1355_v30  ;;  %4486 = vmatprep.mubr.msk.bf16.mxu0 %vm4723_vm1, %v4722_v3 }
 0x3fc   : > { %4496 = vmatprep.subr.bf16.mxu0 %v4722_v3 }
 0x41b   : > { %v1074_v31 = vpop.xlane.xlu1 %1073 }
 0x41c   : > { %4696 = vrcp.f32 %v1074_v31 }
 0x41f   : > { %v1080_v32 = vpop.xlane.xlu1 %1079  ;;  %v1077_v33 = vpop.xlane.xlu0 %1076 }
 0x420   : > { %4698 = vrcp.f32 %v1080_v32 }
 0x421   : > { %4700 = vrcp.f32 %v1077_v33 }
 0x423   : > { %v1083_v34 = vpop.xlane.xlu0 %1082  ;;  %v1446_v41 = vpop.permute.xlu1 %1445 }
 0x424   : > { %4702 = vrcp.f32 %v1083_v34  ;;  %v1451_v44 = vsel %vm1113_vm4, %v1446_v41, 0 }
 0x426   : > { %v4697_v35 = vpop.eup %4696 }
 0x427   : > { %v1096_v36 = vmul.f32 %v4697_v35, %v4974_v23  ;;  %v1398_v16 = vpop.permute.xlu0 %1397 }
 0x428   : > { %v1403_v13 = vsel %vm1113_vm4, %v1398_v16, 0 }
 0x429   : > { %v1104_v20 = vpack.c.bf16 %v1096_v36, %v1096_v36 }
 0x42a   : > { %v4699_v37 = vpop.eup %4698 }
 0x42b   : > { %v4701_v38 = vpop.eup %4700  ;;  %4481 = vmatmul.mubr.msk.bf16.vlgmr.msra.gmra.mrb[24].mxu1 %vm617_vm3, %v1104_v20  ;;  %v1098_v40 = vmul.f32 %v4699_v37, %v4980_v62 }
 0x42c   : > { %v1097_v39 = vmul.f32 %v4701_v38, %v4976_v19  ;;  %4491 = vmatpush3.bf16.msra.mxu1 %v1403_v13  ;;  %4492 = vmatprep.mubr.msk.bf16.mxu1 %vm4723_vm1, %v4722_v3  ;;  %v597_v19 = vld [vmem:[%s4815_s29 + $0xc] sm:$0xf] }
 0x42d   : > { %4502 = vmatprep.subr.bf16.mxu1 %v4722_v3  ;;  %v1106_v45 = vpack.c.bf16 %v1098_v40, %v1098_v40  ;;  %v1644_v60 = vsel %vm1113_vm4, %v597_v19, 0 }
 0x42e   : > { %v1105_v42 = vpack.c.bf16 %v1097_v39, %v1097_v39  ;;  %v4703_v43 = vpop.eup %4702 }
 0x42f   : > { %v1099_v46 = vmul.f32 %v4703_v43, %v4986_v4 }
 0x430   : > { %4487 = vmatmul.mubr.msk.bf16.vlgmr.msra.gmra.mrb[28].mxu0 %vm617_vm3, %v1105_v42 }
 0x431   : > { %4497 = vmatpush3.bf16.msra.mxu0 %v1451_v44  ;;  %4498 = vmatprep.mubr.msk.bf16.mxu0 %vm4723_vm1, %v4722_v3  ;;  %v1107_v48 = vpack.c.bf16 %v1099_v46, %v1099_v46 }
 0x432   : > { %4508 = vmatprep.subr.bf16.mxu0 %v4722_v3 }
 0x433   : > { %4493 = vmatmul.mubr.msk.bf16.vlgmr.msra.gmra.mrb[28].mxu1 %vm617_vm3, %v1106_v45 }
 0x434   : > { %4504 = vmatprep.mubr.msk.bf16.mxu1 %vm4723_vm1, %v4722_v3  ;;  %4503 = vmatpush3.bf16.msra.mxu1 %v1499_v51 }
 0x435   : > { %4514 = vmatprep.subr.bf16.mxu1 %v4722_v3 }
 0x438   : > { %4499 = vmatmul.mubr.msk.bf16.vlgmr.msra.gmra.mrb[32].mxu0 %vm617_vm3, %v1107_v48 }
 0x439   : > { %4509 = vmatpush3.bf16.msra.mxu0 %v1546_v49  ;;  %4510 = vmatprep.mubr.msk.bf16.mxu0 %vm4723_vm1, %v4722_v3 }
 0x43a   : > { %4520 = vmatprep.subr.bf16.mxu0 %v4722_v3 }
 0x474   : > { %v1151_v52 = vpop.f32.mrb[16].mxu1 }
 0x475   : > { %v1199_v53 = vpop.f32.mrb[20].mxu0  ;;  %v4458_v54 = vpop.f32.mrb[17].mxu1 }
 0x476   : > { %v1493_v55 = vpack.c.bf16 %v1199_v53, %v1151_v52  ;;  %v4464_v56 = vpop.f32.mrb[21].mxu0  ;;  %v1154_v57 = vpop.f32.mrb[18].mxu1  ;;  %v4713_v53 = vld [vmem:[#allocation2 + $0x8] sm:$0xff] }
 0x477   : > { %v1202_v58 = vpop.f32.mrb[22].mxu0  ;;  %v4459_v59 = vpop.f32.mrb[19].mxu1 }
 0x478   : > { %v4465_v23 = vpop.f32.mrb[23].mxu0  ;;  %4511 = vmatmul.mubr.msk.bf16.vlgmr.msra.gmra.mrb[36].mxu0 %vm617_vm3, %v1493_v55 }
 0x479   : > { %4522 = vmatprep.mubr.msk.bf16.mxu0 %vm4723_vm1, %v4722_v3  ;;  %4521 = vmatpush3.bf16.msra.mxu0 %v1644_v60 }
 0x4c9   : > { %v1247_v61 = vpop.f32.mrb[20].mxu1 }
 0x4ca   : > { %v4470_v62 = vpop.f32.mrb[21].mxu1 }
 0x4cb   : > { %v1250_v63 = vpop.f32.mrb[22].mxu1 }
 0x4cc   : > { %v4471_v1 = vpop.f32.mrb[23].mxu1 }
 0x4cd   : > { %v1295_v2 = vpop.f32.mrb[24].mxu0  ;;  %v1739_v1 = vld [vmem:[%s4825_s17 + $0x40] sm:$0xff] }
 0x4ce   : > { %v1494_v4 = vpack.c.bf16 %v1295_v2, %v1247_v61  ;;  %v4476_v5 = vpop.f32.mrb[25].mxu0  ;;  %v1738_v2 = vld [vmem:[%s4825_s17 + $0x8] sm:$0xff] }
 0x4cf   : > { %v1298_v7 = vpop.f32.mrb[26].mxu0  ;;  %v1740_v5 = vld [vmem:[%s4825_s17 + $0x48] sm:$0xff] }
 0x4d0   : > { %v4477_v8 = vpop.f32.mrb[27].mxu0  ;;  %4505 = vmatmul.mubr.msk.bf16.vlgmr.msra.gmra.mrb[32].mxu1 %vm617_vm3, %v1494_v4  ;;  %v4000_v4 = vcombine.high %v1737_v0, %v1739_v1  ;;  %v4001_v7 = vcombine.low %v1738_v2, %v1740_v5 }
 0x4d1   : > { %4515 = vmatpush3.bf16.msra.mxu1 %v1594_v6  ;;  %4516 = vmatprep.mubr.msk.bf16.mxu1 %vm4723_vm1, %v4722_v3  ;;  %v3999_v6 = vcombine.low %v1737_v0, %v1739_v1  ;;  %v4002_v8 = vcombine.high %v1738_v2, %v1740_v5  ;;  %v4558_v0 = vld [vmem:[%s4840_s30 + $0x118] sm:$0xff]   ;;  %v4560_v2 = vld [vmem:[%s4840_s30 + $0x160] sm:$0xff]  }
 0x4d2   : > { %1810 = vmatprep.subr.bf16.mxu1 %v4000_v4  ;;  %v4559_v1 = vld [vmem:[%s4840_s30 + $0x198] sm:$0xff]   ;;  %v4561_v4 = vld [vmem:[%s4840_s30 + $0x1e0] sm:$0xff]  }
 0x4d3   : > { %1853 = vmatprep.subr.bf16.mxu0 %v4002_v8  ;;  %v4562_v5 = vld [vmem:[%s4840_s30 + $0x120] sm:$0xff]   ;;  %v4565_v8 = vld [vmem:[%s4840_s30 + $0x1e8] sm:$0xff]  }
 0x4fe   : > { %v1343_v9 = vpop.f32.mrb[24].mxu1 }
 0x4ff   : > { %v4482_v10 = vpop.f32.mrb[25].mxu1 }
 0x500   : > { %v1346_v11 = vpop.f32.mrb[26].mxu1  ;;  %v1743_v10 = vld [vmem:[%s4825_s17 + $0xc0] sm:$0xff] }
 0x501   : > { %v4483_v12 = vpop.f32.mrb[27].mxu1  ;;  %v1742_v11 = vld [vmem:[%s4825_s17 + $0x88] sm:$0xff] }
 0x503   : > { %v1391_v14 = vpop.f32.mrb[28].mxu0 }
 0x504   : > { %v1589_v15 = vpack.c.bf16 %v1391_v14, %v1343_v9  ;;  %v4488_v17 = vpop.f32.mrb[29].mxu0  ;;  %v1741_v9 = vld [vmem:[%s4825_s17 + $0x80] sm:$0xff]  ;;  %v1744_v14 = vld [vmem:[%s4825_s17 + $0xc8] sm:$0xff] }
 0x505   : > { %v1394_v18 = vpop.f32.mrb[30].mxu0  ;;  %v4004_v12 = vcombine.high %v1741_v9, %v1743_v10  ;;  %v4005_v17 = vcombine.low %v1742_v11, %v1744_v14 }
 0x506   : > { %v4489_v27 = vpop.f32.mrb[31].mxu0  ;;  %4517 = vmatmul.mubr.msk.bf16.vlgmr.msra.gmra.mrb[36].mxu1 %vm617_vm3, %v1589_v15  ;;  %v1439_v21 = vpop.f32.mrb[28].mxu1  ;;  %v4003_v15 = vcombine.low %v1741_v9, %v1743_v10  ;;  %v4006_v18 = vcombine.high %v1742_v11, %v1744_v14  ;;  %v4566_v9 = vld [vmem:[%s4840_s30 + $0x128] sm:$0xff]   ;;  %v4568_v11 = vld [vmem:[%s4840_s30 + $0x170] sm:$0xff]  }
 0x507   : > { %v4494_v22 = vpop.f32.mrb[29].mxu1  ;;  %1811 = vmatpush1.bf16.msra.mxu1 %v3999_v6  ;;  %v1972_v27 = vld [vmem:[%s4825_s17 + $0x10] sm:$0xff]  ;;  %v4563_v6 = vld [vmem:[%s4840_s30 + $0x1a0] sm:$0xff]   ;;  %v4567_v10 = vld [vmem:[%s4840_s30 + $0x1a8] sm:$0xff]  }
 0x508   : > { %v1442_v25 = vpop.f32.mrb[30].mxu1  ;;  %1812 = vmatprep.subr.bf16.mxu1 %v4004_v12  ;;  %v1973_v22 = vld [vmem:[%s4825_s17 + $0x18] sm:$0xff]  ;;  %v4569_v12 = vld [vmem:[%s4840_s30 + $0x1f0] sm:$0xff]  }
 0x509   : > { %v4495_v26 = vpop.f32.mrb[31].mxu1  ;;  %v4729_v25 = vmov 0   ;;  %v4570_v14 = vld [vmem:[%s4840_s30 + $0x130] sm:$0xff]  }
 0x50a   : > { %1842 = vmatprep.mubr.bf16.mxu1 %v4729_v25 }
 0x50b   : > { %v1487_v28 = vpop.f32.mrb[32].mxu0  ;;  %1813 = vmatpush1.bf16.msra.mxu1 %v4003_v15  ;;  %v4571_v15 = vld [vmem:[%s4840_s30 + $0x1b0] sm:$0xff]  }
 0x50c   : > { %v1639_v29 = vpack.c.bf16 %v1487_v28, %v1439_v21  ;;  %v4500_v24 = vpop.f32.mrb[33].mxu0  ;;  %v1974_v21 = vld [vmem:[%s4825_s17 + $0x50] sm:$0xff]  ;;  %v1975_v28 = vld [vmem:[%s4825_s17 + $0x58] sm:$0xff] }
 0x50d   : > { %v1490_v30 = vpop.f32.mrb[34].mxu0  ;;  %v4010_v26 = vcombine.high %v1972_v27, %v1974_v21  ;;  %v4011_v24 = vcombine.low %v1973_v22, %v1975_v28 }
 0x50e   : > { %v4501_v3 = vpop.f32.mrb[35].mxu0  ;;  %4523 = vmatmul.mubr.msk.bf16.vlgmr.msra.gmra.mrb[40].mxu0 %vm617_vm3, %v1639_v29  ;;  %v4009_v29 = vcombine.low %v1972_v27, %v1974_v21  ;;  %v4012_v30 = vcombine.high %v1973_v22, %v1975_v28  ;;  %v4574_v27 = vld [vmem:[%s4840_s30 + $0x138] sm:$0xff]   ;;  %v4576_v22 = vld [vmem:[%s4840_s30 + $0x40] sm:$0xff]   ;;  %v1747_v28 = vlaneseq }
 0x50f   : > { %1854 = vmatpush1.bf16.msra.mxu0 %v4001_v7  ;;  %1885 = vmatprep.mubr.bf16.mxu0 %v4729_v25  ;;  %v4564_v7 = vld [vmem:[%s4840_s30 + $0x168] sm:$0xff]   ;;  %v4575_v21 = vld [vmem:[%s4840_s30 + $0x1b8] sm:$0xff]  }
 0x510   : > { %1855 = vmatprep.subr.bf16.mxu0 %v4006_v18  ;;  %2042 = vmatprep.subr.bf16.mxu1 %v4010_v26  ;;  %v4573_v18 = vld [vmem:[%s4840_s30 + $0x1f8] sm:$0xff]   ;;  %v4577_v26 = vld [vmem:[%s4840_s30 + $0xc0] sm:$0xff]  }
 0x513   : > { %1856 = vmatpush1.bf16.msra.mxu0 %v4005_v17  ;;  %v4572_v17 = vld [vmem:[%s4840_s30 + $0x178] sm:$0xff]  }
 0x514   : > { %2085 = vmatprep.subr.bf16.mxu0 %v4012_v30 }
 0x54b   : > { %v1582_v31 = vpop.f32.mrb[36].mxu0 }
 0x54c   : > { %v4512_v32 = vpop.f32.mrb[37].mxu0 }
 0x54d   : > { %v1585_v33 = vpop.f32.mrb[38].mxu0 }
 0x54e   : > { %v4513_v34 = vpop.f32.mrb[39].mxu0 }
 0x5a3   : > { %v1535_v35 = vpop.f32.mrb[32].mxu1 }
 0x5a4   : > { %v1583_v36 = vadd.f32 %v1582_v31, %v1535_v35  ;;  %v4506_v16 = vpop.f32.mrb[33].mxu1 }
 0x5a5   : > { %v1538_v20 = vpop.f32.mrb[34].mxu1 }
 0x5a6   : > { %v1586_v37 = vadd.f32 %v1585_v33, %v1538_v20  ;;  %v4507_v38 = vpop.f32.mrb[35].mxu1  ;;  %v3997_v20 = vld [vmem:[%s5375_s15] ss:$0 sm:$0xff] }
 0x5d9   : > { %v1630_v13 = vpop.f32.mrb[36].mxu1 }
 0x5da   : > { %v1637_v39 = vadd.f32 %v1630_v13, %v1583_v36  ;;  %v4518_v40 = vpop.f32.mrb[37].mxu1 }
 0x5db   : > { %v1633_v41 = vpop.f32.mrb[38].mxu1 }
 0x5dc   : > { %v1638_v42 = vadd.f32 %v1633_v41, %v1586_v37  ;;  %v4519_v43 = vpop.f32.mrb[39].mxu1  ;;  %v1976_v41 = vld [vmem:[%s4825_s17 + $0x90] sm:$0xff] }
 0x5dd   : > { %v1977_v43 = vld [vmem:[%s4825_s17 + $0x98] sm:$0xff] }
 0x5e1   : > { %v1680_v44 = vpop.f32.mrb[40].mxu0 }
 0x5e2   : > { %v1687_v45 = vadd.f32 %v1680_v44, %v1637_v39  ;;  %v4524_v46 = vpop.f32.mrb[41].mxu0  ;;  %v3998_v39 = vld [vmem:[%s5376_s22] ss:$0 sm:$0xff]  ;;  %v1979_v44 = vld [vmem:[%s4825_s17 + $0xd8] sm:$0xff] }
 0x5e3   : > { %v1683_v47 = vpop.f32.mrb[42].mxu0 }
 0x5e4   : > { %v1688_v48 = vadd.f32 %v1683_v47, %v1638_v42  ;;  %v4525_v49 = vpop.f32.mrb[43].mxu0  ;;  %v1691_v51 = vadd.f32 %v4712_v50, %v1687_v45  ;;  %v1978_v42 = vld [vmem:[%s4825_s17 + $0xd0] sm:$0xff] }
 0x5e5   : > { %v4016_v49 = vcombine.high %v1977_v43, %v1979_v44  ;;  %v4013_v50 = vcombine.low %v1976_v41, %v1978_v42 }
 0x5e6   : > { %v1693_v52 = vsel %vm548_vm2, %v1691_v51, 0.0  ;;  %v1692_v54 = vadd.f32 %v4713_v53, %v1688_v48  ;;  %v4014_v48 = vcombine.high %v1976_v41, %v1978_v42  ;;  %v4545_v53 = vld [vmem:[%s4840_s30 + $0x1c0] sm:$0xff]  }
 0x5e7   : > { %1694 = vadd.xlane.f32.xlu0 %v1693_v52  ;;  %v4544_v52 = vld [vmem:[%s4840_s30 + $0x140] sm:$0xff]  }
 0x5e8   : > { %v1696_v55 = vsel %vm548_vm2, %v1692_v54, 0.0 }
 0x5e9   : > { %1697 = vadd.xlane.f32.xlu1 %v1696_v55  ;;  %v4547_v55 = vld [vmem:[%s4840_s30 + $0x180] sm:$0xff]  }
 0x674   : > { %v1695_v56 = vpop.xlane.xlu0 %1694 }
 0x675   : > { %v1700_v57 = vmul.f32 0.03125, %v1695_v56  ;;  %v4548_v56 = vld [vmem:[%s4840_s30 + $0x148] sm:$0xff]  }
 0x676   : > { %v1698_v58 = vpop.xlane.xlu1 %1697 }
 0x677   : > { %v1702_v59 = vsub.f32 %v1691_v51, %v1700_v57  ;;  %v1701_v23 = vmul.f32 0.03125, %v1698_v58  ;;  %v4015_v51 = vcombine.low %v1977_v43, %v1979_v44  ;;  %v4549_v57 = vld [vmem:[%s4840_s30 + $0x1c8] sm:$0xff]  }
 0x678   : > { %v4550_v58 = vld [vmem:[%s4840_s30 + $0x108] sm:$0xff]  }
 0x679   : > { %v1703_v19 = vsub.f32 %v1692_v54, %v1701_v23  ;;  %v1704_v60 = vmul.f32 %v1702_v59, %v1702_v59  ;;  %v4546_v54 = vld [vmem:[%s4840_s30 + $0x100] sm:$0xff]   ;;  %v4552_v23 = vld [vmem:[%s4840_s30 + $0x150] sm:$0xff]  }
 0x67b   : > { %v1706_v61 = vsel %vm548_vm2, %v1704_v60, 0.0  ;;  %v1705_v62 = vmul.f32 %v1703_v19, %v1703_v19  ;;  %v4554_v60 = vld [vmem:[%s4840_s30 + $0x110] sm:$0xff]  }
 0x67c   : > { %1707 = vadd.xlane.f32.xlu0 %v1706_v61  ;;  %v4555_v61 = vld [vmem:[%s4840_s30 + $0x190] sm:$0xff]  }
 0x67d   : > { %v1709_v63 = vsel %vm548_vm2, %v1705_v62, 0.0  ;;  %v4556_v62 = vld [vmem:[%s4840_s30 + $0x158] sm:$0xff]  }
 0x680   : > { %1710 = vadd.xlane.f32.xlu0 %v1709_v63  ;;  %v4557_v63 = vld [vmem:[%s4840_s30 + $0x1d8] sm:$0xff]  }
 0x709   : > { %v1708_v3 = vpop.xlane.xlu0 %1707 }
 0x70a   : > { %v1712_v31 = vmul.f32 0.03125, %v1708_v3  ;;  %v1745_v3 = vld [vmem:[%s4830_s24] sm:$0xf] }
 0x70c   : > { %v1714_v32 = vadd.f32 1e-05, %v1712_v31 }
 0x70d   : > { %v1711_v33 = vpop.xlane.xlu0 %1710 }
 0x70e   : > { %4704 = vrsqrt.f32 %v1714_v32  ;;  %v1713_v34 = vmul.f32 0.03125, %v1711_v33 }
 0x710   : > { %v1715_v35 = vadd.f32 1e-05, %v1713_v34 }
 0x712   : > { %4706 = vrsqrt.f32 %v1715_v35 }
 0x718   : > { %v4705_v36 = vpop.eup %4704 }
 0x719   : > { %v1718_v16 = vmul.f32 %v4705_v36, %v1702_v59  ;;  %v4551_v59 = vld [vmem:[%s4840_s30 + $0x188] sm:$0xff]  }
 0x71b   : > { %v1726_v38 = vmul.f32 %v3997_v20, %v1718_v16 }
 0x71c   : > { %v4707_v37 = vpop.eup %4706 }
 0x71d   : > { %v1719_v13 = vmul.f32 %v4707_v37, %v1703_v19  ;;  %v5086_v45 = vadd.f32 %v3998_v39, %v1726_v38  ;;  %v4553_v19 = vld [vmem:[%s4840_s30 + $0x1d0] sm:$0xff]   ;;  %v1980_v37 = vld [vmem:[%s4830_s24 + $0x4] sm:$0xf] }
 0x71f   : > { %v1727_v40 = vmul.f32 %v3997_v20, %v1719_v13 }
 0x721   : > { %v5088_v46 = vadd.f32 %v3998_v39, %v1727_v40 }
 0x723   : > { %v5092_v47 = vpack.c.bf16 %v5088_v46, %v5086_v45 }
 0x725   : > { %4007 = vmatmul.mubr.msk.bf16.vlgmr.msra.gmra.mrb[40].mxu1 %vm548_vm2, %v5092_v47  ;;  %4008 = vmatmul.mubr.msk.bf16.vlgmr.msra.gmra.mrb[44].mxu0 %vm548_vm2, %v5092_v47 }
 0x726   : > { %2043 = vmatpush1.bf16.msra.mxu1 %v4009_v29  ;;  %2086 = vmatpush1.bf16.msra.mxu0 %v4011_v24  ;;  %v1748_v29 = vshrl.u32 %v1747_v28, 7 }
 0x727   : > { %2044 = vmatprep.subr.bf16.mxu1 %v4014_v48  ;;  %2087 = vmatprep.subr.bf16.mxu0 %v4016_v49 }
 0x728   : > { %2074 = vmatprep.mubr.bf16.mxu1 %v4729_v25  ;;  %2117 = vmatprep.mubr.bf16.mxu0 %v4729_v25  ;;  %v5138_v24 = vsub.s32 0, %v1748_v29  ;;  %v5140_v30 = vsub.s32 2, %v1748_v29  ;;  %v5143_v31 = vsub.s32 1, %v1748_v29  ;;  %v5145_v32 = vsub.s32 3, %v1748_v29 }
 0x72a   : > { %2045 = vmatpush1.bf16.msra.mxu1 %v4013_v50  ;;  %2088 = vmatpush1.bf16.msra.mxu0 %v4015_v51  ;;  %v1750_v33 = vrot.slane %v1745_v3, %v5138_v24  ;;  %v1758_v34 = vrot.slane %v1745_v3, %v5140_v30  ;;  %v1754_v35 = vrot.slane %v1745_v3, %v5143_v31 }
 0x72b   : > { %4222 = vmatprep.subr.bf16.mxu1 %v4544_v52  ;;  %4244 = vmatprep.subr.bf16.mxu0 %v4545_v53  ;;  %v1762_v36 = vrot.slane %v1745_v3, %v5145_v32  ;;  %v1985_v52 = vrot.slane %v1980_v37, %v5138_v24  ;;  %v1993_v53 = vrot.slane %v1980_v37, %v5140_v30 }
 0x72d   : > { %4017 = vmatmul.mubr.msk.bf16.vlgmr.msra.gmra.mrb[44].mxu1 %vm548_vm2, %v5092_v47  ;;  %4018 = vmatmul.mubr.msk.bf16.vlgmr.msra.gmra.mrb[48].mxu0 %vm548_vm2, %v5092_v47 }
 0x72e   : > { %4223 = vmatpush3.bf16.msra.mxu1 %v4546_v54  ;;  %4245 = vmatpush3.bf16.msra.mxu0 %v4547_v55 }
 0x72f   : > { %4224 = vmatprep.subr.bf16.mxu1 %v4548_v56  ;;  %4246 = vmatprep.subr.bf16.mxu0 %v4549_v57  ;;  %v1989_v56 = vrot.slane %v1980_v37, %v5143_v31  ;;  %v1997_v57 = vrot.slane %v1980_v37, %v5145_v32 }
 0x732   : > { %4225 = vmatpush3.bf16.msra.mxu1 %v4550_v58  ;;  %4247 = vmatpush3.bf16.msra.mxu0 %v4551_v59 }
 0x733   : > { %4226 = vmatprep.subr.bf16.mxu1 %v4552_v23  ;;  %4248 = vmatprep.subr.bf16.mxu0 %v4553_v19 }
 0x736   : > { %4227 = vmatpush3.bf16.msra.mxu1 %v4554_v60  ;;  %4249 = vmatpush3.bf16.msra.mxu0 %v4555_v61 }
 0x737   : > { %4228 = vmatprep.subr.bf16.mxu1 %v4556_v62  ;;  %4250 = vmatprep.subr.bf16.mxu0 %v4557_v63 }
 0x73a   : > { %4229 = vmatpush3.bf16.msra.mxu1 %v4558_v0  ;;  %4251 = vmatpush3.bf16.msra.mxu0 %v4559_v1 }
 0x73b   : > { %4230 = vmatprep.subr.bf16.mxu1 %v4560_v2  ;;  %4252 = vmatprep.subr.bf16.mxu0 %v4561_v4 }
 0x73e   : > { %4231 = vmatpush3.bf16.msra.mxu1 %v4562_v5  ;;  %4253 = vmatpush3.bf16.msra.mxu0 %v4563_v6 }
 0x73f   : > { %4232 = vmatprep.subr.bf16.mxu1 %v4564_v7  ;;  %4254 = vmatprep.subr.bf16.mxu0 %v4565_v8 }
 0x742   : > { %4233 = vmatpush3.bf16.msra.mxu1 %v4566_v9  ;;  %4255 = vmatpush3.bf16.msra.mxu0 %v4567_v10 }
 0x743   : > { %4234 = vmatprep.subr.bf16.mxu1 %v4568_v11  ;;  %4256 = vmatprep.subr.bf16.mxu0 %v4569_v12 }
 0x746   : > { %4235 = vmatpush3.bf16.msra.mxu1 %v4570_v14  ;;  %4257 = vmatpush3.bf16.msra.mxu0 %v4571_v15 }
 0x747   : > { %4236 = vmatprep.subr.bf16.mxu1 %v4572_v17  ;;  %4258 = vmatprep.subr.bf16.mxu0 %v4573_v18 }
 0x74a   : > { %4237 = vmatpush3.bf16.msra.mxu1 %v4574_v27  ;;  %4259 = vmatpush3.bf16.msra.mxu0 %v4575_v21 }
 0x74b   : > { %4266 = vmatprep.subr.bf16.mxu1 %v4576_v22  ;;  %4288 = vmatprep.subr.bf16.mxu0 %v4577_v26 }
 0x7f8   : > { %v1844_v16 = vpop.f32.mrb[40].mxu1  ;;  %v1887_v20 = vpop.f32.mrb[44].mxu0 }
 0x7f9   : > { %v1845_v38 = vadd.f32 %v1844_v16, %v1750_v33  ;;  %v1888_v13 = vadd.f32 %v1887_v20, %v1758_v34  ;;  %v1846_v39 = vpop.f32.mrb[41].mxu1  ;;  %v1889_v40 = vpop.f32.mrb[45].mxu0 }
 0x7fa   : > { %v1847_v41 = vadd.f32 %v1846_v39, %v1754_v35  ;;  %v1890_v42 = vadd.f32 %v1889_v40, %v1762_v36  ;;  %v1848_v43 = vpop.f32.mrb[42].mxu1  ;;  %v1891_v44 = vpop.f32.mrb[46].mxu0  ;;  %v4578_v39 = vld [vmem:[%s4840_s30] sm:$0xff]  }
 0x7fb   : > { %v1849_v48 = vadd.f32 %v1848_v43, %v1750_v33  ;;  %v1892_v49 = vadd.f32 %v1891_v44, %v1758_v34  ;;  %v1850_v50 = vpop.f32.mrb[43].mxu1  ;;  %v1893_v51 = vpop.f32.mrb[47].mxu0  ;;  %v1896_v58 = vmax.f32 %v1845_v38, 0.0  ;;  %v1898_v59 = vmax.f32 %v1888_v13, 0.0  ;;  %v4579_v40 = vld [vmem:[%s4840_s30 + $0x80] sm:$0xff]   ;;  %v4582_v43 = vld [vmem:[%s4840_s30 + $0x8] sm:$0xff]  }
 0x7fc   : > { %v1851_v54 = vadd.f32 %v1850_v50, %v1754_v35  ;;  %v1894_v55 = vadd.f32 %v1893_v51, %v1762_v36  ;;  %v1897_v60 = vmax.f32 %v1847_v41, 0.0  ;;  %v1899_v61 = vmax.f32 %v1890_v42, 0.0  ;;  %v4580_v41 = vld [vmem:[%s4840_s30 + $0x48] sm:$0xff]   ;;  %v4586_v50 = vld [vmem:[%s4840_s30 + $0x10] sm:$0xff]  }
 0x7fd   : > { %v1900_v23 = vmax.f32 %v1849_v48, 0.0  ;;  %v1902_v19 = vmax.f32 %v1892_v49, 0.0  ;;  %v4581_v42 = vld [vmem:[%s4840_s30 + $0xc8] sm:$0xff]   ;;  %v4584_v48 = vld [vmem:[%s4840_s30 + $0x50] sm:$0xff]  }
 0x7fe   : > { %v1901_v62 = vmax.f32 %v1851_v54, 0.0  ;;  %v1903_v63 = vmax.f32 %v1894_v55, 0.0  ;;  %v4583_v44 = vld [vmem:[%s4840_s30 + $0x88] sm:$0xff]   ;;  %v4585_v49 = vld [vmem:[%s4840_s30 + $0xd0] sm:$0xff]   ;;  %v4590_v54 = vld [vmem:[%s4840_s30 + $0x18] sm:$0xff]  }
 0x7ff   : > { %v5156_v0 = vpack.c.bf16 %v1900_v23, %v1896_v58  ;;  %v5158_v1 = vpack.c.bf16 %v1902_v19, %v1898_v59  ;;  %v4587_v51 = vld [vmem:[%s4840_s30 + $0x90] sm:$0xff]   ;;  %v4591_v55 = vld [vmem:[%s4840_s30 + $0x98] sm:$0xff]   ;;  %v4594_v58 = vld [vmem:[%s4840_s30 + $0x20] sm:$0xff]  }
 0x800   : > { %v1969_v2 = vpack.c.bf16 %v1901_v62, %v1897_v60  ;;  %v1971_v4 = vpack.c.bf16 %v1903_v63, %v1899_v61  ;;  %v2076_v5 = vpop.f32.mrb[44].mxu1  ;;  %v2119_v6 = vpop.f32.mrb[48].mxu0  ;;  %v4595_v59 = vld [vmem:[%s4840_s30 + $0xa0] sm:$0xff]   ;;  %v4596_v23 = vld [vmem:[%s4840_s30 + $0x68] sm:$0xff]   ;;  %v4600_v62 = vld [vmem:[%s4840_s30 + $0x70] sm:$0xff]  }
 0x801   : > { %v2077_v7 = vadd.f32 %v2076_v5, %v1985_v52  ;;  %v2120_v8 = vadd.f32 %v2119_v6, %v1993_v53  ;;  %v2078_v9 = vpop.f32.mrb[45].mxu1  ;;  %v2121_v10 = vpop.f32.mrb[49].mxu0  ;;  %v4597_v19 = vld [vmem:[%s4840_s30 + $0xe8] sm:$0xff]   ;;  %v4601_v63 = vld [vmem:[%s4840_s30 + $0xf0] sm:$0xff]   ;;  %v4604_v5 = vld [vmem:[%s4840_s30 + $0x78] sm:$0xff]  }
 0x802   : > { %v2079_v11 = vadd.f32 %v2078_v9, %v1989_v56  ;;  %v2122_v12 = vadd.f32 %v2121_v10, %v1997_v57  ;;  %v2080_v14 = vpop.f32.mrb[46].mxu1  ;;  %v2123_v15 = vpop.f32.mrb[50].mxu0  ;;  %v4598_v60 = vld [vmem:[%s4840_s30 + $0x28] sm:$0xff]   ;;  %v4605_v6 = vld [vmem:[%s4840_s30 + $0xf8] sm:$0xff]  }
 0x803   : > { %v2081_v17 = vadd.f32 %v2080_v14, %v1985_v52  ;;  %v2124_v18 = vadd.f32 %v2123_v15, %v1993_v53  ;;  %v2082_v27 = vpop.f32.mrb[47].mxu1  ;;  %v2125_v21 = vpop.f32.mrb[51].mxu0  ;;  %v2128_v28 = vmax.f32 %v2077_v7, 0.0  ;;  %v2130_v29 = vmax.f32 %v2120_v8, 0.0  ;;  %v4588_v52 = vld [vmem:[%s4840_s30 + $0x58] sm:$0xff]   ;;  %v4599_v61 = vld [vmem:[%s4840_s30 + $0xa8] sm:$0xff]  }
 0x804   : > { %v2083_v22 = vadd.f32 %v2082_v27, %v1989_v56  ;;  %v2126_v26 = vadd.f32 %v2125_v21, %v1997_v57  ;;  %v2129_v34 = vmax.f32 %v2079_v11, 0.0  ;;  %v2131_v35 = vmax.f32 %v2122_v12, 0.0  ;;  %v4589_v53 = vld [vmem:[%s4840_s30 + $0xd8] sm:$0xff]   ;;  %v4592_v56 = vld [vmem:[%s4840_s30 + $0x60] sm:$0xff]   ;;  %v2753_v9 = vld [vmem:[%s4825_s17 + $0x28] sm:$0xff] }
 0x805   : > { %v2132_v3 = vmax.f32 %v2081_v17, 0.0  ;;  %v2134_v33 = vmax.f32 %v2124_v18, 0.0  ;;  %v4593_v57 = vld [vmem:[%s4840_s30 + $0xe0] sm:$0xff]   ;;  %v2755_v10 = vld [vmem:[%s4825_s17 + $0x68] sm:$0xff]  ;;  %v4606_v11 = vld [vmem:[%s4840_s30 + $0x38] sm:$0xff]  }
 0x806   : > { %v2133_v36 = vmax.f32 %v2083_v22, 0.0  ;;  %v2135_v16 = vmax.f32 %v2126_v26, 0.0  ;;  %v2752_v7 = vld [vmem:[%s4825_s17 + $0x20] sm:$0xff]  ;;  %v4607_v12 = vld [vmem:[%s4840_s30 + $0xb8] sm:$0xff]   ;;  %v4086_v15 = vcombine.high %v2753_v9, %v2755_v10  ;;  %v2757_v27 = vld [vmem:[%s4825_s17 + $0xa8] sm:$0xff]  ;;  %v4085_v26 = vcombine.low %v2753_v9, %v2755_v10 }
 0x807   : > { %v2200_v20 = vpack.c.bf16 %v2132_v3, %v2128_v28  ;;  %v2202_v37 = vpack.c.bf16 %v2134_v33, %v2130_v29  ;;  %v2754_v8 = vld [vmem:[%s4825_s17 + $0x60] sm:$0xff]  ;;  %v2759_v21 = vld [vmem:[%s4825_s17 + $0xe8] sm:$0xff] }
 0x808   : > { %v2201_v38 = vpack.c.bf16 %v2133_v36, %v2129_v34  ;;  %v2203_v13 = vpack.c.bf16 %v2135_v16, %v2131_v35  ;;  %v4084_v14 = vcombine.high %v2752_v7, %v2754_v8  ;;  %v2756_v17 = vld [vmem:[%s4825_s17 + $0xa0] sm:$0xff]  ;;  %v4083_v22 = vcombine.low %v2752_v7, %v2754_v8  ;;  %v4612_v36 = vld [vmem:[%s4840_s30 + $0x248] sm:$0xff]  }
 0x809   : > { %v2758_v18 = vld [vmem:[%s4825_s17 + $0xe0] sm:$0xff]  ;;  %v4090_v29 = vcombine.high %v2757_v27, %v2759_v21  ;;  %v4089_v33 = vcombine.low %v2757_v27, %v2759_v21  ;;  %v4613_v16 = vld [vmem:[%s4840_s30 + $0x2c8] sm:$0xff]  }
 0x80a   : > { %2428 = vmatprep.mubr.bf16.mxu1 %v2201_v38  ;;  %2469 = vmatprep.mubr.bf16.mxu0 %v2203_v13  ;;  %v4088_v28 = vcombine.high %v2756_v17, %v2758_v18  ;;  %v4087_v3 = vcombine.low %v2756_v17, %v2758_v18  ;;  %v4610_v34 = vld [vmem:[%s4840_s30 + $0x200] sm:$0xff]   ;;  %v4616_v38 = vld [vmem:[%s4840_s30 + $0x250] sm:$0xff]  }
 0x80b   : > { %2429 = vmatmul.mubr.bf16.vlgmr.msra.gmra.mrb[48].mxu1 %v2200_v20  ;;  %2470 = vmatmul.mubr.bf16.vlgmr.msra.gmra.mrb[52].mxu0 %v2202_v37  ;;  %v4611_v35 = vld [vmem:[%s4840_s30 + $0x280] sm:$0xff]   ;;  %v4614_v20 = vld [vmem:[%s4840_s30 + $0x208] sm:$0xff]   ;;  %v4617_v13 = vld [vmem:[%s4840_s30 + $0x2d0] sm:$0xff]  }
 0x80c   : > { %4267 = vmatpush3.bf16.msra.mxu1 %v4578_v39  ;;  %4289 = vmatpush3.bf16.msra.mxu0 %v4579_v40  ;;  %v4615_v37 = vld [vmem:[%s4840_s30 + $0x288] sm:$0xff]   ;;  %v4618_v39 = vld [vmem:[%s4840_s30 + $0x210] sm:$0xff]  }
 0x80d   : > { %2702 = vmatprep.mubr.bf16.mxu1 %v1969_v2  ;;  %2743 = vmatprep.mubr.bf16.mxu0 %v1971_v4  ;;  %v4602_v2 = vld [vmem:[%s4840_s30 + $0x30] sm:$0xff]  }
 0x80e   : > { %4268 = vmatprep.subr.bf16.mxu1 %v4580_v41  ;;  %4290 = vmatprep.subr.bf16.mxu0 %v4581_v42  ;;  %v4603_v4 = vld [vmem:[%s4840_s30 + $0xb0] sm:$0xff]   ;;  %v4620_v41 = vld [vmem:[%s4840_s30 + $0x258] sm:$0xff]  }
 0x80f   : > { %v4619_v40 = vld [vmem:[%s4840_s30 + $0x290] sm:$0xff]   ;;  %v4621_v42 = vld [vmem:[%s4840_s30 + $0x2d8] sm:$0xff]  }
 0x810   : > { %4269 = vmatpush3.bf16.msra.mxu1 %v4582_v43  ;;  %4291 = vmatpush3.bf16.msra.mxu0 %v4583_v44  ;;  %v4622_v43 = vld [vmem:[%s4840_s30 + $0x218] sm:$0xff]  }
 0x811   : > { %4270 = vmatprep.subr.bf16.mxu1 %v4584_v48  ;;  %4292 = vmatprep.subr.bf16.mxu0 %v4585_v49  ;;  %v4623_v44 = vld [vmem:[%s4840_s30 + $0x298] sm:$0xff]   ;;  %v4624_v48 = vld [vmem:[%s4840_s30 + $0x260] sm:$0xff]  }
 0x812   : > { %v4625_v49 = vld [vmem:[%s4840_s30 + $0x2e0] sm:$0xff]  }
 0x814   : > { %4271 = vmatpush3.bf16.msra.mxu1 %v4586_v50  ;;  %4293 = vmatpush3.bf16.msra.mxu0 %v4587_v51  ;;  %v4626_v50 = vld [vmem:[%s4840_s30 + $0x220] sm:$0xff]  }
 0x815   : > { %4272 = vmatprep.subr.bf16.mxu1 %v4588_v52  ;;  %4294 = vmatprep.subr.bf16.mxu0 %v4589_v53  ;;  %v4627_v51 = vld [vmem:[%s4840_s30 + $0x2a0] sm:$0xff]   ;;  %v4628_v52 = vld [vmem:[%s4840_s30 + $0x268] sm:$0xff]  }
 0x816   : > { %v4629_v53 = vld [vmem:[%s4840_s30 + $0x2e8] sm:$0xff]  }
 0x818   : > { %4273 = vmatpush3.bf16.msra.mxu1 %v4590_v54  ;;  %4295 = vmatpush3.bf16.msra.mxu0 %v4591_v55  ;;  %v4630_v54 = vld [vmem:[%s4840_s30 + $0x228] sm:$0xff]  }
 0x819   : > { %4274 = vmatprep.subr.bf16.mxu1 %v4592_v56  ;;  %4296 = vmatprep.subr.bf16.mxu0 %v4593_v57  ;;  %v4631_v55 = vld [vmem:[%s4840_s30 + $0x2a8] sm:$0xff]   ;;  %v4632_v56 = vld [vmem:[%s4840_s30 + $0x270] sm:$0xff]  }
 0x81a   : > { %v4633_v57 = vld [vmem:[%s4840_s30 + $0x2f0] sm:$0xff]  }
 0x81c   : > { %4275 = vmatpush3.bf16.msra.mxu1 %v4594_v58  ;;  %4297 = vmatpush3.bf16.msra.mxu0 %v4595_v59  ;;  %v4634_v58 = vld [vmem:[%s4840_s30 + $0x230] sm:$0xff]  }
 0x81d   : > { %4276 = vmatprep.subr.bf16.mxu1 %v4596_v23  ;;  %4298 = vmatprep.subr.bf16.mxu0 %v4597_v19  ;;  %v4635_v59 = vld [vmem:[%s4840_s30 + $0x2b0] sm:$0xff]   ;;  %v4636_v23 = vld [vmem:[%s4840_s30 + $0x278] sm:$0xff]  }
 0x81e   : > { %v4637_v19 = vld [vmem:[%s4840_s30 + $0x2f8] sm:$0xff]  }
 0x820   : > { %4277 = vmatpush3.bf16.msra.mxu1 %v4598_v60  ;;  %4299 = vmatpush3.bf16.msra.mxu0 %v4599_v61  ;;  %v4638_v60 = vld [vmem:[%s4840_s30 + $0x238] sm:$0xff]  }
 0x821   : > { %4278 = vmatprep.subr.bf16.mxu1 %v4600_v62  ;;  %4300 = vmatprep.subr.bf16.mxu0 %v4601_v63  ;;  %v4639_v61 = vld [vmem:[%s4840_s30 + $0x2b8] sm:$0xff]   ;;  %v5239_v62 = vld [vmem:[%s4825_s17 + $0x30] sm:$0xff] }
 0x822   : > { %v5242_v63 = vld [vmem:[%s4825_s17 + $0x70] sm:$0xff] }
 0x824   : > { %4279 = vmatpush3.bf16.msra.mxu1 %v4602_v2  ;;  %4301 = vmatpush3.bf16.msra.mxu0 %v4603_v4  ;;  %v5245_v2 = vld [vmem:[%s4825_s17 + $0x38] sm:$0xff]  ;;  %v4126_v4 = vcombine.high %v5239_v62, %v5242_v63 }
 0x825   : > { %4280 = vmatprep.subr.bf16.mxu1 %v4604_v5  ;;  %4302 = vmatprep.subr.bf16.mxu0 %v4605_v6  ;;  %v5250_v5 = vld [vmem:[%s4825_s17 + $0x78] sm:$0xff]  ;;  %v4125_v6 = vcombine.low %v5239_v62, %v5242_v63  ;;  %v4642_v62 = vld [vmem:[%s4840_s30 + $0x300] sm:$0xff]  }
 0x826   : > { %v4127_v7 = vcombine.low %v5245_v2, %v5250_v5  ;;  %v4128_v8 = vcombine.high %v5245_v2, %v5250_v5  ;;  %v4643_v63 = vld [vmem:[%s4840_s30 + $0x380] sm:$0xff]   ;;  %v4644_v2 = vld [vmem:[%s4840_s30 + $0x348] sm:$0xff]  }
 0x827   : > { %v4645_v5 = vld [vmem:[%s4840_s30 + $0x3c8] sm:$0xff]  }
 0x828   : > { %4281 = vmatpush3.bf16.msra.mxu1 %v4606_v11  ;;  %4303 = vmatpush3.bf16.msra.mxu0 %v4607_v12 }
 0x829   : > { %2822 = vmatprep.subr.bf16.mxu1 %v4084_v14  ;;  %2865 = vmatprep.subr.bf16.mxu0 %v4086_v15 }
 0x82b   : > { %2703 = vmatmul.mubr.bf16.vlgmr.msra.gmra.mrb[52].mxu1 %v5156_v0  ;;  %2744 = vmatmul.mubr.bf16.vlgmr.msra.gmra.mrb[56].mxu0 %v5158_v1  ;;  %v4608_v0 = vld [vmem:[%s4840_s30 + $0x240] sm:$0xff]  }
 0x82c   : > { %2823 = vmatpush1.bf16.msra.mxu1 %v4083_v22  ;;  %2866 = vmatpush1.bf16.msra.mxu0 %v4085_v26  ;;  %v4609_v1 = vld [vmem:[%s4840_s30 + $0x2c0] sm:$0xff]  }
 0x82d   : > { %2824 = vmatprep.subr.bf16.mxu1 %v4088_v28  ;;  %2867 = vmatprep.subr.bf16.mxu0 %v4090_v29 }
 0x82e   : > { %2854 = vmatprep.mubr.bf16.mxu1 %v4729_v25  ;;  %2897 = vmatprep.mubr.bf16.mxu0 %v4729_v25 }
 0x830   : > { %2825 = vmatpush1.bf16.msra.mxu1 %v4087_v3  ;;  %2868 = vmatpush1.bf16.msra.mxu0 %v4089_v33 }
 0x831   : > { %4310 = vmatprep.subr.bf16.mxu1 %v4608_v0  ;;  %4332 = vmatprep.subr.bf16.mxu0 %v4609_v1 }
 0x833   : > { %4091 = vmatmul.mubr.msk.bf16.vlgmr.msra.gmra.mrb[56].mxu1 %vm548_vm2, %v5092_v47  ;;  %4092 = vmatmul.mubr.msk.bf16.vlgmr.msra.gmra.mrb[60].mxu0 %vm548_vm2, %v5092_v47 }
 0x834   : > { %4311 = vmatpush3.bf16.msra.mxu1 %v4610_v34  ;;  %4333 = vmatpush3.bf16.msra.mxu0 %v4611_v35 }
 0x835   : > { %4312 = vmatprep.subr.bf16.mxu1 %v4612_v36  ;;  %4334 = vmatprep.subr.bf16.mxu0 %v4613_v16 }
 0x838   : > { %4313 = vmatpush3.bf16.msra.mxu1 %v4614_v20  ;;  %4335 = vmatpush3.bf16.msra.mxu0 %v4615_v37  ;;  %v2760_v20 = vld [vmem:[%s4830_s24 + $0x8] sm:$0xf] }
 0x839   : > { %4314 = vmatprep.subr.bf16.mxu1 %v4616_v38  ;;  %4336 = vmatprep.subr.bf16.mxu0 %v4617_v13 }
 0x83c   : > { %4315 = vmatpush3.bf16.msra.mxu1 %v4618_v39  ;;  %4337 = vmatpush3.bf16.msra.mxu0 %v4619_v40 }
 0x83d   : > { %4316 = vmatprep.subr.bf16.mxu1 %v4620_v41  ;;  %4338 = vmatprep.subr.bf16.mxu0 %v4621_v42  ;;  %v2765_v41 = vrot.slane %v2760_v20, %v5138_v24  ;;  %v2773_v42 = vrot.slane %v2760_v20, %v5140_v30 }
 0x840   : > { %4317 = vmatpush3.bf16.msra.mxu1 %v4622_v43  ;;  %4339 = vmatpush3.bf16.msra.mxu0 %v4623_v44 }
 0x841   : > { %4318 = vmatprep.subr.bf16.mxu1 %v4624_v48  ;;  %4340 = vmatprep.subr.bf16.mxu0 %v4625_v49  ;;  %v2769_v48 = vrot.slane %v2760_v20, %v5143_v31  ;;  %v2777_v49 = vrot.slane %v2760_v20, %v5145_v32  ;;  %v4641_v20 = vld [vmem:[%s4840_s30 + $0x3c0] sm:$0xff]  }
 0x844   : > { %4319 = vmatpush3.bf16.msra.mxu1 %v4626_v50  ;;  %4341 = vmatpush3.bf16.msra.mxu0 %v4627_v51 }
 0x845   : > { %4320 = vmatprep.subr.bf16.mxu1 %v4628_v52  ;;  %4342 = vmatprep.subr.bf16.mxu0 %v4629_v53 }
 0x848   : > { %4321 = vmatpush3.bf16.msra.mxu1 %v4630_v54  ;;  %4343 = vmatpush3.bf16.msra.mxu0 %v4631_v55 }
 0x849   : > { %4322 = vmatprep.subr.bf16.mxu1 %v4632_v56  ;;  %4344 = vmatprep.subr.bf16.mxu0 %v4633_v57 }
 0x84c   : > { %4323 = vmatpush3.bf16.msra.mxu1 %v4634_v58  ;;  %4345 = vmatpush3.bf16.msra.mxu0 %v4635_v59 }
 0x84d   : > { %4324 = vmatprep.subr.bf16.mxu1 %v4636_v23  ;;  %4346 = vmatprep.subr.bf16.mxu0 %v4637_v19 }
 0x850   : > { %4325 = vmatpush3.bf16.msra.mxu1 %v4638_v60  ;;  %4347 = vmatpush3.bf16.msra.mxu0 %v4639_v61 }
 0x851   : > { %3330 = vmatprep.subr.bf16.mxu1 %v4126_v4  ;;  %3373 = vmatprep.subr.bf16.mxu0 %v4128_v8 }
 0x8de   : > { %v4238_v9 = vpop.f32.mrb[48].mxu1  ;;  %v4260_v10 = vpop.f32.mrb[52].mxu0 }
 0x8df   : > { %v4239_v11 = vpop.f32.mrb[49].mxu1  ;;  %v4261_v12 = vpop.f32.mrb[53].mxu0 }
 0x8e0   : > { %v4240_v14 = vadd.f32 %v4239_v11, %v4238_v9  ;;  %v4262_v15 = vadd.f32 %v4261_v12, %v4260_v10  ;;  %v4241_v17 = vpop.f32.mrb[50].mxu1  ;;  %v4263_v18 = vpop.f32.mrb[54].mxu0 }
 0x8e1   : > { %v4242_v27 = vpop.f32.mrb[51].mxu1  ;;  %v4264_v21 = vpop.f32.mrb[55].mxu0 }
 0x8e2   : > { %v2472_v22 = vadd.f32 %v4262_v15, %v4240_v14  ;;  %v4243_v26 = vadd.f32 %v4242_v27, %v4241_v17  ;;  %v4265_v28 = vadd.f32 %v4264_v21, %v4263_v18  ;;  %v3264_v15 = vld [vmem:[%s4825_s17 + $0xb0] sm:$0xff] }
 0x8e3   : > { %v3266_v17 = vld [vmem:[%s4825_s17 + $0xf0] sm:$0xff] }
 0x8e4   : > { %v2475_v29 = vadd.f32 %v4265_v28, %v4243_v26  ;;  %v3265_v26 = vld [vmem:[%s4825_s17 + $0xb8] sm:$0xff] }
 0x8e5   : > { %v3267_v28 = vld [vmem:[%s4825_s17 + $0xf8] sm:$0xff] }
 0x8fe   : > { %v4282_v3 = vpop.f32.mrb[52].mxu1  ;;  %v4304_v33 = vpop.f32.mrb[56].mxu0 }
 0x8ff   : > { %v4283_v0 = vpop.f32.mrb[53].mxu1  ;;  %v4305_v1 = vpop.f32.mrb[57].mxu0 }
 0x900   : > { %v4284_v34 = vadd.f32 %v4283_v0, %v4282_v3  ;;  %v4306_v35 = vadd.f32 %v4305_v1, %v4304_v33  ;;  %v4285_v36 = vpop.f32.mrb[54].mxu1  ;;  %v4307_v16 = vpop.f32.mrb[58].mxu0  ;;  %v4130_v1 = vcombine.high %v3264_v15, %v3266_v17 }
 0x901   : > { %v4286_v37 = vpop.f32.mrb[55].mxu1  ;;  %v4308_v38 = vpop.f32.mrb[59].mxu0 }
 0x902   : > { %v2705_v13 = vadd.f32 %v4284_v34, %v2472_v22  ;;  %v4287_v39 = vadd.f32 %v4286_v37, %v4285_v36  ;;  %v4309_v40 = vadd.f32 %v4308_v38, %v4307_v16  ;;  %v4132_v34 = vcombine.high %v3265_v26, %v3267_v28  ;;  %v4640_v16 = vld [vmem:[%s4840_s30 + $0x340] sm:$0xff]   ;;  %v4649_v37 = vld [vmem:[%s4840_s30 + $0x3d0] sm:$0xff]  }
 0x903   : > { %v4131_v36 = vcombine.low %v3265_v26, %v3267_v28  ;;  %v4650_v38 = vld [vmem:[%s4840_s30 + $0x310] sm:$0xff]  }
 0x904   : > { %v5261_v43 = vadd.f32 %v4306_v35, %v2705_v13  ;;  %v2708_v44 = vadd.f32 %v4287_v39, %v2475_v29  ;;  %v4129_v35 = vcombine.low %v3264_v15, %v3266_v17  ;;  %v4651_v13 = vld [vmem:[%s4840_s30 + $0x390] sm:$0xff]   ;;  %v4653_v39 = vld [vmem:[%s4840_s30 + $0x3d8] sm:$0xff]   ;;  %v3268_v15 = vld [vmem:[%s4830_s24 + $0xc] sm:$0xf] }
 0x905   : > { %v3273_v26 = vrot.slane %v3268_v15, %v5138_v24  ;;  %v3281_v28 = vrot.slane %v3268_v15, %v5140_v30 }
 0x906   : > { %v5265_v50 = vadd.f32 %v4309_v40, %v2708_v44  ;;  %v2856_v51 = vpop.f32.mrb[56].mxu1  ;;  %v2899_v52 = vpop.f32.mrb[60].mxu0  ;;  %v4654_v40 = vld [vmem:[%s4840_s30 + $0x318] sm:$0xff]   ;;  %v4657_v44 = vld [vmem:[%s4840_s30 + $0x3e0] sm:$0xff]  }
 0x907   : > { %v2857_v53 = vadd.f32 %v2856_v51, %v2765_v41  ;;  %v2900_v54 = vadd.f32 %v2899_v52, %v2773_v42  ;;  %v2858_v55 = vpop.f32.mrb[57].mxu1  ;;  %v2901_v56 = vpop.f32.mrb[61].mxu0  ;;  %v4660_v51 = vld [vmem:[%s4840_s30 + $0x368] sm:$0xff]  }
 0x908   : > { %v2859_v57 = vadd.f32 %v2858_v55, %v2769_v48  ;;  %v2902_v58 = vadd.f32 %v2901_v56, %v2777_v49  ;;  %v2860_v59 = vpop.f32.mrb[58].mxu1  ;;  %v2903_v23 = vpop.f32.mrb[62].mxu0  ;;  %v4661_v52 = vld [vmem:[%s4840_s30 + $0x3e8] sm:$0xff]   ;;  %v4664_v55 = vld [vmem:[%s4840_s30 + $0x370] sm:$0xff]  }
 0x909   : > { %v2861_v19 = vadd.f32 %v2860_v59, %v2765_v41  ;;  %v2904_v60 = vadd.f32 %v2903_v23, %v2773_v42  ;;  %v2862_v61 = vpop.f32.mrb[59].mxu1  ;;  %v2905_v4 = vpop.f32.mrb[63].mxu0  ;;  %v2908_v10 = vmax.f32 %v2857_v53, 0.0  ;;  %v2910_v11 = vmax.f32 %v2900_v54, 0.0  ;;  %v4655_v41 = vld [vmem:[%s4840_s30 + $0x398] sm:$0xff]   ;;  %v4656_v42 = vld [vmem:[%s4840_s30 + $0x360] sm:$0xff]  }
 0x90a   : > { %v2863_v8 = vadd.f32 %v2862_v61, %v2769_v48  ;;  %v2906_v9 = vadd.f32 %v2905_v4, %v2777_v49  ;;  %v2909_v18 = vmax.f32 %v2859_v57, 0.0  ;;  %v2911_v27 = vmax.f32 %v2902_v58, 0.0  ;;  %v4658_v48 = vld [vmem:[%s4840_s30 + $0x320] sm:$0xff]   ;;  %v4662_v53 = vld [vmem:[%s4840_s30 + $0x328] sm:$0xff]   ;;  %v4665_v56 = vld [vmem:[%s4840_s30 + $0x3f0] sm:$0xff]  }
 0x90b   : > { %v2912_v12 = vmax.f32 %v2861_v19, 0.0  ;;  %v2914_v14 = vmax.f32 %v2904_v60, 0.0  ;;  %v4659_v49 = vld [vmem:[%s4840_s30 + $0x3a0] sm:$0xff]   ;;  %v4663_v54 = vld [vmem:[%s4840_s30 + $0x3a8] sm:$0xff]   ;;  %v4666_v57 = vld [vmem:[%s4840_s30 + $0x330] sm:$0xff]  }
 0x90c   : > { %v2913_v21 = vmax.f32 %v2863_v8, 0.0  ;;  %v2915_v22 = vmax.f32 %v2906_v9, 0.0  ;;  %v4667_v58 = vld [vmem:[%s4840_s30 + $0x3b0] sm:$0xff]   ;;  %v4668_v59 = vld [vmem:[%s4840_s30 + $0x378] sm:$0xff]  }
 0x90d   : > { %v2980_v29 = vpack.c.bf16 %v2912_v12, %v2908_v10  ;;  %v2982_v3 = vpack.c.bf16 %v2914_v14, %v2910_v11  ;;  %v4669_v23 = vld [vmem:[%s4840_s30 + $0x3f8] sm:$0xff]  }
 0x90e   : > { %v2981_v33 = vpack.c.bf16 %v2913_v21, %v2909_v18  ;;  %v2983_v0 = vpack.c.bf16 %v2915_v22, %v2911_v27  ;;  %v4670_v19 = vld [vmem:[%s4840_s30 + $0x338] sm:$0xff]  }
 0x90f   : > { %v4671_v60 = vld [vmem:[%s4840_s30 + $0x3b8] sm:$0xff]  }
 0x910   : > { %3208 = vmatprep.mubr.bf16.mxu1 %v2981_v33  ;;  %3249 = vmatprep.mubr.bf16.mxu0 %v2983_v0  ;;  %v3277_v33 = vrot.slane %v3268_v15, %v5143_v31  ;;  %v3285_v0 = vrot.slane %v3268_v15, %v5145_v32 }
 0x911   : > { %3209 = vmatmul.mubr.bf16.vlgmr.msra.gmra.mrb[60].mxu1 %v2980_v29  ;;  %3250 = vmatmul.mubr.bf16.vlgmr.msra.gmra.mrb[64].mxu0 %v2982_v3 }
 0x912   : > { %3331 = vmatpush1.bf16.msra.mxu1 %v4125_v6  ;;  %3374 = vmatpush1.bf16.msra.mxu0 %v4127_v7  ;;  %v4647_v6 = vld [vmem:[%s4840_s30 + $0x388] sm:$0xff]   ;;  %v4648_v7 = vld [vmem:[%s4840_s30 + $0x350] sm:$0xff]  }
 0x913   : > { %3332 = vmatprep.subr.bf16.mxu1 %v4130_v1  ;;  %3375 = vmatprep.subr.bf16.mxu0 %v4132_v34 }
 0x914   : > { %3362 = vmatprep.mubr.bf16.mxu1 %v4729_v25  ;;  %3405 = vmatprep.mubr.bf16.mxu0 %v4729_v25  ;;  %v4646_v25 = vld [vmem:[%s4840_s30 + $0x308] sm:$0xff]  }
 0x916   : > { %3333 = vmatpush1.bf16.msra.mxu1 %v4129_v35  ;;  %3376 = vmatpush1.bf16.msra.mxu0 %v4131_v36 }
 0x917   : > { %4354 = vmatprep.subr.bf16.mxu1 %v4640_v16  ;;  %4376 = vmatprep.subr.bf16.mxu0 %v4641_v20 }
 0x919   : > { %4133 = vmatmul.mubr.msk.bf16.vlgmr.msra.gmra.mrb[64].mxu1 %vm548_vm2, %v5092_v47  ;;  %4134 = vmatmul.mubr.msk.bf16.vlgmr.msra.gmra.mrb[68].mxu0 %vm548_vm2, %v5092_v47  ;;  %v4652_v47 = vld [vmem:[%s4840_s30 + $0x358] sm:$0xff]  }
 0x91a   : > { %4355 = vmatpush3.bf16.msra.mxu1 %v4642_v62  ;;  %4377 = vmatpush3.bf16.msra.mxu0 %v4643_v63 }
 0x91b   : > { %4356 = vmatprep.subr.bf16.mxu1 %v4644_v2  ;;  %4378 = vmatprep.subr.bf16.mxu0 %v4645_v5 }
 0x91e   : > { %4357 = vmatpush3.bf16.msra.mxu1 %v4646_v25  ;;  %4379 = vmatpush3.bf16.msra.mxu0 %v4647_v6 }
 0x91f   : > { %4358 = vmatprep.subr.bf16.mxu1 %v4648_v7  ;;  %4380 = vmatprep.subr.bf16.mxu0 %v4649_v37 }
 0x922   : > { %4359 = vmatpush3.bf16.msra.mxu1 %v4650_v38  ;;  %4381 = vmatpush3.bf16.msra.mxu0 %v4651_v13 }
 0x923   : > { %4360 = vmatprep.subr.bf16.mxu1 %v4652_v47  ;;  %4382 = vmatprep.subr.bf16.mxu0 %v4653_v39 }
 0x926   : > { %4361 = vmatpush3.bf16.msra.mxu1 %v4654_v40  ;;  %4383 = vmatpush3.bf16.msra.mxu0 %v4655_v41 }
 0x927   : > { %4362 = vmatprep.subr.bf16.mxu1 %v4656_v42  ;;  %4384 = vmatprep.subr.bf16.mxu0 %v4657_v44 }
 0x92a   : > { %4363 = vmatpush3.bf16.msra.mxu1 %v4658_v48  ;;  %4385 = vmatpush3.bf16.msra.mxu0 %v4659_v49 }
 0x92b   : > { %4364 = vmatprep.subr.bf16.mxu1 %v4660_v51  ;;  %4386 = vmatprep.subr.bf16.mxu0 %v4661_v52 }
 0x92e   : > { %4365 = vmatpush3.bf16.msra.mxu1 %v4662_v53  ;;  %4387 = vmatpush3.bf16.msra.mxu0 %v4663_v54 }
 0x92f   : > { %4366 = vmatprep.subr.bf16.mxu1 %v4664_v55  ;;  %4388 = vmatprep.subr.bf16.mxu0 %v4665_v56 }
 0x932   : > { %4367 = vmatpush3.bf16.msra.mxu1 %v4666_v57  ;;  %4389 = vmatpush3.bf16.msra.mxu0 %v4667_v58 }
 0x933   : > { %4368 = vmatprep.subr.bf16.mxu1 %v4668_v59  ;;  %4390 = vmatprep.subr.bf16.mxu0 %v4669_v23 }
 0x936   : > { %4369 = vmatpush3.bf16.msra.mxu1 %v4670_v19  ;;  %4391 = vmatpush3.bf16.msra.mxu0 %v4671_v60 }
 0x9e4   : > { %v4326_v61 = vpop.f32.mrb[60].mxu1  ;;  %v4348_v4 = vpop.f32.mrb[64].mxu0 }
 0x9e5   : > { %v4327_v8 = vpop.f32.mrb[61].mxu1  ;;  %v4349_v9 = vpop.f32.mrb[65].mxu0 }
 0x9e6   : > { %v4328_v10 = vadd.f32 %v4327_v8, %v4326_v61  ;;  %v4350_v11 = vadd.f32 %v4349_v9, %v4348_v4  ;;  %v4329_v12 = vpop.f32.mrb[62].mxu1  ;;  %v4351_v14 = vpop.f32.mrb[66].mxu0  ;;  %v4167_v61 = vld [vmem:[%s512_s28] ss:$0 sm:$0xff] }
 0x9e7   : > { %v4330_v17 = vpop.f32.mrb[63].mxu1  ;;  %v4352_v18 = vpop.f32.mrb[67].mxu0 }
 0x9e8   : > { %v3252_v27 = vadd.f32 %v4350_v11, %v4328_v10  ;;  %v4331_v21 = vadd.f32 %v4330_v17, %v4329_v12  ;;  %v4353_v22 = vadd.f32 %v4352_v18, %v4351_v14 }
 0x9ea   : > { %v3258_v29 = vadd.f32 %v3252_v27, %v5261_v43  ;;  %v3255_v3 = vadd.f32 %v4353_v22, %v4331_v21 }
 0x9ec   : > { %v3259_v1 = vadd.f32 %v3255_v3, %v5265_v50  ;;  %v3364_v34 = vpop.f32.mrb[64].mxu1  ;;  %v3407_v35 = vpop.f32.mrb[68].mxu0 }
 0x9ed   : > { %v3365_v36 = vadd.f32 %v3364_v34, %v3273_v26  ;;  %v3408_v16 = vadd.f32 %v3407_v35, %v3281_v28  ;;  %v3366_v20 = vpop.f32.mrb[65].mxu1  ;;  %v3409_v62 = vpop.f32.mrb[69].mxu0 }
 0x9ee   : > { %v3367_v63 = vadd.f32 %v3366_v20, %v3277_v33  ;;  %v3410_v2 = vadd.f32 %v3409_v62, %v3285_v0  ;;  %v3368_v24 = vpop.f32.mrb[66].mxu1  ;;  %v3411_v5 = vpop.f32.mrb[70].mxu0  ;;  %v4168_v20 = vld [vmem:[%s515_s14] ss:$0 sm:$0xff] }
 0x9ef   : > { %v3369_v30 = vadd.f32 %v3368_v24, %v3273_v26  ;;  %v3412_v25 = vadd.f32 %v3411_v5, %v3281_v28  ;;  %v3370_v43 = vpop.f32.mrb[67].mxu1  ;;  %v3413_v6 = vpop.f32.mrb[71].mxu0  ;;  %v3416_v37 = vmax.f32 %v3365_v36, 0.0  ;;  %v3418_v32 = vmax.f32 %v3408_v16, 0.0 }
 0x9f0   : > { %v3371_v7 = vadd.f32 %v3370_v43, %v3277_v33  ;;  %v3414_v31 = vadd.f32 %v3413_v6, %v3285_v0  ;;  %v3417_v13 = vmax.f32 %v3367_v63, 0.0  ;;  %v3419_v47 = vmax.f32 %v3410_v2, 0.0  ;;  %v4169_v2 = vld [vmem:[%s518_s21] ss:$0 sm:$0xff] }
 0x9f1   : > { %v3420_v38 = vmax.f32 %v3369_v30, 0.0  ;;  %v3422_v50 = vmax.f32 %v3412_v25, 0.0 }
 0x9f2   : > { %v3421_v39 = vmax.f32 %v3371_v7, 0.0  ;;  %v3423_v40 = vmax.f32 %v3414_v31, 0.0 }
 0x9f3   : > { %v3488_v41 = vpack.c.bf16 %v3420_v38, %v3416_v37  ;;  %v3490_v42 = vpack.c.bf16 %v3422_v50, %v3418_v32 }
 0x9f4   : > { %v3489_v44 = vpack.c.bf16 %v3421_v39, %v3417_v13  ;;  %v3491_v48 = vpack.c.bf16 %v3423_v40, %v3419_v47 }
 0x9f6   : > { %3716 = vmatprep.mubr.bf16.mxu1 %v3489_v44  ;;  %3757 = vmatprep.mubr.bf16.mxu0 %v3491_v48 }
 0x9f7   : > { %3717 = vmatmul.mubr.bf16.vlgmr.msra.gmra.mrb[68].mxu1 %v3488_v41  ;;  %3758 = vmatmul.mubr.bf16.vlgmr.msra.gmra.mrb[72].mxu0 %v3490_v42 }
 0xaca   : > { %v4370_v49 = vpop.f32.mrb[68].mxu1  ;;  %v4392_v51 = vpop.f32.mrb[72].mxu0 }
 0xacb   : > { %v4371_v52 = vpop.f32.mrb[69].mxu1  ;;  %v4393_v53 = vpop.f32.mrb[73].mxu0 }
 0xacc   : > { %v4372_v54 = vadd.f32 %v4371_v52, %v4370_v49  ;;  %v4394_v55 = vadd.f32 %v4393_v53, %v4392_v51  ;;  %v4373_v56 = vpop.f32.mrb[70].mxu1  ;;  %v4395_v57 = vpop.f32.mrb[74].mxu0 }
 0xacd   : > { %v4374_v58 = vpop.f32.mrb[71].mxu1  ;;  %v4396_v59 = vpop.f32.mrb[75].mxu0 }
 0xace   : > { %v3760_v23 = vadd.f32 %v4394_v55, %v4372_v54  ;;  %v4375_v19 = vadd.f32 %v4374_v58, %v4373_v56  ;;  %v4397_v60 = vadd.f32 %v4396_v59, %v4395_v57 }
 0xad0   : > { %v3766_v4 = vadd.f32 %v3760_v23, %v3258_v29  ;;  %v3763_v8 = vadd.f32 %v4397_v60, %v4375_v19 }
 0xad2   : > { %v3767_v9 = vadd.f32 %v3763_v8, %v3259_v1  ;;  %v3775_v10 = vadd.f32 %v4167_v61, %v3766_v4 }
 0xad4   : > { %v3779_v11 = vadd.f32 %v3775_v10, %v5086_v45  ;;  %v3776_v12 = vadd.f32 %v4167_v61, %v3767_v9 }
 0xad6   : > { %v3781_v14 = vsel %vm548_vm2, %v3779_v11, 0.0  ;;  %v3780_v15 = vadd.f32 %v3776_v12, %v5088_v46 }
 0xad7   : > { %3782 = vadd.xlane.f32.xlu1 %v3781_v14 }
 0xad8   : > { %v3784_v17 = vsel %vm548_vm2, %v3780_v15, 0.0 }
 0xad9   : > { %3785 = vadd.xlane.f32.xlu0 %v3784_v17 }
 0xb64   : > { %v3783_v18 = vpop.xlane.xlu1 %3782 }
 0xb65   : > { %v3787_v27 = vmul.f32 0.03125, %v3783_v18 }
 0xb66   : > { %v3786_v21 = vpop.xlane.xlu0 %3785 }
 0xb67   : > { %v3789_v22 = vsub.f32 %v3779_v11, %v3787_v27  ;;  %v3788_v26 = vmul.f32 0.03125, %v3786_v21 }
 0xb69   : > { %v3790_v28 = vsub.f32 %v3780_v15, %v3788_v26  ;;  %v3791_v29 = vmul.f32 %v3789_v22, %v3789_v22 }
 0xb6b   : > { %v3793_v3 = vsel %vm548_vm2, %v3791_v29, 0.0  ;;  %v3792_v45 = vmul.f32 %v3790_v28, %v3790_v28 }
 0xb6c   : > { %3794 = vadd.xlane.f32.xlu1 %v3793_v3 }
 0xb6d   : > { %v3796_v33 = vsel %vm548_vm2, %v3792_v45, 0.0 }
 0xb6e   : > { %3797 = vadd.xlane.f32.xlu0 %v3796_v33 }
 0xbf9   : > { %v3795_v46 = vpop.xlane.xlu1 %3794 }
 0xbfa   : > { %v3799_v0 = vmul.f32 0.03125, %v3795_v46 }
 0xbfb   : > { %v3798_v1 = vpop.xlane.xlu0 %3797 }
 0xbfc   : > { %v3801_v34 = vadd.f32 1e-05, %v3799_v0  ;;  %v3800_v35 = vmul.f32 0.03125, %v3798_v1 }
 0xbfe   : > { %4708 = vrsqrt.f32 %v3801_v34  ;;  %v3802_v36 = vadd.f32 1e-05, %v3800_v35 }
 0xc00   : > { %4710 = vrsqrt.f32 %v3802_v36 }
 0xc08   : > { %v4709_v16 = vpop.eup %4708 }
 0xc09   : > { %v3805_v62 = vmul.f32 %v4709_v16, %v3789_v22 }
 0xc0a   : > { %v4711_v63 = vpop.eup %4710 }
 0xc0b   : > { %v3813_v24 = vmul.f32 %v4168_v20, %v3805_v62  ;;  %v3806_v5 = vmul.f32 %v4711_v63, %v3790_v28  ;;  %3828 = sbr.rel (%p4170_p5) target bundleno = 3090 (0xc12), region = 72 }
 0xc0d   : > { %v3821_v30 = vadd.f32 %v4169_v2, %v3813_v24  ;;  %v3814_v25 = vmul.f32 %v4168_v20, %v3806_v5 }
 0xc0f   : > { %3823 = vst.msk [vmem:[#allocation2] sm:$0xff] %vm548_vm2, %v3821_v30  ;;  %v3822_v43 = vadd.f32 %v4169_v2, %v3814_v25  ;;  %3829 = vst.msk [vmem:[%s5368_s11] sm:$0xff] (!%p4170_p5), %vm548_vm2, %v3821_v30 }
 0xc11   : > { %3824 = vst.msk [vmem:[#allocation2 + $0x8] sm:$0xff] %vm548_vm2, %v3822_v43  ;;  %3830 = vst.msk [vmem:[%s5368_s11 + $0x8] sm:$0xff] (!%p4170_p5), %vm548_vm2, %v3822_v43 }
 0xc12 PF: > { %s5377_s26 = sld [smem:[#allocation3_spill]] }
 0xc18   : > { %s21_s17 = sadd.s32 1, %s5377_s26  }
 0xc19   : > { %p18_p6 = scmp.ge.s32.totalorder %s21_s17, 8  }
 0xc1b   :  { %20 = sbr.rel (!%p18_p6) target bundleno = 3 (0x3), region = 125 }

// kernel: transformer_forward.3
= control target key start
LH: loop header
LB: loop body
LE: loop exit
PB: predicated region body
PF: predicated region fallthrough
CT: control target
= control target key end

     0   :  { %s7809_s0 = inlined_call_operand.vmem [shape: f32[2,8,32], index: 0, kind: input, shape index: {}]   ;;  %s7810_s1 = inlined_call_operand.vmem [shape: f32[2,8,32], index: 1, kind: input, shape index: {}]   ;;  %s7811_s2 = inlined_call_operand.vmem [shape: f32[8,8], index: 2, kind: input, shape index: {}]   ;;  %s7812_s3 = inlined_call_operand.vmem [shape: bf16[6,32,96], index: 3, kind: input, shape index: {}]   ;;  %s7813_s4 = inlined_call_operand.vmem [shape: bf16[6,32,32], index: 4, kind: input, shape index: {}]   ;;  %s7814_s5 = inlined_call_operand.vmem [shape: f32[6,1,32], index: 5, kind: input, shape index: {}]   ;;  %s7815_s6 = inlined_call_operand.vmem [shape: f32[6,1,32], index: 6, kind: input, shape index: {}]   ;;  %s7816_s7 = inlined_call_operand.vmem [shape: bf16[6,32,32], index: 7, kind: input, shape index: {}]   ;;  %s7817_s8 = inlined_call_operand.vmem [shape: bf16[6,32,64], index: 8, kind: input, shape index: {}]   ;;  %s7818_s9 = inlined_call_operand.vmem [shape: bf16[6,32,32], index: 9, kind: input, shape index: {}]   ;;  %s7819_s10 = inlined_call_operand.vmem [shape: f32[6,1,32], index: 10, kind: input, shape index: {}]   ;;  %s7820_s11 = inlined_call_operand.vmem [shape: f32[6,1,32], index: 11, kind: input, shape index: {}]   ;;  %s7821_s12 = inlined_call_operand.vmem [shape: bf16[6,32,2048], index: 12, kind: input, shape index: {}]   ;;  %s7822_s13 = inlined_call_operand.vmem [shape: f32[6,1,2048], index: 13, kind: input, shape index: {}]   ;;  %s7823_s14 = inlined_call_operand.vmem [shape: bf16[6,2048,32], index: 14, kind: input, shape index: {}]   ;;  %s7824_s15 = inlined_call_operand.vmem [shape: f32[6,1,32], index: 15, kind: input, shape index: {}]   ;;  %s7825_s16 = inlined_call_operand.vmem [shape: f32[6,1,32], index: 16, kind: input, shape index: {}]   ;;  %s7826_s17 = inlined_call_operand.vmem [shape: f32[6,1,32], index: 17, kind: input, shape index: {}]   ;;  %s7827_s18 = inlined_call_operand.vmem [shape: bf16[32,128], index: 18, kind: input, shape index: {}]   ;;  %s7828_s19 = inlined_call_operand.vmem [shape: f32[1,128], index: 19, kind: input, shape index: {}]   ;;  %s7829_s20 = inlined_call_operand.hbm [shape: f32[2,8,128], index: 20, kind: output, shape index: {}]  }
   0x1   :  { %7838 = sst [smem:[#allocation9_spill]] %s7809_s0 }
   0x2   :  { %7839 = sst [smem:[#allocation10_spill]] %s7810_s1 }
   0x3   :  { %7840 = sst [smem:[#allocation11_spill]] %s7811_s2 }
   0x4   :  { %7841 = sst [smem:[#allocation12_spill]] %s7812_s3 }
   0x5   :  { %7842 = sst [smem:[#allocation13_spill]] %s7813_s4 }
   0x6   :  { %7843 = sst [smem:[#allocation14_spill]] %s7815_s6 }
   0x7   :  { %7844 = sst [smem:[#allocation15_spill]] %s7816_s7 }
   0x8   :  { %7845 = sst [smem:[#allocation16_spill]] %s7817_s8 }
   0x9   :  { %7846 = sst [smem:[#allocation17_spill]] %s7818_s9 }
   0xa   :  { %7847 = sst [smem:[#allocation18_spill]] %s7821_s12 }
   0xb   :  { %7848 = sst [smem:[#allocation19_spill]] %s7827_s18 }
   0xc   :  { %7849 = sst [smem:[#allocation20_spill]] %s7828_s19 }
   0xd   :  { %7850 = sst [smem:[#allocation21_spill]] %s7829_s20 }
   0xe   :  { %25 = vsyncpa [#allocation4], 0  ;;  %s6914_s1 = smov 0  }
   0xf LB: > { %7851 = sst [smem:[#allocation6_spill]] %s6794_s1  ;;  %s6920_s22 = sadd.s32 4294967295, %s6794_s1   ;;  %s6794_s1 = sphi %s6914_s1, %s31_s1  }
  0x10   : > { %7852 = sst [smem:[#allocation7_spill]] %s6920_s22  ;;  %p5696_p0 = scmp.ge.s32.totalorder %s6794_s1, 1 }
  0x11   : > { %p683_p1 = scmp.lt.s32.totalorder %s6794_s1, 7 }
  0x13   : > { %p684_p2 = pnand %p5696_p0, %p683_p1 }
  0x15   : > { %687 = sbr.rel (%p684_p2) target bundleno = 5049 (0x13b9), region = 100 }
  0x1c   : > { %p791_p3 = scmp.lt.s32.totalorder %s6920_s22, 5  ;;  %s7853_s28 = sld [smem:[#allocation12_spill]] }
  0x1d   : > { %s7854_s0 = sld [smem:[#allocation13_spill]]  ;;  %s7856_s7 = sld [smem:[#allocation15_spill]] }
  0x1e   : > { %s6926_s23 = scalar_select %p791_p3, %s6920_s22, 5 }
  0x1f   : > { %s7857_s8 = sld [smem:[#allocation16_spill]]  ;;  %s7858_s9 = sld [smem:[#allocation17_spill]] }
  0x20   : > { %s5964_s24 = sshll.u32 %s6926_s23, 4  ;;  %s5969_s22 = sshll.u32 %s6926_s23, 8 }
  0x21   : > { %s6972_s3 = scalar_lea.vmem %s7822_s13, %s5964_s24  ;;  %s7860_s12 = sld [smem:[#allocation18_spill]] }
  0x22   : > { %s795_s4 = scalar_lea.vmem %s7853_s28, %s5964_s24  ;;  %s5970_s28 = sshll.u32 %s6926_s23, 10 }
  0x23   : > { %s6939_s21 = scalar_lea.vmem %s7854_s0, %s5964_s24  ;;  %s6948_s2 = scalar_lea.vmem %s7856_s7, %s5964_s24 }
  0x24   : > { %s6983_s30 = scalar_lea.vmem %s7823_s14, %s5970_s28  ;;  %s844_s1 = scalar_lea.vmem %s7824_s15, %s6926_s23 }
  0x25   : > { %s6953_s26 = scalar_lea.vmem %s7857_s8, %s5964_s24  ;;  %s6958_s29 = scalar_lea.vmem %s7858_s9, %s5964_s24 }
  0x26   : > { %7859 = sst [smem:[#allocation8_spill]] %s6958_s29  ;;  %s847_s6 = scalar_lea.vmem %s7825_s16, %s6926_s23 }
  0x27   : > { %s6977_s27 = scalar_lea.vmem %s7860_s12, %s5969_s22  ;;  %s850_s8 = scalar_lea.vmem %s7826_s17, %s6926_s23 }
  0x28   : > { %s7861_s22 = sld [smem:[#allocation7_spill]] }
  0x2e   : > { %p5712_p4 = scmp.ne.s32.totalorder %s7861_s22, 0 }
  0x2f   : > { %s7862_s9 = sld [smem:[#allocation9_spill]] (!%p5712_p4)  ;;  %vm858_vm0 = vcmask (!%p5712_p4), 261120  }
  0x30   : > { %855 = sbr.rel (%p5712_p4) target bundleno = 55 (0x37), region = 104 }
  0x35   : > { %v856_v0 = vld [vmem:[%s7862_s9] sm:$0xff] (!%p5712_p4)  ;;  %v857_v1 = vld [vmem:[%s7862_s9 + $0x8] sm:$0xff] (!%p5712_p4) }
  0x36   : > { %859 = vst.msk [vmem:[#allocation2] sm:$0xff] (!%p5712_p4), %vm858_vm0, %v856_v0  ;;  %860 = vst.msk [vmem:[#allocation2 + $0x8] sm:$0xff] (!%p5712_p4), %vm858_vm0, %v857_v1 }
  0x37 PF: > { %v6544_v2 = vld [vmem:[%s795_s4] sm:$0xff]   ;;  %v6796_v3 = vmov 0.0   ;;  %v6545_v4 = vld [vmem:[%s795_s4 + $0x8] sm:$0xff]   ;;  %vm6797_vm1 = vmmov 0   ;;  %vm881_vm2 = vcmask 261120   ;;  %s6798_s12 = smov 112   ;;  %s7870_s28 = scalar_lea.vmem %s7820_s11, %s6926_s23 }
  0x38   : > { %6245 = vmatprep.subr.bf16.mxu0 %v6796_v3  ;;  %6253 = vmatprep.subr.bf16.mxu1 %v6796_v3  ;;  %s6799_s4 = smov 120   ;;  %s6800_s20 = smov 104   ;;  %vm950_vm3 = vcmask 64512   ;;  %vm1446_vm4 = vcmask 1043456  }
  0x39   : > { %6246 = vmatpush3.bf16.msra.mxu0 %v6544_v2  ;;  %6249 = vmatprep.mubr.msk.bf16.mxu0 %vm6797_vm1, %v6796_v3  ;;  %s6801_s18 = smov 96   ;;  %s6802_s0 = smov 64  }
  0x3a   : > { %6247 = vmatprep.subr.bf16.mxu0 %v6796_v3  ;;  %6255 = vmatprep.mubr.msk.bf16.mxu1 %vm6797_vm1, %v6796_v3  ;;  %s7863_s24 = sld [smem:[#allocation11_spill]]  ;;  %s7864_s25 = sld [smem:[#allocation10_spill]] }
  0x3d   : > { %v861_v5 = vld [vmem:[#allocation2] sm:$0xff]  ;;  %v862_v6 = vld [vmem:[#allocation2 + $0x8] sm:$0xff]  ;;  %6248 = vmatpush3.bf16.msra.mxu0 %v6545_v4 }
  0x3e   : > { %v864_v7 = vpack.c.bf16 %v862_v6, %v861_v5  ;;  %6259 = vmatprep.subr.bf16.mxu0 %v6796_v3 }
  0x40   : > { %6250 = vmatmul.mubr.msk.bf16.vlgmr.msra.gmra.mrb[0].mxu0 %vm881_vm2, %v864_v7  ;;  %v863_v44 = vld [vmem:[%s7863_s24] sm:$0xff]  ;;  %s7866_s24 = sld [smem:[#allocation14_spill]] }
  0x41   : > { %6261 = vmatprep.mubr.msk.bf16.mxu0 %vm6797_vm1, %v6796_v3 }
 0x113   : > { %v919_v8 = vpop.f32.mrb[0].mxu0 }
 0x114   : > { %v5971_v9 = vpack.c.bf16 %v919_v8, %v919_v8  ;;  %v6251_v10 = vpop.f32.mrb[1].mxu0 }
 0x115   : > { %v922_v11 = vpop.f32.mrb[2].mxu0 }
 0x116   : > { %940 = vrot.lane.b32.xlu1 %v5971_v9, %s6798_s12  ;;  %936 = vrot.lane.b32.xlu0 %v5971_v9, %s6799_s4  ;;  %v6252_v12 = vpop.f32.mrb[3].mxu0  ;;  %v7017_v13 = vpack.c.bf16 %v922_v11, %v922_v11 }
 0x11a   : > { %942 = vrot.lane.b32.xlu1 %v7017_v13, %s6798_s12  ;;  %938 = vrot.lane.b32.xlu0 %v7017_v13, %s6799_s4 }
 0x11e   : > { %946 = vrot.lane.b32.xlu1 %v7017_v13, %s6800_s20  ;;  %944 = vrot.lane.b32.xlu0 %v5971_v9, %s6800_s20 }
 0x122   : > { %997 = vrot.lane.b32.xlu1 %v7017_v13, %s6801_s18  ;;  %948 = vrot.lane.b32.xlu0 %v5971_v9, %s6801_s18 }
 0x188   : > { %v941_v14 = vpop.permute.xlu1 %940  ;;  %v937_v15 = vpop.permute.xlu0 %936 }
 0x189   : > { %v7029_v16 = vcombine.low %v937_v15, %v937_v15  ;;  %v7033_v19 = vcombine.low %v941_v14, %v941_v14 }
 0x18b   : > { %1047 = vrot.lane.b32.xlu0 %v7029_v16, %s6801_s18 }
 0x18c   : > { %v943_v17 = vpop.permute.xlu1 %942  ;;  %v939_v18 = vpop.permute.xlu0 %938 }
 0x18d   : > { %v7035_v20 = vcombine.low %v939_v18, %v939_v18  ;;  %v7041_v23 = vcombine.low %v943_v17, %v943_v17 }
 0x18f   : > { %1147 = vrot.lane.b32.xlu0 %v7033_v19, %s6801_s18  ;;  %1097 = vrot.lane.b32.xlu1 %v7035_v20, %s6801_s18 }
 0x190   : > { %v947_v21 = vpop.permute.xlu1 %946  ;;  %v945_v22 = vpop.permute.xlu0 %944 }
 0x191   : > { %v7043_v24 = vcombine.low %v945_v22, %v945_v22  ;;  %v7049_v27 = vcombine.low %v947_v21, %v947_v21 }
 0x193   : > { %1197 = vrot.lane.b32.xlu1 %v7041_v23, %s6801_s18  ;;  %1247 = vrot.lane.b32.xlu0 %v7043_v24, %s6801_s18 }
 0x194   : > { %v998_v25 = vpop.permute.xlu1 %997  ;;  %v949_v26 = vpop.permute.xlu0 %948 }
 0x195   : > { %v1003_v28 = vsel %vm950_vm3, %v998_v25, 0  ;;  %v955_v29 = vsel %vm950_vm3, %v949_v26, 0 }
 0x196   : > { %6254 = vmatpush3.bf16.xpose.msra.mxu1 %v955_v29  ;;  %6260 = vmatpush3.bf16.xpose.msra.mxu0 %v1003_v28 }
 0x197   : > { %1297 = vrot.lane.b32.xlu1 %v7049_v27, %s6801_s18  ;;  %6265 = vmatprep.subr.bf16.mxu1 %v6796_v3 }
 0x198   : > { %6271 = vmatprep.subr.bf16.mxu0 %v6796_v3 }
 0x19b   : > { %1441 = vrot.lane.b32.xlu1 %v5971_v9, %s6802_s0 }
 0x19d   : > { %6256 = vmatmul.mubr.msk.bf16.vlgmr.msra.gmra.mrb[0].mxu1 %vm950_vm3, %v5971_v9  ;;  %6262 = vmatmul.mubr.msk.bf16.vlgmr.msra.gmra.mrb[4].mxu0 %vm950_vm3, %v7017_v13 }
 0x19e   : > { %6267 = vmatprep.mubr.msk.bf16.mxu1 %vm6797_vm1, %v6796_v3  ;;  %6273 = vmatprep.mubr.msk.bf16.mxu0 %vm6797_vm1, %v6796_v3 }
 0x1fd   : > { %v1048_v30 = vpop.permute.xlu0 %1047 }
 0x1fe   : > { %v1053_v31 = vsel %vm950_vm3, %v1048_v30, 0 }
 0x1ff   : > { %6266 = vmatpush3.bf16.xpose.msra.mxu1 %v1053_v31 }
 0x200   : > { %6277 = vmatprep.subr.bf16.mxu1 %v6796_v3 }
 0x201   : > { %v1098_v32 = vpop.permute.xlu1 %1097  ;;  %v1148_v34 = vpop.permute.xlu0 %1147 }
 0x202   : > { %v1103_v33 = vsel %vm950_vm3, %v1098_v32, 0  ;;  %v1153_v35 = vsel %vm950_vm3, %v1148_v34, 0 }
 0x203   : > { %6272 = vmatpush3.bf16.xpose.msra.mxu0 %v1103_v33 }
 0x204   : > { %6283 = vmatprep.subr.bf16.mxu0 %v6796_v3 }
 0x205   : > { %v1198_v36 = vpop.permute.xlu1 %1197  ;;  %v1248_v38 = vpop.permute.xlu0 %1247 }
 0x206   : > { %6268 = vmatmul.mubr.msk.bf16.vlgmr.msra.gmra.mrb[4].mxu1 %vm950_vm3, %v937_v15  ;;  %v1203_v37 = vsel %vm950_vm3, %v1198_v36, 0  ;;  %v1253_v40 = vsel %vm950_vm3, %v1248_v38, 0 }
 0x207   : > { %6278 = vmatpush3.bf16.xpose.msra.mxu1 %v1153_v35  ;;  %6279 = vmatprep.mubr.msk.bf16.mxu1 %vm6797_vm1, %v6796_v3 }
 0x208   : > { %6289 = vmatprep.subr.bf16.mxu1 %v6796_v3 }
 0x209   : > { %v1298_v39 = vpop.permute.xlu1 %1297 }
 0x20a   : > { %6274 = vmatmul.mubr.msk.bf16.vlgmr.msra.gmra.mrb[8].mxu0 %vm950_vm3, %v939_v18  ;;  %v1303_v41 = vsel %vm950_vm3, %v1298_v39, 0 }
 0x20b   : > { %6284 = vmatpush3.bf16.xpose.msra.mxu0 %v1203_v37  ;;  %6285 = vmatprep.mubr.msk.bf16.mxu0 %vm6797_vm1, %v6796_v3 }
 0x20c   : > { %6295 = vmatprep.subr.bf16.mxu0 %v6796_v3 }
 0x20d   : > { %v1442_v42 = vpop.permute.xlu1 %1441 }
 0x20e   : > { %6280 = vmatmul.mubr.msk.bf16.vlgmr.msra.gmra.mrb[8].mxu1 %vm950_vm3, %v941_v14  ;;  %v1448_v43 = vsel %vm1446_vm4, %v1442_v42, 0 }
 0x20f   : > { %6290 = vmatpush3.bf16.xpose.msra.mxu1 %v1253_v40  ;;  %6291 = vmatprep.mubr.msk.bf16.mxu1 %vm6797_vm1, %v6796_v3 }
 0x210   : > { %6301 = vmatprep.subr.bf16.mxu1 %v6796_v3 }
 0x212   : > { %6286 = vmatmul.mubr.msk.bf16.vlgmr.msra.gmra.mrb[12].mxu0 %vm950_vm3, %v943_v17 }
 0x213   : > { %6296 = vmatpush3.bf16.xpose.msra.mxu0 %v1303_v41  ;;  %6297 = vmatprep.mubr.msk.bf16.mxu0 %vm6797_vm1, %v6796_v3 }
 0x214   : > { %6307 = vmatprep.subr.bf16.mxu0 %v6796_v3 }
 0x216   : > { %6292 = vmatmul.mubr.msk.bf16.vlgmr.msra.gmra.mrb[12].mxu1 %vm950_vm3, %v945_v22 }
 0x217   : > { %6302 = vmatpush3.bf16.msra.mxu1 %v1448_v43  ;;  %6303 = vmatprep.mubr.msk.bf16.mxu1 %vm6797_vm1, %v6796_v3 }
 0x218   : > { %6313 = vmatprep.subr.bf16.mxu1 %v6796_v3 }
 0x21a   : > { %6298 = vmatmul.mubr.msk.bf16.vlgmr.msra.gmra.mrb[16].mxu0 %vm950_vm3, %v947_v21 }
 0x21b   : > { %6309 = vmatprep.mubr.msk.bf16.mxu0 %vm6797_vm1, %v6796_v3 }
 0x270   : > { %v991_v45 = vpop.f32.mrb[0].mxu1  ;;  %v1039_v46 = vpop.f32.mrb[4].mxu0 }
 0x271   : > { %v992_v47 = vadd.f32 %v991_v45, %v863_v44  ;;  %v1040_v48 = vadd.f32 %v1039_v46, %v863_v44  ;;  %v6257_v49 = vpop.f32.mrb[1].mxu1  ;;  %v6263_v50 = vpop.f32.mrb[5].mxu0 }
 0x272   : > { %v994_v51 = vpop.f32.mrb[2].mxu1  ;;  %v1042_v52 = vpop.f32.mrb[6].mxu0 }
 0x273   : > { %v6258_v53 = vpop.f32.mrb[3].mxu1  ;;  %v6264_v54 = vpop.f32.mrb[7].mxu0  ;;  %v1345_v55 = vsel %vm950_vm3, %v992_v47, -inf  ;;  %v1348_v56 = vsel %vm950_vm3, %v1040_v48, -inf }
 0x274   : > { %1346 = vmax.xlane.f32.xlu0 %v1345_v55  ;;  %1349 = vmax.xlane.f32.xlu1 %v1348_v56 }
 0x2d9   : > { %v1089_v57 = vpop.f32.mrb[4].mxu1 }
 0x2da   : > { %v1090_v58 = vadd.f32 %v1089_v57, %v863_v44  ;;  %v6269_v59 = vpop.f32.mrb[5].mxu1 }
 0x2db   : > { %v1092_v60 = vpop.f32.mrb[6].mxu1 }
 0x2dc   : > { %v6270_v61 = vpop.f32.mrb[7].mxu1  ;;  %v1351_v62 = vsel %vm950_vm3, %v1090_v58, -inf }
 0x2dd   : > { %1352 = vmax.xlane.f32.xlu0 %v1351_v62  ;;  %v1139_v63 = vpop.f32.mrb[8].mxu0 }
 0x2de   : > { %v1140_v0 = vadd.f32 %v1139_v63, %v863_v44  ;;  %v6275_v1 = vpop.f32.mrb[9].mxu0 }
 0x2df   : > { %v1142_v2 = vpop.f32.mrb[10].mxu0 }
 0x2e0   : > { %v6276_v4 = vpop.f32.mrb[11].mxu0  ;;  %v1354_v5 = vsel %vm950_vm3, %v1140_v0, -inf }
 0x2e1   : > { %v1189_v6 = vpop.f32.mrb[8].mxu1  ;;  %1355 = vmax.xlane.f32.xlu0 %v1354_v5 }
 0x2e2   : > { %v7104_v7 = vadd.f32 %v1189_v6, %v863_v44  ;;  %v6281_v8 = vpop.f32.mrb[9].mxu1 }
 0x2e3   : > { %v1192_v9 = vpop.f32.mrb[10].mxu1 }
 0x2e4   : > { %v6282_v10 = vpop.f32.mrb[11].mxu1  ;;  %v1357_v11 = vsel %vm950_vm3, %v7104_v7, -inf }
 0x2e5   : > { %1358 = vmax.xlane.f32.xlu1 %v1357_v11  ;;  %v1239_v12 = vpop.f32.mrb[12].mxu0 }
 0x2e6   : > { %v7108_v14 = vadd.f32 %v1239_v12, %v863_v44  ;;  %v6287_v15 = vpop.f32.mrb[13].mxu0 }
 0x2e7   : > { %v1242_v17 = vpop.f32.mrb[14].mxu0 }
 0x2e8   : > { %v6288_v18 = vpop.f32.mrb[15].mxu0  ;;  %v1360_v21 = vsel %vm950_vm3, %v7108_v14, -inf }
 0x2e9   : > { %v1289_v22 = vpop.f32.mrb[12].mxu1  ;;  %1361 = vmax.xlane.f32.xlu0 %v1360_v21 }
 0x2ea   : > { %v1290_v25 = vadd.f32 %v1289_v22, %v863_v44  ;;  %v6293_v26 = vpop.f32.mrb[13].mxu1 }
 0x2eb   : > { %v1292_v28 = vpop.f32.mrb[14].mxu1 }
 0x2ec   : > { %v6294_v29 = vpop.f32.mrb[15].mxu1  ;;  %v1363_v30 = vsel %vm950_vm3, %v1290_v25, -inf }
 0x2ed   : > { %1364 = vmax.xlane.f32.xlu1 %v1363_v30  ;;  %v1339_v31 = vpop.f32.mrb[16].mxu0 }
 0x2ee   : > { %v1340_v32 = vadd.f32 %v1339_v31, %v863_v44  ;;  %v6299_v33 = vpop.f32.mrb[17].mxu0 }
 0x2ef   : > { %v1342_v34 = vpop.f32.mrb[18].mxu0 }
 0x2f0   : > { %v6300_v35 = vpop.f32.mrb[19].mxu0  ;;  %v1366_v36 = vsel %vm950_vm3, %v1340_v32, -inf }
 0x2f1   : > { %1367 = vmax.xlane.f32.xlu0 %v1366_v36 }
 0x2fe   : > { %1538 = vrot.lane.b32.xlu1 %v7029_v16, %s6802_s0 }
 0x301   : > { %v1347_v37 = vpop.xlane.xlu0 %1346  ;;  %v1350_v38 = vpop.xlane.xlu1 %1349 }
 0x302   : > { %1586 = vrot.lane.b32.xlu1 %v7035_v20, %s6802_s0  ;;  %v1369_v39 = vsub.f32 %v992_v47, %v1347_v37  ;;  %v1370_v40 = vsub.f32 %v1040_v48, %v1350_v38 }
 0x304   : > { %v1377_v41 = vmul.f32 1.442695, %v1369_v39  ;;  %v1379_v42 = vmul.f32 1.442695, %v1370_v40 }
 0x306   : > { %6678 = vpow2.f32 %v1377_v41 }
 0x307   : > { %1490 = vrot.lane.b32.xlu0 %v7017_v13, %s6802_s0  ;;  %6680 = vpow2.f32 %v1379_v42 }
 0x310   : > { %v6679_v43 = vpop.eup %6678 }
 0x311   : > { %v6681_v44 = vpop.eup %6680  ;;  %v1393_v45 = vsel %vm950_vm3, %v6679_v43, 0.0 }
 0x312   : > { %v1396_v16 = vsel %vm950_vm3, %v6681_v44, 0.0 }
 0x326   : > { %1394 = vadd.xlane.f32.xlu1 %v1393_v45  ;;  %1397 = vadd.xlane.f32.xlu0 %v1396_v16 }
 0x36a   : > { %v1353_v20 = vpop.xlane.xlu0 %1352 }
 0x36b   : > { %v1371_v46 = vsub.f32 %v1090_v58, %v1353_v20 }
 0x36d   : > { %v1381_v49 = vmul.f32 1.442695, %v1371_v46 }
 0x36e   : > { %v1356_v13 = vpop.xlane.xlu0 %1355 }
 0x36f   : > { %6682 = vpow2.f32 %v1381_v49  ;;  %v1372_v50 = vsub.f32 %v1140_v0, %v1356_v13 }
 0x371   : > { %v1383_v47 = vmul.f32 1.442695, %v1372_v50 }
 0x372   : > { %v1359_v58 = vpop.xlane.xlu1 %1358 }
 0x373   : > { %6684 = vpow2.f32 %v1383_v47  ;;  %v1373_v59 = vsub.f32 %v7104_v7, %v1359_v58 }
 0x375   : > { %v1385_v62 = vmul.f32 1.442695, %v1373_v59  ;;  %v928_v59 = vld [vmem:[%s6939_s21 + $0x4] sm:$0xf] }
 0x376   : > { %v1362_v51 = vpop.xlane.xlu0 %1361 }
 0x377   : > { %v1374_v61 = vsub.f32 %v7108_v14, %v1362_v51  ;;  %6686 = vpow2.f32 %v1385_v62 }
 0x379   : > { %v7122_v48 = vpop.eup %6682  ;;  %v1387_v0 = vmul.f32 1.442695, %v1374_v61 }
 0x37a   : > { %v1399_v52 = vsel %vm950_vm3, %v7122_v48, 0.0  ;;  %v1365_v60 = vpop.xlane.xlu1 %1364 }
 0x37b   : > { %1400 = vadd.xlane.f32.xlu1 %v1399_v52  ;;  %v1375_v63 = vsub.f32 %v1290_v25, %v1365_v60  ;;  %6688 = vpow2.f32 %v1387_v0  ;;  %v1832_v60 = vsel %vm1446_vm4, %v928_v59, 0 }
 0x37d   : > { %v7126_v53 = vpop.eup %6684  ;;  %v1389_v1 = vmul.f32 1.442695, %v1375_v63 }
 0x37e   : > { %v1368_v54 = vpop.xlane.xlu0 %1367  ;;  %v1402_v55 = vsel %vm950_vm3, %v7126_v53, 0.0  ;;  %v1539_v5 = vpop.permute.xlu1 %1538 }
 0x37f   : > { %1403 = vadd.xlane.f32.xlu0 %v1402_v55  ;;  %v1376_v2 = vsub.f32 %v1340_v32, %v1368_v54  ;;  %6690 = vpow2.f32 %v1389_v1  ;;  %v1544_v28 = vsel %vm1446_vm4, %v1539_v5, 0 }
 0x381   : > { %v1391_v4 = vmul.f32 1.442695, %v1376_v2 }
 0x382   : > { %v1491_v56 = vpop.permute.xlu0 %1490  ;;  %v1587_v6 = vpop.permute.xlu1 %1586 }
 0x383   : > { %v1496_v57 = vsel %vm1446_vm4, %v1491_v56, 0  ;;  %6692 = vpow2.f32 %v1391_v4  ;;  %v1592_v29 = vsel %vm1446_vm4, %v1587_v6, 0  ;;  %v927_v56 = vld [vmem:[%s6939_s21] sm:$0xf] }
 0x384   : > { %6308 = vmatpush3.bf16.msra.mxu0 %v1496_v57  ;;  %v1879_v58 = vsel %vm1446_vm4, %v927_v56, 0 }
 0x385   : > { %6319 = vmatprep.subr.bf16.mxu0 %v6796_v3 }
 0x38c   : > { %1682 = vrot.lane.b32.xlu1 %v7041_v23, %s6802_s0  ;;  %v7138_v23 = vpop.eup %6686 }
 0x38d   : > { %v1405_v7 = vsel %vm950_vm3, %v7138_v23, 0.0 }
 0x395   : > { %1634 = vrot.lane.b32.xlu0 %v7033_v19, %s6802_s0  ;;  %v7140_v19 = vpop.eup %6688 }
 0x396   : > { %v7144_v8 = vpop.eup %6690  ;;  %v1408_v12 = vsel %vm950_vm3, %v7140_v19, 0.0 }
 0x397   : > { %v1411_v11 = vsel %vm950_vm3, %v7144_v8, 0.0  ;;  %v7150_v14 = vpop.eup %6692 }
 0x398   : > { %v1414_v15 = vsel %vm950_vm3, %v7150_v14, 0.0 }
 0x3b0   : > { %1406 = vadd.xlane.f32.xlu1 %v1405_v7 }
 0x3b3   : > { %v1395_v9 = vpop.xlane.xlu1 %1394  ;;  %v1398_v10 = vpop.xlane.xlu0 %1397 }
 0x3b4   : > { %6694 = vrcp.f32 %v1395_v9  ;;  %1412 = vadd.xlane.f32.xlu1 %v1411_v11  ;;  %1409 = vadd.xlane.f32.xlu0 %v1408_v12 }
 0x3b5   : > { %6696 = vrcp.f32 %v1398_v10  ;;  %v929_v10 = vld [vmem:[%s6939_s21 + $0x8] sm:$0xf] }
 0x3b8   : > { %1415 = vadd.xlane.f32.xlu0 %v1414_v15 }
 0x3be   : > { %v6695_v17 = vpop.eup %6694 }
 0x3bf   : > { %v6697_v18 = vpop.eup %6696  ;;  %v1425_v21 = vmul.f32 %v6695_v17, %v6679_v43  ;;  %v1927_v17 = vsel %vm1446_vm4, %v929_v10, 0 }
 0x3c0   : > { %v1426_v22 = vmul.f32 %v6697_v18, %v6681_v44 }
 0x3c1   : > { %v1433_v25 = vpack.c.bf16 %v1425_v21, %v1425_v21 }
 0x3c2   : > { %v1434_v26 = vpack.c.bf16 %v1426_v22, %v1426_v22 }
 0x3c3   : > { %6304 = vmatmul.mubr.msk.bf16.vlgmr.msra.gmra.mrb[16].mxu1 %vm950_vm3, %v1433_v25 }
 0x3c4   : > { %6310 = vmatmul.mubr.msk.bf16.vlgmr.msra.gmra.mrb[20].mxu0 %vm950_vm3, %v1434_v26  ;;  %6314 = vmatpush3.bf16.msra.mxu1 %v1544_v28 }
 0x3c5   : > { %6320 = vmatpush3.bf16.msra.mxu0 %v1592_v29  ;;  %1778 = vrot.lane.b32.xlu1 %v7049_v27, %s6802_s0 }
 0x3c6   : > { %6315 = vmatprep.mubr.msk.bf16.mxu1 %vm6797_vm1, %v6796_v3  ;;  %6325 = vmatprep.subr.bf16.mxu1 %v6796_v3 }
 0x3c7   : > { %6321 = vmatprep.mubr.msk.bf16.mxu0 %vm6797_vm1, %v6796_v3  ;;  %6331 = vmatprep.subr.bf16.mxu0 %v6796_v3 }
 0x3ce   : > { %1730 = vrot.lane.b32.xlu0 %v7043_v24, %s6802_s0 }
 0x408   : > { %v1401_v30 = vpop.xlane.xlu1 %1400 }
 0x409   : > { %6698 = vrcp.f32 %v1401_v30 }
 0x40c   : > { %v1404_v31 = vpop.xlane.xlu0 %1403  ;;  %v1683_v38 = vpop.permute.xlu1 %1682 }
 0x40d   : > { %6700 = vrcp.f32 %v1404_v31  ;;  %v1688_v39 = vsel %vm1446_vm4, %v1683_v38, 0 }
 0x410   : > { %v1635_v33 = vpop.permute.xlu0 %1634 }
 0x411   : > { %v1640_v37 = vsel %vm1446_vm4, %v1635_v33, 0 }
 0x413   : > { %v6699_v32 = vpop.eup %6698 }
 0x414   : > { %v1427_v27 = vmul.f32 %v6699_v32, %v7122_v48 }
 0x416   : > { %v1435_v34 = vpack.c.bf16 %v1427_v27, %v1427_v27 }
 0x417   : > { %v6701_v35 = vpop.eup %6700 }
 0x418   : > { %v1428_v36 = vmul.f32 %v6701_v35, %v7126_v53  ;;  %6316 = vmatmul.mubr.msk.bf16.vlgmr.msra.gmra.mrb[20].mxu1 %vm950_vm3, %v1435_v34 }
 0x419   : > { %6326 = vmatpush3.bf16.msra.mxu1 %v1640_v37  ;;  %6327 = vmatprep.mubr.msk.bf16.mxu1 %vm6797_vm1, %v6796_v3 }
 0x41a   : > { %v1436_v24 = vpack.c.bf16 %v1428_v36, %v1428_v36  ;;  %6337 = vmatprep.subr.bf16.mxu1 %v6796_v3 }
 0x41c   : > { %6322 = vmatmul.mubr.msk.bf16.vlgmr.msra.gmra.mrb[24].mxu0 %vm950_vm3, %v1436_v24 }
 0x41d   : > { %6332 = vmatpush3.bf16.msra.mxu0 %v1688_v39  ;;  %6333 = vmatprep.mubr.msk.bf16.mxu0 %vm6797_vm1, %v6796_v3 }
 0x41e   : > { %6343 = vmatprep.subr.bf16.mxu0 %v6796_v3 }
 0x43d   : > { %v1407_v40 = vpop.xlane.xlu1 %1406 }
 0x43e   : > { %6702 = vrcp.f32 %v1407_v40 }
 0x441   : > { %v1413_v41 = vpop.xlane.xlu1 %1412  ;;  %v1410_v42 = vpop.xlane.xlu0 %1409 }
 0x442   : > { %6704 = vrcp.f32 %v1413_v41 }
 0x443   : > { %6706 = vrcp.f32 %v1410_v42 }
 0x445   : > { %v1416_v43 = vpop.xlane.xlu0 %1415  ;;  %v1779_v48 = vpop.permute.xlu1 %1778 }
 0x446   : > { %6708 = vrcp.f32 %v1416_v43  ;;  %v1784_v53 = vsel %vm1446_vm4, %v1779_v48, 0 }
 0x448   : > { %v6703_v44 = vpop.eup %6702 }
 0x449   : > { %v1429_v45 = vmul.f32 %v6703_v44, %v7138_v23  ;;  %v1731_v16 = vpop.permute.xlu0 %1730 }
 0x44a   : > { %v1736_v13 = vsel %vm1446_vm4, %v1731_v16, 0 }
 0x44b   : > { %v1437_v20 = vpack.c.bf16 %v1429_v45, %v1429_v45 }
 0x44c   : > { %v6705_v46 = vpop.eup %6704 }
 0x44d   : > { %v6707_v49 = vpop.eup %6706  ;;  %6328 = vmatmul.mubr.msk.bf16.vlgmr.msra.gmra.mrb[24].mxu1 %vm950_vm3, %v1437_v20  ;;  %v1431_v47 = vmul.f32 %v6705_v46, %v7144_v8 }
 0x44e   : > { %v1430_v50 = vmul.f32 %v6707_v49, %v7140_v19  ;;  %6338 = vmatpush3.bf16.msra.mxu1 %v1736_v13  ;;  %6339 = vmatprep.mubr.msk.bf16.mxu1 %vm6797_vm1, %v6796_v3  ;;  %v930_v19 = vld [vmem:[%s6939_s21 + $0xc] sm:$0xf]  ;;  %s7867_s21 = scalar_lea.vmem %s7866_s24, %s6926_s23 }
 0x44f   : > { %6349 = vmatprep.subr.bf16.mxu1 %v6796_v3  ;;  %v1439_v54 = vpack.c.bf16 %v1431_v47, %v1431_v47  ;;  %v1977_v6 = vsel %vm1446_vm4, %v930_v19, 0 }
 0x450   : > { %v1438_v51 = vpack.c.bf16 %v1430_v50, %v1430_v50  ;;  %v6709_v52 = vpop.eup %6708 }
 0x451   : > { %v1432_v55 = vmul.f32 %v6709_v52, %v7150_v14 }
 0x452   : > { %6334 = vmatmul.mubr.msk.bf16.vlgmr.msra.gmra.mrb[28].mxu0 %vm950_vm3, %v1438_v51 }
 0x453   : > { %6344 = vmatpush3.bf16.msra.mxu0 %v1784_v53  ;;  %6345 = vmatprep.mubr.msk.bf16.mxu0 %vm6797_vm1, %v6796_v3  ;;  %v1440_v57 = vpack.c.bf16 %v1432_v55, %v1432_v55 }
 0x454   : > { %6355 = vmatprep.subr.bf16.mxu0 %v6796_v3 }
 0x455   : > { %6340 = vmatmul.mubr.msk.bf16.vlgmr.msra.gmra.mrb[28].mxu1 %vm950_vm3, %v1439_v54 }
 0x456   : > { %6351 = vmatprep.mubr.msk.bf16.mxu1 %vm6797_vm1, %v6796_v3  ;;  %6350 = vmatpush3.bf16.msra.mxu1 %v1832_v60  ;;  %v6754_v60 = vld [vmem:[#allocation2] sm:$0xff] }
 0x457   : > { %6361 = vmatprep.subr.bf16.mxu1 %v6796_v3 }
 0x45a   : > { %6346 = vmatmul.mubr.msk.bf16.vlgmr.msra.gmra.mrb[32].mxu0 %vm950_vm3, %v1440_v57 }
 0x45b   : > { %6356 = vmatpush3.bf16.msra.mxu0 %v1879_v58  ;;  %6357 = vmatprep.mubr.msk.bf16.mxu0 %vm6797_vm1, %v6796_v3 }
 0x45c   : > { %6367 = vmatprep.subr.bf16.mxu0 %v6796_v3 }
 0x496   : > { %v1484_v61 = vpop.f32.mrb[16].mxu1 }
 0x497   : > { %v1532_v62 = vpop.f32.mrb[20].mxu0  ;;  %v6305_v63 = vpop.f32.mrb[17].mxu1 }
 0x498   : > { %v1826_v0 = vpack.c.bf16 %v1532_v62, %v1484_v61  ;;  %v6311_v1 = vpop.f32.mrb[21].mxu0  ;;  %v1487_v2 = vpop.f32.mrb[18].mxu1  ;;  %v6755_v63 = vld [vmem:[#allocation2 + $0x8] sm:$0xff] }
 0x499   : > { %v1535_v4 = vpop.f32.mrb[22].mxu0  ;;  %v6306_v5 = vpop.f32.mrb[19].mxu1 }
 0x49a   : > { %v6312_v23 = vpop.f32.mrb[23].mxu0  ;;  %6358 = vmatmul.mubr.msk.bf16.vlgmr.msra.gmra.mrb[36].mxu0 %vm950_vm3, %v1826_v0 }
 0x49b   : > { %6369 = vmatprep.mubr.msk.bf16.mxu0 %vm6797_vm1, %v6796_v3  ;;  %6368 = vmatpush3.bf16.msra.mxu0 %v1977_v6 }
 0x49c   : > { %6381 = vmatprep.subr.bf16.mxu0 %v6796_v3 }
 0x4eb   : > { %v1580_v7 = vpop.f32.mrb[20].mxu1 }
 0x4ec   : > { %v6317_v8 = vpop.f32.mrb[21].mxu1 }
 0x4ed   : > { %v1583_v9 = vpop.f32.mrb[22].mxu1 }
 0x4ee   : > { %v6318_v11 = vpop.f32.mrb[23].mxu1 }
 0x4ef   : > { %v1628_v12 = vpop.f32.mrb[24].mxu0  ;;  %v6546_v11 = vld [vmem:[%s6953_s26] sm:$0xff]  }
 0x4f0   : > { %v1827_v14 = vpack.c.bf16 %v1628_v12, %v1580_v7  ;;  %v6323_v15 = vpop.f32.mrb[25].mxu0  ;;  %v6547_v12 = vld [vmem:[%s6953_s26 + $0x8] sm:$0xff]  }
 0x4f1   : > { %v1631_v18 = vpop.f32.mrb[26].mxu0  ;;  %v2132_v15 = vld [vmem:[%s7864_s25 + $0x8] sm:$0xff] }
 0x4f2   : > { %v6324_v21 = vpop.f32.mrb[27].mxu0  ;;  %6352 = vmatmul.mubr.msk.bf16.vlgmr.msra.gmra.mrb[32].mxu1 %vm950_vm3, %v1827_v14  ;;  %v2131_v14 = vld [vmem:[%s7864_s25] sm:$0xff] }
 0x4f3   : > { %6362 = vmatpush3.bf16.msra.mxu1 %v1927_v17  ;;  %6363 = vmatprep.mubr.msk.bf16.mxu1 %vm6797_vm1, %v6796_v3  ;;  %v2133_v17 = vpack.c.bf16 %v2132_v15, %v2131_v14  ;;  %v6548_v18 = vld [vmem:[%s6948_s2] sm:$0xff]   ;;  %v6549_v21 = vld [vmem:[%s6948_s2 + $0x8] sm:$0xff]   ;;  %s7865_s2 = scalar_lea.vmem %s7814_s5, %s6926_s23 }
 0x4f4   : > { %6373 = vmatprep.subr.bf16.mxu1 %v6796_v3 }
 0x520   : > { %v1676_v22 = vpop.f32.mrb[24].mxu1 }
 0x521   : > { %v6329_v25 = vpop.f32.mrb[25].mxu1 }
 0x522   : > { %v1679_v26 = vpop.f32.mrb[26].mxu1 }
 0x523   : > { %v6330_v28 = vpop.f32.mrb[27].mxu1 }
 0x525   : > { %v1724_v29 = vpop.f32.mrb[28].mxu0 }
 0x526   : > { %v1922_v30 = vpack.c.bf16 %v1724_v29, %v1676_v22  ;;  %v6335_v31 = vpop.f32.mrb[29].mxu0 }
 0x527   : > { %v1727_v32 = vpop.f32.mrb[30].mxu0 }
 0x528   : > { %v6336_v27 = vpop.f32.mrb[31].mxu0  ;;  %6364 = vmatmul.mubr.msk.bf16.vlgmr.msra.gmra.mrb[36].mxu1 %vm950_vm3, %v1922_v30  ;;  %v1772_v33 = vpop.f32.mrb[28].mxu1 }
 0x529   : > { %v6341_v34 = vpop.f32.mrb[29].mxu1  ;;  %6377 = vmatprep.mubr.msk.bf16.mxu1 %vm6797_vm1, %v6796_v3  ;;  %6374 = vmatpush3.bf16.msra.mxu1 %v6548_v18  ;;  %v5744_v27 = vld [vmem:[%s7865_s2] ss:$0 sm:$0xff]  ;;  %s7871_s2 = sld [smem:[#allocation7_spill]] }
 0x52a   : > { %v1775_v35 = vpop.f32.mrb[30].mxu1  ;;  %6375 = vmatprep.subr.bf16.mxu1 %v6796_v3 }
 0x52b   : > { %v6342_v36 = vpop.f32.mrb[31].mxu1 }
 0x52c   : > { %v5745_v36 = vld [vmem:[%s7867_s21] ss:$0 sm:$0xff] }
 0x52d   : > { %v1820_v37 = vpop.f32.mrb[32].mxu0  ;;  %6376 = vmatpush3.bf16.msra.mxu1 %v6549_v21 }
 0x52e   : > { %v1972_v38 = vpack.c.bf16 %v1820_v37, %v1772_v33  ;;  %v6347_v24 = vpop.f32.mrb[33].mxu0  ;;  %6389 = vmatprep.subr.bf16.mxu1 %v6796_v3 }
 0x52f   : > { %v1823_v39 = vpop.f32.mrb[34].mxu0  ;;  %p5955_p5 = scmp.ne.s32.totalorder %s7871_s2, 5 }
 0x530   : > { %v6348_v40 = vpop.f32.mrb[35].mxu0  ;;  %6370 = vmatmul.mubr.msk.bf16.vlgmr.msra.gmra.mrb[40].mxu0 %vm950_vm3, %v1972_v38  ;;  %s7872_s7 = sld [smem:[#allocation19_spill]] (!%p5955_p5)  ;;  %vm6805_vm5 = vmmov (!%p5955_p5), 0  }
 0x531   : > { %6385 = vmatprep.mubr.msk.bf16.mxu0 %vm6797_vm1, %v6796_v3  ;;  %6382 = vmatpush3.bf16.msra.mxu0 %v6546_v11 }
 0x532   : > { %6383 = vmatprep.subr.bf16.mxu0 %v6796_v3 }
 0x535   : > { %6384 = vmatpush3.bf16.msra.mxu0 %v6547_v12 }
 0x536   : > { %6395 = vmatprep.subr.bf16.mxu0 %v6796_v3 }
 0x538   : > { %6386 = vmatmul.mubr.msk.bf16.vlgmr.msra.gmra.mrb[44].mxu0 %vm881_vm2, %v2133_v17 }
 0x539   : > { %6397 = vmatprep.mubr.msk.bf16.mxu0 %vm6797_vm1, %v6796_v3 }
 0x56d   : > { %v1915_v41 = vpop.f32.mrb[36].mxu0 }
 0x56e   : > { %v6359_v42 = vpop.f32.mrb[37].mxu0 }
 0x56f   : > { %v1918_v43 = vpop.f32.mrb[38].mxu0 }
 0x570   : > { %v6360_v44 = vpop.f32.mrb[39].mxu0 }
 0x5c5   : > { %v1868_v45 = vpop.f32.mrb[32].mxu1 }
 0x5c6   : > { %v1916_v16 = vadd.f32 %v1915_v41, %v1868_v45  ;;  %v6353_v20 = vpop.f32.mrb[33].mxu1 }
 0x5c7   : > { %v1871_v46 = vpop.f32.mrb[34].mxu1 }
 0x5c8   : > { %v1919_v49 = vadd.f32 %v1918_v43, %v1871_v46  ;;  %v6354_v13 = vpop.f32.mrb[35].mxu1 }
 0x5fb   : > { %v1963_v50 = vpop.f32.mrb[36].mxu1 }
 0x5fc   : > { %v1970_v47 = vadd.f32 %v1963_v50, %v1916_v16  ;;  %v6365_v48 = vpop.f32.mrb[37].mxu1 }
 0x5fd   : > { %v1966_v51 = vpop.f32.mrb[38].mxu1 }
 0x5fe   : > { %v1971_v52 = vadd.f32 %v1966_v51, %v1919_v49  ;;  %v6366_v53 = vpop.f32.mrb[39].mxu1 }
 0x603   : > { %v2013_v54 = vpop.f32.mrb[40].mxu0 }
 0x604   : > { %v2020_v55 = vadd.f32 %v2013_v54, %v1970_v47  ;;  %v6371_v56 = vpop.f32.mrb[41].mxu0 }
 0x605   : > { %v2016_v57 = vpop.f32.mrb[42].mxu0 }
 0x606   : > { %v2021_v58 = vadd.f32 %v2016_v57, %v1971_v52  ;;  %v6372_v59 = vpop.f32.mrb[43].mxu0  ;;  %v2024_v61 = vadd.f32 %v6754_v60, %v2020_v55 }
 0x608   : > { %v2026_v62 = vsel %vm881_vm2, %v2024_v61, 0.0  ;;  %v2025_v0 = vadd.f32 %v6755_v63, %v2021_v58 }
 0x609   : > { %2027 = vadd.xlane.f32.xlu0 %v2026_v62 }
 0x60a   : > { %v2029_v1 = vsel %vm881_vm2, %v2025_v0, 0.0 }
 0x60b   : > { %2030 = vadd.xlane.f32.xlu1 %v2029_v1  ;;  %v2187_v40 = vpop.f32.mrb[44].mxu0 }
 0x60c   : > { %v5975_v41 = vpack.c.bf16 %v2187_v40, %v2187_v40  ;;  %v6387_v42 = vpop.f32.mrb[45].mxu0 }
 0x60d   : > { %v2190_v43 = vpop.f32.mrb[46].mxu0 }
 0x60e   : > { %v7264_v44 = vpack.c.bf16 %v2190_v43, %v2190_v43  ;;  %v6388_v45 = vpop.f32.mrb[47].mxu0  ;;  %v2237_v16 = vsel %vm950_vm3, %v5975_v41, 0 }
 0x610   : > { %v2283_v20 = vsel %vm950_vm3, %v7264_v44, 0 }
 0x611   : > { %6396 = vmatpush3.bf16.xpose.msra.mxu0 %v2283_v20 }
 0x612   : > { %6407 = vmatprep.subr.bf16.mxu0 %v6796_v3 }
 0x61c   : > { %2221 = vrot.lane.b32.xlu1 %v5975_v41, %s6799_s4 }
 0x620   : > { %2227 = vrot.lane.b32.xlu1 %v7264_v44, %s6798_s12 }
 0x696   : > { %v2028_v2 = vpop.xlane.xlu0 %2027 }
 0x697   : > { %v2033_v4 = vmul.f32 0.03125, %v2028_v2 }
 0x698   : > { %v2031_v5 = vpop.xlane.xlu1 %2030 }
 0x699   : > { %v2035_v23 = vsub.f32 %v2024_v61, %v2033_v4  ;;  %v2034_v19 = vmul.f32 0.03125, %v2031_v5 }
 0x69b   : > { %v2036_v6 = vsub.f32 %v2025_v0, %v2034_v19  ;;  %v2037_v7 = vmul.f32 %v2035_v23, %v2035_v23 }
 0x69c   : > { %v7277_v49 = vpop.permute.xlu1 %2221 }
 0x69d   : > { %v2039_v8 = vsel %vm881_vm2, %v2037_v7, 0.0  ;;  %v2038_v9 = vmul.f32 %v2036_v6, %v2036_v6  ;;  %v2329_v47 = vsel %vm950_vm3, %v7277_v49, 0 }
 0x69e   : > { %2040 = vadd.xlane.f32.xlu0 %v2039_v8 }
 0x69f   : > { %v2042_v10 = vsel %vm881_vm2, %v2038_v9, 0.0 }
 0x6a0   : > { %v7303_v55 = vpop.permute.xlu1 %2227 }
 0x6a1   : > { %v2467_v61 = vsel %vm950_vm3, %v7303_v55, 0 }
 0x6a2   : > { %2043 = vadd.xlane.f32.xlu0 %v2042_v10 }
 0x6b8   : > { %2223 = vrot.lane.b32.xlu0 %v7264_v44, %s6799_s4 }
 0x6bc   : > { %2225 = vrot.lane.b32.xlu0 %v5975_v41, %s6798_s12 }
 0x72b   : > { %v2041_v22 = vpop.xlane.xlu0 %2040 }
 0x72c   : > { %v2045_v25 = vmul.f32 0.03125, %v2041_v22 }
 0x72e   : > { %v2047_v26 = vadd.f32 1e-05, %v2045_v25 }
 0x72f   : > { %v2044_v28 = vpop.xlane.xlu0 %2043 }
 0x730   : > { %6710 = vrsqrt.f32 %v2047_v26  ;;  %v2046_v29 = vmul.f32 0.03125, %v2044_v28 }
 0x732   : > { %v2048_v30 = vadd.f32 1e-05, %v2046_v29 }
 0x733   : > { %v7281_v51 = vpop.permute.xlu0 %2223 }
 0x734   : > { %6712 = vrsqrt.f32 %v2048_v30  ;;  %v2375_v54 = vsel %vm950_vm3, %v7281_v51, 0 }
 0x737   : > { %v7305_v56 = vpop.permute.xlu0 %2225 }
 0x738   : > { %v2421_v58 = vsel %vm950_vm3, %v7305_v56, 0 }
 0x73a   : > { %v6711_v31 = vpop.eup %6710 }
 0x73b   : > { %v2051_v32 = vmul.f32 %v6711_v31, %v2035_v23 }
 0x73d   : > { %v2059_v34 = vmul.f32 %v5744_v27, %v2051_v32 }
 0x73e   : > { %v6713_v33 = vpop.eup %6712 }
 0x73f   : > { %v2052_v35 = vmul.f32 %v6713_v33, %v2036_v6  ;;  %v7255_v38 = vadd.f32 %v5745_v36, %v2059_v34 }
 0x741   : > { %v2060_v37 = vmul.f32 %v5744_v27, %v2052_v35 }
 0x743   : > { %v7257_v24 = vadd.f32 %v5745_v36, %v2060_v37 }
 0x745   : > { %v2069_v39 = vpack.c.bf16 %v7257_v24, %v7255_v38 }
 0x747   : > { %6378 = vmatmul.mubr.msk.bf16.vlgmr.msra.gmra.mrb[40].mxu1 %vm881_vm2, %v2069_v39 }
 0x748   : > { %6391 = vmatprep.mubr.msk.bf16.mxu1 %vm6797_vm1, %v6796_v3  ;;  %6390 = vmatpush3.bf16.xpose.msra.mxu1 %v2237_v16 }
 0x749   : > { %6401 = vmatprep.subr.bf16.mxu1 %v6796_v3 }
 0x81a   : > { %v2123_v46 = vpop.f32.mrb[40].mxu1 }
 0x81b   : > { %v5973_v13 = vpack.c.bf16 %v2123_v46, %v2123_v46  ;;  %v6379_v50 = vpop.f32.mrb[41].mxu1 }
 0x81c   : > { %v2126_v48 = vpop.f32.mrb[42].mxu1 }
 0x81d   : > { %v5974_v52 = vpack.c.bf16 %v2126_v48, %v2126_v48  ;;  %v6380_v53 = vpop.f32.mrb[43].mxu1  ;;  %6392 = vmatmul.mubr.msk.bf16.vlgmr.msra.gmra.mrb[44].mxu1 %vm950_vm3, %v5973_v13  ;;  %2209 = vrot.lane.b32.xlu1 %v5973_v13, %s6799_s4 }
 0x81e   : > { %2213 = vrot.lane.b32.xlu0 %v5973_v13, %s6798_s12  ;;  %6402 = vmatpush3.bf16.xpose.msra.mxu1 %v2329_v47  ;;  %v5766_v53 = vcombine.low %v7277_v49, %v7277_v49 }
 0x81f   : > { %6398 = vmatmul.mubr.msk.bf16.vlgmr.msra.gmra.mrb[48].mxu0 %vm950_vm3, %v5974_v52  ;;  %6403 = vmatprep.mubr.msk.bf16.mxu1 %vm6797_vm1, %v6796_v3 }
 0x820   : > { %6408 = vmatpush3.bf16.xpose.msra.mxu0 %v2375_v54  ;;  %6413 = vmatprep.subr.bf16.mxu1 %v6796_v3  ;;  %v5768_v54 = vcombine.low %v7281_v51, %v7281_v51 }
 0x821   : > { %2211 = vrot.lane.b32.xlu1 %v5974_v52, %s6799_s4  ;;  %6409 = vmatprep.mubr.msk.bf16.mxu0 %vm6797_vm1, %v6796_v3 }
 0x822   : > { %2229 = vrot.lane.b32.xlu0 %v5975_v41, %s6800_s20  ;;  %6419 = vmatprep.subr.bf16.mxu0 %v6796_v3 }
 0x825   : > { %2215 = vrot.lane.b32.xlu1 %v5974_v52, %s6798_s12  ;;  %s7868_s12 = sld [smem:[#allocation8_spill]] }
 0x826   : > { %2217 = vrot.lane.b32.xlu0 %v5973_v13, %s6800_s20 }
 0x829   : > { %2231 = vrot.lane.b32.xlu1 %v7264_v44, %s6800_s20 }
 0x82d   : > { %2219 = vrot.lane.b32.xlu1 %v5974_v52, %s6800_s20 }
 0x831   : > { %2697 = vrot.lane.b32.xlu1 %v5975_v41, %s6801_s18 }
 0x88f   : > { %v2210_v57 = vpop.permute.xlu1 %2209 }
 0x890   : > { %v2214_v59 = vpop.permute.xlu0 %2213  ;;  %6404 = vmatmul.mubr.msk.bf16.vlgmr.msra.gmra.mrb[48].mxu1 %vm950_vm3, %v2210_v57 }
 0x891   : > { %6414 = vmatpush3.bf16.xpose.msra.mxu1 %v2421_v58  ;;  %6415 = vmatprep.mubr.msk.bf16.mxu1 %vm6797_vm1, %v6796_v3 }
 0x892   : > { %6425 = vmatprep.subr.bf16.mxu1 %v6796_v3 }
 0x893   : > { %v2212_v60 = vpop.permute.xlu1 %2211 }
 0x894   : > { %6410 = vmatmul.mubr.msk.bf16.vlgmr.msra.gmra.mrb[52].mxu0 %vm950_vm3, %v2212_v60  ;;  %v7316_v62 = vpop.permute.xlu0 %2229 }
 0x895   : > { %6420 = vmatpush3.bf16.xpose.msra.mxu0 %v2467_v61  ;;  %6421 = vmatprep.mubr.msk.bf16.mxu0 %vm6797_vm1, %v6796_v3  ;;  %v2513_v0 = vsel %vm950_vm3, %v7316_v62, 0 }
 0x896   : > { %6431 = vmatprep.subr.bf16.mxu0 %v6796_v3 }
 0x897   : > { %v2216_v63 = vpop.permute.xlu1 %2215 }
 0x898   : > { %6416 = vmatmul.mubr.msk.bf16.vlgmr.msra.gmra.mrb[52].mxu1 %vm950_vm3, %v2214_v59  ;;  %v2218_v4 = vpop.permute.xlu0 %2217 }
 0x899   : > { %6426 = vmatpush3.bf16.xpose.msra.mxu1 %v2513_v0  ;;  %6427 = vmatprep.mubr.msk.bf16.mxu1 %vm6797_vm1, %v6796_v3 }
 0x89a   : > { %6437 = vmatprep.subr.bf16.mxu1 %v6796_v3 }
 0x89b   : > { %v7327_v1 = vpop.permute.xlu1 %2231 }
 0x89c   : > { %v2559_v2 = vsel %vm950_vm3, %v7327_v1, 0  ;;  %6422 = vmatmul.mubr.msk.bf16.vlgmr.msra.gmra.mrb[56].mxu0 %vm950_vm3, %v2216_v63 }
 0x89d   : > { %6432 = vmatpush3.bf16.xpose.msra.mxu0 %v2559_v2  ;;  %6433 = vmatprep.mubr.msk.bf16.mxu0 %vm6797_vm1, %v6796_v3 }
 0x89e   : > { %6443 = vmatprep.subr.bf16.mxu0 %v6796_v3 }
 0x89f   : > { %v2220_v5 = vpop.permute.xlu1 %2219 }
 0x8a0   : > { %6428 = vmatmul.mubr.msk.bf16.vlgmr.msra.gmra.mrb[56].mxu1 %vm950_vm3, %v2218_v4 }
 0x8a1   : > { %6439 = vmatprep.mubr.msk.bf16.mxu1 %vm6797_vm1, %v6796_v3 }
 0x8a3   : > { %v2698_v23 = vpop.permute.xlu1 %2697 }
 0x8a4   : > { %v2703_v19 = vsel %vm1446_vm4, %v2698_v23, 0  ;;  %6434 = vmatmul.mubr.msk.bf16.vlgmr.msra.gmra.mrb[60].mxu0 %vm950_vm3, %v2220_v5 }
 0x8a5   : > { %6438 = vmatpush3.bf16.msra.mxu1 %v2703_v19  ;;  %6445 = vmatprep.mubr.msk.bf16.mxu0 %vm6797_vm1, %v6796_v3 }
 0x8a6   : > { %6449 = vmatprep.subr.bf16.mxu1 %v6796_v3 }
 0x8f0   : > { %v2273_v6 = vpop.f32.mrb[44].mxu1 }
 0x8f1   : > { %v6393_v7 = vpop.f32.mrb[45].mxu1  ;;  %v2601_v8 = vsel %vm950_vm3, %v2273_v6, -inf }
 0x8f2   : > { %v2276_v9 = vpop.f32.mrb[46].mxu1  ;;  %2602 = vmax.xlane.f32.xlu0 %v2601_v8  ;;  %v2319_v10 = vpop.f32.mrb[48].mxu0 }
 0x8f3   : > { %v6394_v11 = vpop.f32.mrb[47].mxu1  ;;  %v6399_v12 = vpop.f32.mrb[49].mxu0  ;;  %v2604_v14 = vsel %vm950_vm3, %v2319_v10, -inf }
 0x8f4   : > { %2605 = vmax.xlane.f32.xlu1 %v2604_v14  ;;  %v2322_v15 = vpop.f32.mrb[50].mxu0 }
 0x8f5   : > { %v6400_v17 = vpop.f32.mrb[51].mxu0 }
 0x8f6   : > { %v5772_v17 = vcombine.low %v7303_v55, %v7303_v55 }
 0x963   : > { %v2365_v18 = vpop.f32.mrb[48].mxu1 }
 0x964   : > { %v6405_v21 = vpop.f32.mrb[49].mxu1  ;;  %v2607_v22 = vsel %vm950_vm3, %v2365_v18, -inf }
 0x965   : > { %v2368_v25 = vpop.f32.mrb[50].mxu1  ;;  %2608 = vmax.xlane.f32.xlu0 %v2607_v22 }
 0x966   : > { %v6406_v26 = vpop.f32.mrb[51].mxu1 }
 0x967   : > { %v2411_v28 = vpop.f32.mrb[52].mxu0 }
 0x968   : > { %v6411_v29 = vpop.f32.mrb[53].mxu0  ;;  %v2610_v30 = vsel %vm950_vm3, %v2411_v28, -inf }
 0x969   : > { %2611 = vmax.xlane.f32.xlu0 %v2610_v30  ;;  %v2414_v31 = vpop.f32.mrb[54].mxu0 }
 0x96a   : > { %v6412_v32 = vpop.f32.mrb[55].mxu0 }
 0x96b   : > { %v7347_v27 = vpop.f32.mrb[52].mxu1 }
 0x96c   : > { %v6417_v33 = vpop.f32.mrb[53].mxu1  ;;  %v2613_v34 = vsel %vm950_vm3, %v7347_v27, -inf }
 0x96d   : > { %v2460_v35 = vpop.f32.mrb[54].mxu1  ;;  %2614 = vmax.xlane.f32.xlu1 %v2613_v34 }
 0x96e   : > { %v6418_v36 = vpop.f32.mrb[55].mxu1 }
 0x96f   : > { %v7351_v37 = vpop.f32.mrb[56].mxu0 }
 0x970   : > { %v6423_v39 = vpop.f32.mrb[57].mxu0  ;;  %v2616_v40 = vsel %vm950_vm3, %v7351_v37, -inf }
 0x971   : > { %2617 = vmax.xlane.f32.xlu0 %v2616_v40  ;;  %v2506_v41 = vpop.f32.mrb[58].mxu0 }
 0x972   : > { %v6424_v42 = vpop.f32.mrb[59].mxu0 }
 0x973   : > { %v7355_v43 = vpop.f32.mrb[56].mxu1 }
 0x974   : > { %v6429_v45 = vpop.f32.mrb[57].mxu1  ;;  %v2619_v16 = vsel %vm950_vm3, %v7355_v43, -inf }
 0x975   : > { %v2552_v20 = vpop.f32.mrb[58].mxu1  ;;  %2620 = vmax.xlane.f32.xlu1 %v2619_v16 }
 0x976   : > { %v6430_v46 = vpop.f32.mrb[59].mxu1 }
 0x977   : > { %v2595_v13 = vpop.f32.mrb[60].mxu0 }
 0x978   : > { %v6435_v50 = vpop.f32.mrb[61].mxu0  ;;  %v2622_v47 = vsel %vm950_vm3, %v2595_v13, -inf }
 0x979   : > { %2623 = vmax.xlane.f32.xlu0 %v2622_v47  ;;  %v2598_v48 = vpop.f32.mrb[62].mxu0  ;;  %v5776_v47 = vcombine.low %v7327_v1, %v7327_v1  ;;  %v5774_v1 = vcombine.low %v7316_v62, %v7316_v62 }
 0x97a   : > { %v6436_v52 = vpop.f32.mrb[63].mxu0 }
 0x97f   : > { %v2603_v57 = vpop.xlane.xlu0 %2602 }
 0x980   : > { %v2625_v59 = vsub.f32 %v2273_v6, %v2603_v57 }
 0x981   : > { %v2606_v58 = vpop.xlane.xlu1 %2605 }
 0x982   : > { %v2626_v60 = vsub.f32 %v2319_v10, %v2606_v58  ;;  %v2633_v61 = vmul.f32 1.442695, %v2625_v59 }
 0x984   : > { %v2635_v63 = vmul.f32 1.442695, %v2626_v60  ;;  %6714 = vpow2.f32 %v2633_v61 }
 0x986   : > { %2795 = vrot.lane.b32.xlu1 %v5766_v53, %s6801_s18  ;;  %6716 = vpow2.f32 %v2635_v63 }
 0x98a   : > { %2845 = vrot.lane.b32.xlu1 %v5768_v54, %s6801_s18 }
 0x98e   : > { %v7368_v0 = vpop.eup %6714 }
 0x98f   : > { %2745 = vrot.lane.b32.xlu0 %v7264_v44, %s6801_s18  ;;  %v2649_v51 = vsel %vm950_vm3, %v7368_v0, 0.0 }
 0x990   : > { %v7370_v49 = vpop.eup %6716 }
 0x991   : > { %v2652_v2 = vsel %vm950_vm3, %v7370_v49, 0.0 }
 0x9ae   : > { %2650 = vadd.xlane.f32.xlu1 %v2649_v51  ;;  %2653 = vadd.xlane.f32.xlu0 %v2652_v2 }
 0x9f2   : > { %v2609_v44 = vpop.xlane.xlu0 %2608 }
 0x9f3   : > { %v2627_v4 = vsub.f32 %v2365_v18, %v2609_v44  ;;  %v5770_v18 = vcombine.low %v7305_v56, %v7305_v56 }
 0x9f5   : > { %v2637_v5 = vmul.f32 1.442695, %v2627_v4 }
 0x9f6   : > { %v2612_v23 = vpop.xlane.xlu0 %2611 }
 0x9f7   : > { %6718 = vpow2.f32 %v2637_v5  ;;  %v2628_v19 = vsub.f32 %v2411_v28, %v2612_v23 }
 0x9f9   : > { %v2639_v6 = vmul.f32 1.442695, %v2628_v19 }
 0x9fa   : > { %v2615_v21 = vpop.xlane.xlu1 %2614 }
 0x9fb   : > { %6720 = vpow2.f32 %v2639_v6  ;;  %v2629_v22 = vsub.f32 %v7347_v27, %v2615_v21 }
 0x9fd   : > { %v2641_v28 = vmul.f32 1.442695, %v2629_v22 }
 0x9fe   : > { %v2618_v8 = vpop.xlane.xlu0 %2617 }
 0x9ff   : > { %v2630_v26 = vsub.f32 %v7351_v37, %v2618_v8  ;;  %6722 = vpow2.f32 %v2641_v28 }
 0xa01   : > { %v7376_v7 = vpop.eup %6718  ;;  %v2643_v30 = vmul.f32 1.442695, %v2630_v26 }
 0xa02   : > { %v2655_v9 = vsel %vm950_vm3, %v7376_v7, 0.0  ;;  %v2621_v25 = vpop.xlane.xlu1 %2620 }
 0xa03   : > { %2656 = vadd.xlane.f32.xlu1 %v2655_v9  ;;  %v2631_v29 = vsub.f32 %v7355_v43, %v2621_v25  ;;  %6724 = vpow2.f32 %v2643_v30  ;;  %v2195_v25 = vld [vmem:[%s7868_s12] sm:$0xf] }
 0xa04   : > { %v3146_v28 = vsel %vm1446_vm4, %v2195_v25, 0 }
 0xa05   : > { %v7380_v10 = vpop.eup %6720  ;;  %v2645_v31 = vmul.f32 1.442695, %v2631_v29  ;;  %v2196_v29 = vld [vmem:[%s7868_s12 + $0x4] sm:$0xf] }
 0xa06   : > { %v2624_v11 = vpop.xlane.xlu0 %2623  ;;  %v2658_v12 = vsel %vm950_vm3, %v7380_v10, 0.0  ;;  %v2796_v33 = vpop.permute.xlu1 %2795  ;;  %v3099_v30 = vsel %vm1446_vm4, %v2196_v29, 0 }
 0xa07   : > { %2659 = vadd.xlane.f32.xlu0 %v2658_v12  ;;  %v2632_v55 = vsub.f32 %v2595_v13, %v2624_v11  ;;  %6726 = vpow2.f32 %v2645_v31  ;;  %v2801_v48 = vsel %vm1446_vm4, %v2796_v33, 0 }
 0xa09   : > { %v2647_v32 = vmul.f32 1.442695, %v2632_v55  ;;  %v7395_v56 = vpop.eup %6722 }
 0xa0a   : > { %v2746_v14 = vpop.permute.xlu0 %2745  ;;  %v2846_v27 = vpop.permute.xlu1 %2845  ;;  %v2661_v35 = vsel %vm950_vm3, %v7395_v56, 0.0 }
 0xa0b   : > { %v2751_v15 = vsel %vm1446_vm4, %v2746_v14, 0  ;;  %6728 = vpow2.f32 %v2647_v32  ;;  %v2851_v52 = vsel %vm1446_vm4, %v2846_v27, 0 }
 0xa0c   : > { %6444 = vmatpush3.bf16.msra.mxu0 %v2751_v15 }
 0xa0d   : > { %6455 = vmatprep.subr.bf16.mxu0 %v6796_v3  ;;  %v7397_v34 = vpop.eup %6724 }
 0xa0e   : > { %v2664_v41 = vsel %vm950_vm3, %v7397_v34, 0.0 }
 0xa11   : > { %v7401_v36 = vpop.eup %6726 }
 0xa12   : > { %v2667_v40 = vsel %vm950_vm3, %v7401_v36, 0.0 }
 0xa14   : > { %2945 = vrot.lane.b32.xlu1 %v5772_v17, %s6801_s18 }
 0xa15   : > { %v7407_v42 = vpop.eup %6728 }
 0xa16   : > { %v2670_v43 = vsel %vm950_vm3, %v7407_v42, 0.0 }
 0xa1d   : > { %2895 = vrot.lane.b32.xlu0 %v5770_v18, %s6801_s18 }
 0xa38   : > { %2662 = vadd.xlane.f32.xlu1 %v2661_v35 }
 0xa3b   : > { %v2651_v37 = vpop.xlane.xlu1 %2650  ;;  %v2654_v39 = vpop.xlane.xlu0 %2653 }
 0xa3c   : > { %6730 = vrcp.f32 %v2651_v37  ;;  %2668 = vadd.xlane.f32.xlu1 %v2667_v40  ;;  %2665 = vadd.xlane.f32.xlu0 %v2664_v41  ;;  %v2198_v37 = vld [vmem:[%s7868_s12 + $0xc] sm:$0xf] }
 0xa3d   : > { %6732 = vrcp.f32 %v2654_v39  ;;  %v3244_v39 = vsel %vm1446_vm4, %v2198_v37, 0 }
 0xa40   : > { %2671 = vadd.xlane.f32.xlu0 %v2670_v43  ;;  %v2197_v43 = vld [vmem:[%s7868_s12 + $0x8] sm:$0xf]  ;;  %s7873_s12 = sld [smem:[#allocation20_spill]] (!%p5955_p5) }
 0xa46   : > { %v6731_v45 = vpop.eup %6730 }
 0xa47   : > { %v6733_v16 = vpop.eup %6732  ;;  %v2681_v20 = vmul.f32 %v6731_v45, %v7368_v0 }
 0xa48   : > { %v2682_v46 = vmul.f32 %v6733_v16, %v7370_v49 }
 0xa49   : > { %v2689_v13 = vpack.c.bf16 %v2681_v20, %v2681_v20 }
 0xa4a   : > { %v2690_v50 = vpack.c.bf16 %v2682_v46, %v2682_v46 }
 0xa4b   : > { %6440 = vmatmul.mubr.msk.bf16.vlgmr.msra.gmra.mrb[60].mxu1 %vm950_vm3, %v2689_v13  ;;  %v3194_v13 = vsel %vm1446_vm4, %v2197_v43, 0  ;;  %v3337_v43 = vld [vmem:[%s6977_s27 + $0x8] sm:$0xff] }
 0xa4c   : > { %6446 = vmatmul.mubr.msk.bf16.vlgmr.msra.gmra.mrb[64].mxu0 %vm950_vm3, %v2690_v50  ;;  %6450 = vmatpush3.bf16.msra.mxu1 %v2801_v48 }
 0xa4d   : > { %6456 = vmatpush3.bf16.msra.mxu0 %v2851_v52  ;;  %3045 = vrot.lane.b32.xlu1 %v5776_v47, %s6801_s18 }
 0xa4e   : > { %6451 = vmatprep.mubr.msk.bf16.mxu1 %vm6797_vm1, %v6796_v3  ;;  %6461 = vmatprep.subr.bf16.mxu1 %v6796_v3 }
 0xa4f   : > { %6457 = vmatprep.mubr.msk.bf16.mxu0 %vm6797_vm1, %v6796_v3  ;;  %6467 = vmatprep.subr.bf16.mxu0 %v6796_v3 }
 0xa56   : > { %2995 = vrot.lane.b32.xlu0 %v5774_v1, %s6801_s18  ;;  %s7869_s18 = scalar_lea.vmem %s7819_s10, %s6926_s23 }
 0xa90   : > { %v2657_v53 = vpop.xlane.xlu1 %2656 }
 0xa91   : > { %6734 = vrcp.f32 %v2657_v53 }
 0xa94   : > { %v2660_v54 = vpop.xlane.xlu0 %2659  ;;  %v2946_v49 = vpop.permute.xlu1 %2945 }
 0xa95   : > { %6736 = vrcp.f32 %v2660_v54  ;;  %v2951_v51 = vsel %vm1446_vm4, %v2946_v49, 0 }
 0xa98   : > { %v2896_v59 = vpop.permute.xlu0 %2895 }
 0xa99   : > { %v2901_v0 = vsel %vm1446_vm4, %v2896_v59, 0 }
 0xa9b   : > { %v6735_v57 = vpop.eup %6734 }
 0xa9c   : > { %v2683_v58 = vmul.f32 %v6735_v57, %v7376_v7 }
 0xa9e   : > { %v2691_v60 = vpack.c.bf16 %v2683_v58, %v2683_v58 }
 0xa9f   : > { %v6737_v61 = vpop.eup %6736 }
 0xaa0   : > { %v2684_v63 = vmul.f32 %v6737_v61, %v7380_v10  ;;  %6452 = vmatmul.mubr.msk.bf16.vlgmr.msra.gmra.mrb[64].mxu1 %vm950_vm3, %v2691_v60 }
 0xaa1   : > { %6462 = vmatpush3.bf16.msra.mxu1 %v2901_v0  ;;  %6463 = vmatprep.mubr.msk.bf16.mxu1 %vm6797_vm1, %v6796_v3 }
 0xaa2   : > { %v2692_v62 = vpack.c.bf16 %v2684_v63, %v2684_v63  ;;  %6473 = vmatprep.subr.bf16.mxu1 %v6796_v3 }
 0xaa4   : > { %6458 = vmatmul.mubr.msk.bf16.vlgmr.msra.gmra.mrb[68].mxu0 %vm950_vm3, %v2692_v62 }
 0xaa5   : > { %6468 = vmatpush3.bf16.msra.mxu0 %v2951_v51  ;;  %6469 = vmatprep.mubr.msk.bf16.mxu0 %vm6797_vm1, %v6796_v3 }
 0xaa6   : > { %6479 = vmatprep.subr.bf16.mxu0 %v6796_v3 }
 0xac5   : > { %v2663_v2 = vpop.xlane.xlu1 %2662 }
 0xac6   : > { %6738 = vrcp.f32 %v2663_v2 }
 0xac9   : > { %v2669_v44 = vpop.xlane.xlu1 %2668  ;;  %v2666_v4 = vpop.xlane.xlu0 %2665 }
 0xaca   : > { %6740 = vrcp.f32 %v2669_v44 }
 0xacb   : > { %6742 = vrcp.f32 %v2666_v4 }
 0xacd   : > { %v2672_v5 = vpop.xlane.xlu0 %2671  ;;  %v3046_v14 = vpop.permute.xlu1 %3045 }
 0xace   : > { %6744 = vrcp.f32 %v2672_v5  ;;  %v3051_v18 = vsel %vm1446_vm4, %v3046_v14, 0 }
 0xad0   : > { %v6739_v23 = vpop.eup %6738 }
 0xad1   : > { %v2685_v19 = vmul.f32 %v6739_v23, %v7395_v56  ;;  %v2996_v6 = vpop.permute.xlu0 %2995 }
 0xad2   : > { %v3001_v10 = vsel %vm1446_vm4, %v2996_v6, 0 }
 0xad3   : > { %v2693_v7 = vpack.c.bf16 %v2685_v19, %v2685_v19 }
 0xad4   : > { %v6741_v8 = vpop.eup %6740 }
 0xad5   : > { %v6743_v9 = vpop.eup %6742  ;;  %6464 = vmatmul.mubr.msk.bf16.vlgmr.msra.gmra.mrb[68].mxu1 %vm950_vm3, %v2693_v7  ;;  %v2687_v12 = vmul.f32 %v6741_v8, %v7401_v36 }
 0xad6   : > { %v2686_v11 = vmul.f32 %v6743_v9, %v7397_v34  ;;  %6474 = vmatpush3.bf16.msra.mxu1 %v3001_v10  ;;  %6475 = vmatprep.mubr.msk.bf16.mxu1 %vm6797_vm1, %v6796_v3 }
 0xad7   : > { %6485 = vmatprep.subr.bf16.mxu1 %v6796_v3  ;;  %v2695_v21 = vpack.c.bf16 %v2687_v12, %v2687_v12 }
 0xad8   : > { %v2694_v15 = vpack.c.bf16 %v2686_v11, %v2686_v11  ;;  %v6745_v17 = vpop.eup %6744 }
 0xad9   : > { %v2688_v22 = vmul.f32 %v6745_v17, %v7407_v42 }
 0xada   : > { %6470 = vmatmul.mubr.msk.bf16.vlgmr.msra.gmra.mrb[72].mxu0 %vm950_vm3, %v2694_v15 }
 0xadb   : > { %6480 = vmatpush3.bf16.msra.mxu0 %v3051_v18  ;;  %6481 = vmatprep.mubr.msk.bf16.mxu0 %vm6797_vm1, %v6796_v3  ;;  %v2696_v26 = vpack.c.bf16 %v2688_v22, %v2688_v22 }
 0xadc   : > { %6491 = vmatprep.subr.bf16.mxu0 %v6796_v3 }
 0xadd   : > { %6476 = vmatmul.mubr.msk.bf16.vlgmr.msra.gmra.mrb[72].mxu1 %vm950_vm3, %v2695_v21 }
 0xade   : > { %6487 = vmatprep.mubr.msk.bf16.mxu1 %vm6797_vm1, %v6796_v3  ;;  %6486 = vmatpush3.bf16.msra.mxu1 %v3099_v30 }
 0xadf   : > { %6497 = vmatprep.subr.bf16.mxu1 %v6796_v3 }
 0xae2   : > { %6482 = vmatmul.mubr.msk.bf16.vlgmr.msra.gmra.mrb[76].mxu0 %vm950_vm3, %v2696_v26 }
 0xae3   : > { %6492 = vmatpush3.bf16.msra.mxu0 %v3146_v28  ;;  %6493 = vmatprep.mubr.msk.bf16.mxu0 %vm6797_vm1, %v6796_v3 }
 0xae4   : > { %6503 = vmatprep.subr.bf16.mxu0 %v6796_v3 }
 0xb1e   : > { %v2739_v31 = vpop.f32.mrb[60].mxu1 }
 0xb1f   : > { %v2787_v55 = vpop.f32.mrb[64].mxu0  ;;  %v6441_v32 = vpop.f32.mrb[61].mxu1 }
 0xb20   : > { %v3093_v33 = vpack.c.bf16 %v2787_v55, %v2739_v31  ;;  %v6447_v56 = vpop.f32.mrb[65].mxu0  ;;  %v2742_v34 = vpop.f32.mrb[62].mxu1 }
 0xb21   : > { %v2790_v27 = vpop.f32.mrb[66].mxu0  ;;  %v6442_v35 = vpop.f32.mrb[63].mxu1 }
 0xb22   : > { %v6448_v36 = vpop.f32.mrb[67].mxu0  ;;  %6494 = vmatmul.mubr.msk.bf16.vlgmr.msra.gmra.mrb[80].mxu0 %vm950_vm3, %v3093_v33 }
 0xb23   : > { %6505 = vmatprep.mubr.msk.bf16.mxu0 %vm6797_vm1, %v6796_v3  ;;  %6504 = vmatpush3.bf16.msra.mxu0 %v3244_v39 }
 0xb73   : > { %v2837_v40 = vpop.f32.mrb[64].mxu1 }
 0xb74   : > { %v6453_v41 = vpop.f32.mrb[65].mxu1 }
 0xb75   : > { %v2840_v42 = vpop.f32.mrb[66].mxu1  ;;  %v3336_v41 = vld [vmem:[%s6977_s27] sm:$0xff] }
 0xb76   : > { %v6454_v45 = vpop.f32.mrb[67].mxu1  ;;  %v3338_v42 = vld [vmem:[%s6977_s27 + $0x40] sm:$0xff] }
 0xb77   : > { %v2887_v16 = vpop.f32.mrb[68].mxu0  ;;  %v5785_v45 = vcombine.high %v3336_v41, %v3338_v42 }
 0xb78   : > { %v3094_v20 = vpack.c.bf16 %v2887_v16, %v2837_v40  ;;  %v6459_v46 = vpop.f32.mrb[69].mxu0  ;;  %v3339_v16 = vld [vmem:[%s6977_s27 + $0x48] sm:$0xff] }
 0xb79   : > { %v2890_v50 = vpop.f32.mrb[70].mxu0  ;;  %v5786_v46 = vcombine.low %v3337_v43, %v3339_v16 }
 0xb7a   : > { %v6460_v47 = vpop.f32.mrb[71].mxu0  ;;  %6488 = vmatmul.mubr.msk.bf16.vlgmr.msra.gmra.mrb[76].mxu1 %vm950_vm3, %v3094_v20  ;;  %v5784_v20 = vcombine.low %v3336_v41, %v3338_v42  ;;  %v3340_v50 = vld [vmem:[%s6977_s27 + $0x80] sm:$0xff]  ;;  %v6564_v41 = vld [vmem:[%s6983_s30 + $0x118] sm:$0xff]  }
 0xb7b   : > { %6498 = vmatpush3.bf16.msra.mxu1 %v3194_v13  ;;  %6499 = vmatprep.mubr.msk.bf16.mxu1 %vm6797_vm1, %v6796_v3  ;;  %v5787_v13 = vcombine.high %v3337_v43, %v3339_v16  ;;  %v3342_v47 = vld [vmem:[%s6977_s27 + $0xc0] sm:$0xff]  ;;  %v6565_v42 = vld [vmem:[%s6983_s30 + $0x198] sm:$0xff]  }
 0xb7c   : > { %3409 = vmatprep.subr.bf16.mxu1 %v5785_v45  ;;  %v6566_v43 = vld [vmem:[%s6983_s30 + $0x160] sm:$0xff]  }
 0xb7d   : > { %3452 = vmatprep.subr.bf16.mxu0 %v5787_v13  ;;  %v6567_v45 = vld [vmem:[%s6983_s30 + $0x1e0] sm:$0xff]   ;;  %v6571_v13 = vld [vmem:[%s6983_s30 + $0x1e8] sm:$0xff]  }
 0xb7e   : > { %v6568_v16 = vld [vmem:[%s6983_s30 + $0x120] sm:$0xff]  }
 0xba8   : > { %v2937_v48 = vpop.f32.mrb[68].mxu1 }
 0xba9   : > { %v6465_v52 = vpop.f32.mrb[69].mxu1 }
 0xbaa   : > { %v2940_v1 = vpop.f32.mrb[70].mxu1  ;;  %v5789_v52 = vcombine.high %v3340_v50, %v3342_v47 }
 0xbab   : > { %v6466_v53 = vpop.f32.mrb[71].mxu1  ;;  %v3343_v1 = vld [vmem:[%s6977_s27 + $0xc8] sm:$0xff] }
 0xbac   : > { %v5788_v53 = vcombine.low %v3340_v50, %v3342_v47  ;;  %v6572_v50 = vld [vmem:[%s6983_s30 + $0x128] sm:$0xff]  }
 0xbad   : > { %v2987_v54 = vpop.f32.mrb[72].mxu0  ;;  %v6573_v47 = vld [vmem:[%s6983_s30 + $0x1a8] sm:$0xff]  }
 0xbae   : > { %v3189_v57 = vpack.c.bf16 %v2987_v54, %v2937_v48  ;;  %v6471_v58 = vpop.f32.mrb[73].mxu0  ;;  %v3341_v48 = vld [vmem:[%s6977_s27 + $0x88] sm:$0xff] }
 0xbaf   : > { %v2990_v59 = vpop.f32.mrb[74].mxu0  ;;  %v5790_v54 = vcombine.low %v3341_v48, %v3343_v1  ;;  %v3571_v58 = vld [vmem:[%s6977_s27 + $0x10] sm:$0xff] }
 0xbb0   : > { %v6472_v60 = vpop.f32.mrb[75].mxu0  ;;  %6500 = vmatmul.mubr.msk.bf16.vlgmr.msra.gmra.mrb[80].mxu1 %vm950_vm3, %v3189_v57  ;;  %v3037_v61 = vpop.f32.mrb[72].mxu1  ;;  %v5791_v57 = vcombine.high %v3341_v48, %v3343_v1  ;;  %v3573_v59 = vld [vmem:[%s6977_s27 + $0x50] sm:$0xff] }
 0xbb1   : > { %v6477_v63 = vpop.f32.mrb[73].mxu1  ;;  %3410 = vmatpush1.bf16.msra.mxu1 %v5784_v20  ;;  %v3572_v60 = vld [vmem:[%s6977_s27 + $0x18] sm:$0xff]  ;;  %v6569_v20 = vld [vmem:[%s6983_s30 + $0x1a0] sm:$0xff]   ;;  %v6574_v48 = vld [vmem:[%s6983_s30 + $0x170] sm:$0xff]  }
 0xbb2   : > { %v3040_v0 = vpop.f32.mrb[74].mxu1  ;;  %3411 = vmatprep.subr.bf16.mxu1 %v5789_v52  ;;  %v5795_v63 = vcombine.high %v3571_v58, %v3573_v59  ;;  %v6575_v52 = vld [vmem:[%s6983_s30 + $0x1f0] sm:$0xff]  }
 0xbb3   : > { %v6478_v49 = vpop.f32.mrb[75].mxu1  ;;  %v3574_v0 = vld [vmem:[%s6977_s27 + $0x58] sm:$0xff]  ;;  %v6576_v1 = vld [vmem:[%s6983_s30 + $0x130] sm:$0xff]  }
 0xbb4   : > { %v5794_v49 = vcombine.low %v3571_v58, %v3573_v59  ;;  %v6580_v58 = vld [vmem:[%s6983_s30 + $0x138] sm:$0xff]  }
 0xbb5   : > { %v3087_v62 = vpop.f32.mrb[76].mxu0  ;;  %3412 = vmatpush1.bf16.msra.mxu1 %v5788_v53  ;;  %v6577_v53 = vld [vmem:[%s6983_s30 + $0x1b0] sm:$0xff]   ;;  %v6581_v59 = vld [vmem:[%s6983_s30 + $0x1b8] sm:$0xff]  }
 0xbb6   : > { %v3239_v51 = vpack.c.bf16 %v3087_v62, %v3037_v61  ;;  %v6483_v2 = vpop.f32.mrb[77].mxu0  ;;  %v6803_v61 = vmov 0   ;;  %v5796_v62 = vcombine.low %v3572_v60, %v3574_v0  ;;  %3641 = vmatprep.subr.bf16.mxu1 %v5795_v63  ;;  %v6583_v63 = vld [vmem:[%s6983_s30 + $0xc0] sm:$0xff]  }
 0xbb7   : > { %v3090_v44 = vpop.f32.mrb[78].mxu0  ;;  %3441 = vmatprep.mubr.bf16.mxu1 %v6803_v61 }
 0xbb8   : > { %v6484_v3 = vpop.f32.mrb[79].mxu0  ;;  %6506 = vmatmul.mubr.msk.bf16.vlgmr.msra.gmra.mrb[84].mxu0 %vm950_vm3, %v3239_v51  ;;  %v5797_v51 = vcombine.high %v3572_v60, %v3574_v0  ;;  %v6582_v60 = vld [vmem:[%s6983_s30 + $0x40] sm:$0xff]   ;;  %v3346_v0 = vlaneseq }
 0xbb9   : > { %3453 = vmatpush1.bf16.msra.mxu0 %v5786_v46  ;;  %3484 = vmatprep.mubr.bf16.mxu0 %v6803_v61  ;;  %v6570_v46 = vld [vmem:[%s6983_s30 + $0x168] sm:$0xff]  }
 0xbba   : > { %3454 = vmatprep.subr.bf16.mxu0 %v5791_v57  ;;  %v6579_v57 = vld [vmem:[%s6983_s30 + $0x1f8] sm:$0xff]  }
 0xbbd   : > { %3455 = vmatpush1.bf16.msra.mxu0 %v5790_v54  ;;  %v6578_v54 = vld [vmem:[%s6983_s30 + $0x178] sm:$0xff]  }
 0xbbe   : > { %3684 = vmatprep.subr.bf16.mxu0 %v5797_v51 }
 0xbf5   : > { %v3182_v4 = vpop.f32.mrb[80].mxu0 }
 0xbf6   : > { %v6495_v5 = vpop.f32.mrb[81].mxu0 }
 0xbf7   : > { %v3185_v23 = vpop.f32.mrb[82].mxu0 }
 0xbf8   : > { %v6496_v19 = vpop.f32.mrb[83].mxu0 }
 0xc4d   : > { %v3135_v6 = vpop.f32.mrb[76].mxu1 }
 0xc4e   : > { %v3183_v7 = vadd.f32 %v3182_v4, %v3135_v6  ;;  %v6489_v8 = vpop.f32.mrb[77].mxu1 }
 0xc4f   : > { %v3138_v9 = vpop.f32.mrb[78].mxu1 }
 0xc50   : > { %v3186_v10 = vadd.f32 %v3185_v23, %v3138_v9  ;;  %v6490_v11 = vpop.f32.mrb[79].mxu1 }
 0xc51   : > { %v5783_v11 = vld [vmem:[%s7870_s28] ss:$0 sm:$0xff] }
 0xc83   : > { %v3230_v12 = vpop.f32.mrb[80].mxu1 }
 0xc84   : > { %v3237_v14 = vadd.f32 %v3230_v12, %v3183_v7  ;;  %v6501_v15 = vpop.f32.mrb[81].mxu1  ;;  %v5782_v7 = vld [vmem:[%s7869_s18] ss:$0 sm:$0xff] }
 0xc85   : > { %v3233_v17 = vpop.f32.mrb[82].mxu1  ;;  %v3577_v15 = vld [vmem:[%s6977_s27 + $0xd0] sm:$0xff] }
 0xc86   : > { %v3238_v18 = vadd.f32 %v3233_v17, %v3186_v10  ;;  %v6502_v21 = vpop.f32.mrb[83].mxu1  ;;  %v3576_v17 = vld [vmem:[%s6977_s27 + $0x98] sm:$0xff] }
 0xc8b   : > { %v3280_v22 = vpop.f32.mrb[84].mxu0 }
 0xc8c   : > { %v3287_v25 = vadd.f32 %v3280_v22, %v3237_v14  ;;  %v6507_v26 = vpop.f32.mrb[85].mxu0  ;;  %v3575_v14 = vld [vmem:[%s6977_s27 + $0x90] sm:$0xff] }
 0xc8d   : > { %v3283_v28 = vpop.f32.mrb[86].mxu0  ;;  %v5799_v26 = vcombine.high %v3575_v14, %v3577_v15 }
 0xc8e   : > { %v3288_v29 = vadd.f32 %v3283_v28, %v3238_v18  ;;  %v6508_v30 = vpop.f32.mrb[87].mxu0  ;;  %v3291_v31 = vadd.f32 %v3287_v25, %v7255_v38  ;;  %v3578_v18 = vld [vmem:[%s6977_s27 + $0xd8] sm:$0xff] }
 0xc8f   : > { %v5801_v28 = vcombine.high %v3576_v17, %v3578_v18  ;;  %v5800_v30 = vcombine.low %v3576_v17, %v3578_v18 }
 0xc90   : > { %v3293_v55 = vsel %vm881_vm2, %v3291_v31, 0.0  ;;  %v3292_v32 = vadd.f32 %v3288_v29, %v7257_v24  ;;  %v5798_v29 = vcombine.low %v3575_v14, %v3577_v15 }
 0xc91   : > { %3294 = vadd.xlane.f32.xlu0 %v3293_v55  ;;  %v6551_v55 = vld [vmem:[%s6983_s30 + $0x1c0] sm:$0xff]  }
 0xc92   : > { %v3296_v33 = vsel %vm881_vm2, %v3292_v32, 0.0 }
 0xc93   : > { %3297 = vadd.xlane.f32.xlu1 %v3296_v33  ;;  %v6553_v33 = vld [vmem:[%s6983_s30 + $0x180] sm:$0xff]  }
 0xd1e   : > { %v3295_v56 = vpop.xlane.xlu0 %3294 }
 0xd1f   : > { %v3299_v34 = vmul.f32 0.03125, %v3295_v56  ;;  %v6554_v56 = vld [vmem:[%s6983_s30 + $0x148] sm:$0xff]  }
 0xd20   : > { %v3298_v27 = vpop.xlane.xlu1 %3297 }
 0xd21   : > { %v3301_v35 = vsub.f32 %v3291_v31, %v3299_v34  ;;  %v3300_v36 = vmul.f32 0.03125, %v3298_v27  ;;  %v6550_v31 = vld [vmem:[%s6983_s30 + $0x140] sm:$0xff]   ;;  %v6555_v34 = vld [vmem:[%s6983_s30 + $0x1c8] sm:$0xff]  }
 0xd22   : > { %v6556_v27 = vld [vmem:[%s6983_s30 + $0x108] sm:$0xff]  }
 0xd23   : > { %v3302_v37 = vsub.f32 %v3292_v32, %v3300_v36  ;;  %v3303_v39 = vmul.f32 %v3301_v35, %v3301_v35  ;;  %v6552_v32 = vld [vmem:[%s6983_s30 + $0x100] sm:$0xff]   ;;  %v6558_v36 = vld [vmem:[%s6983_s30 + $0x150] sm:$0xff]  }
 0xd25   : > { %v3305_v38 = vsel %vm881_vm2, %v3303_v39, 0.0  ;;  %v3304_v40 = vmul.f32 %v3302_v37, %v3302_v37  ;;  %v6560_v39 = vld [vmem:[%s6983_s30 + $0x110] sm:$0xff]  }
 0xd26   : > { %3306 = vadd.xlane.f32.xlu0 %v3305_v38  ;;  %v6561_v38 = vld [vmem:[%s6983_s30 + $0x190] sm:$0xff]  }
 0xd27   : > { %v3308_v24 = vsel %vm881_vm2, %v3304_v40, 0.0  ;;  %v6562_v40 = vld [vmem:[%s6983_s30 + $0x158] sm:$0xff]  }
 0xd2a   : > { %3309 = vadd.xlane.f32.xlu0 %v3308_v24  ;;  %v6563_v24 = vld [vmem:[%s6983_s30 + $0x1d8] sm:$0xff]  }
 0xdb3   : > { %v3307_v2 = vpop.xlane.xlu0 %3306 }
 0xdb4   : > { %v3311_v44 = vmul.f32 0.03125, %v3307_v2  ;;  %v3344_v2 = vld [vmem:[%s6972_s3] sm:$0xf] }
 0xdb6   : > { %v3313_v3 = vadd.f32 1e-05, %v3311_v44 }
 0xdb7   : > { %v3310_v4 = vpop.xlane.xlu0 %3309 }
 0xdb8   : > { %6746 = vrsqrt.f32 %v3313_v3  ;;  %v3312_v5 = vmul.f32 0.03125, %v3310_v4 }
 0xdba   : > { %v3314_v23 = vadd.f32 1e-05, %v3312_v5 }
 0xdbc   : > { %6748 = vrsqrt.f32 %v3314_v23 }
 0xdc2   : > { %v6747_v19 = vpop.eup %6746 }
 0xdc3   : > { %v3317_v6 = vmul.f32 %v6747_v19, %v3301_v35  ;;  %v6557_v35 = vld [vmem:[%s6983_s30 + $0x188] sm:$0xff]  }
 0xdc5   : > { %v3325_v9 = vmul.f32 %v5782_v7, %v3317_v6 }
 0xdc6   : > { %v6749_v8 = vpop.eup %6748 }
 0xdc7   : > { %v3318_v10 = vmul.f32 %v6749_v8, %v3302_v37  ;;  %v7513_v21 = vadd.f32 %v5783_v11, %v3325_v9  ;;  %v6559_v37 = vld [vmem:[%s6983_s30 + $0x1d0] sm:$0xff]   ;;  %v3579_v8 = vld [vmem:[%s6972_s3 + $0x4] sm:$0xf] }
 0xdc9   : > { %v3326_v12 = vmul.f32 %v5782_v7, %v3318_v10 }
 0xdcb   : > { %v7515_v22 = vadd.f32 %v5783_v11, %v3326_v12 }
 0xdcd   : > { %v7519_v25 = vpack.c.bf16 %v7515_v22, %v7513_v21 }
 0xdcf   : > { %5792 = vmatmul.mubr.msk.bf16.vlgmr.msra.gmra.mrb[84].mxu1 %vm881_vm2, %v7519_v25  ;;  %5793 = vmatmul.mubr.msk.bf16.vlgmr.msra.gmra.mrb[88].mxu0 %vm881_vm2, %v7519_v25 }
 0xdd0   : > { %3642 = vmatpush1.bf16.msra.mxu1 %v5794_v49  ;;  %3685 = vmatpush1.bf16.msra.mxu0 %v5796_v62  ;;  %v3347_v49 = vshrl.u32 %v3346_v0, 7 }
 0xdd1   : > { %3643 = vmatprep.subr.bf16.mxu1 %v5799_v26  ;;  %3686 = vmatprep.subr.bf16.mxu0 %v5801_v28 }
 0xdd2   : > { %3673 = vmatprep.mubr.bf16.mxu1 %v6803_v61  ;;  %3716 = vmatprep.mubr.bf16.mxu0 %v6803_v61  ;;  %v7565_v62 = vsub.s32 0, %v3347_v49  ;;  %v7567_v51 = vsub.s32 2, %v3347_v49  ;;  %v7570_v44 = vsub.s32 1, %v3347_v49  ;;  %v7572_v3 = vsub.s32 3, %v3347_v49 }
 0xdd4   : > { %3644 = vmatpush1.bf16.msra.mxu1 %v5798_v29  ;;  %3687 = vmatpush1.bf16.msra.mxu0 %v5800_v30  ;;  %v3349_v4 = vrot.slane %v3344_v2, %v7565_v62  ;;  %v3357_v5 = vrot.slane %v3344_v2, %v7567_v51  ;;  %v3353_v23 = vrot.slane %v3344_v2, %v7570_v44 }
 0xdd5   : > { %6066 = vmatprep.subr.bf16.mxu1 %v6550_v31  ;;  %6088 = vmatprep.subr.bf16.mxu0 %v6551_v55  ;;  %v3361_v19 = vrot.slane %v3344_v2, %v7572_v3  ;;  %v3584_v31 = vrot.slane %v3579_v8, %v7565_v62  ;;  %v3592_v55 = vrot.slane %v3579_v8, %v7567_v51 }
 0xdd7   : > { %5802 = vmatmul.mubr.msk.bf16.vlgmr.msra.gmra.mrb[88].mxu1 %vm881_vm2, %v7519_v25  ;;  %5803 = vmatmul.mubr.msk.bf16.vlgmr.msra.gmra.mrb[92].mxu0 %vm881_vm2, %v7519_v25 }
 0xdd8   : > { %6067 = vmatpush3.bf16.msra.mxu1 %v6552_v32  ;;  %6089 = vmatpush3.bf16.msra.mxu0 %v6553_v33 }
 0xdd9   : > { %6068 = vmatprep.subr.bf16.mxu1 %v6554_v56  ;;  %6090 = vmatprep.subr.bf16.mxu0 %v6555_v34  ;;  %v3588_v56 = vrot.slane %v3579_v8, %v7570_v44  ;;  %v3596_v34 = vrot.slane %v3579_v8, %v7572_v3 }
 0xddc   : > { %6069 = vmatpush3.bf16.msra.mxu1 %v6556_v27  ;;  %6091 = vmatpush3.bf16.msra.mxu0 %v6557_v35 }
 0xddd   : > { %6070 = vmatprep.subr.bf16.mxu1 %v6558_v36  ;;  %6092 = vmatprep.subr.bf16.mxu0 %v6559_v37 }
 0xde0   : > { %6071 = vmatpush3.bf16.msra.mxu1 %v6560_v39  ;;  %6093 = vmatpush3.bf16.msra.mxu0 %v6561_v38 }
 0xde1   : > { %6072 = vmatprep.subr.bf16.mxu1 %v6562_v40  ;;  %6094 = vmatprep.subr.bf16.mxu0 %v6563_v24 }
 0xde4   : > { %6073 = vmatpush3.bf16.msra.mxu1 %v6564_v41  ;;  %6095 = vmatpush3.bf16.msra.mxu0 %v6565_v42 }
 0xde5   : > { %6074 = vmatprep.subr.bf16.mxu1 %v6566_v43  ;;  %6096 = vmatprep.subr.bf16.mxu0 %v6567_v45 }
 0xde8   : > { %6075 = vmatpush3.bf16.msra.mxu1 %v6568_v16  ;;  %6097 = vmatpush3.bf16.msra.mxu0 %v6569_v20 }
 0xde9   : > { %6076 = vmatprep.subr.bf16.mxu1 %v6570_v46  ;;  %6098 = vmatprep.subr.bf16.mxu0 %v6571_v13 }
 0xdec   : > { %6077 = vmatpush3.bf16.msra.mxu1 %v6572_v50  ;;  %6099 = vmatpush3.bf16.msra.mxu0 %v6573_v47 }
 0xded   : > { %6078 = vmatprep.subr.bf16.mxu1 %v6574_v48  ;;  %6100 = vmatprep.subr.bf16.mxu0 %v6575_v52 }
 0xdf0   : > { %6079 = vmatpush3.bf16.msra.mxu1 %v6576_v1  ;;  %6101 = vmatpush3.bf16.msra.mxu0 %v6577_v53 }
 0xdf1   : > { %6080 = vmatprep.subr.bf16.mxu1 %v6578_v54  ;;  %6102 = vmatprep.subr.bf16.mxu0 %v6579_v57 }
 0xdf4   : > { %6081 = vmatpush3.bf16.msra.mxu1 %v6580_v58  ;;  %6103 = vmatpush3.bf16.msra.mxu0 %v6581_v59 }
 0xdf5   : > { %6110 = vmatprep.subr.bf16.mxu1 %v6582_v60  ;;  %6132 = vmatprep.subr.bf16.mxu0 %v6583_v63 }
 0xea2   : > { %v3443_v6 = vpop.f32.mrb[84].mxu1  ;;  %v3486_v7 = vpop.f32.mrb[88].mxu0 }
 0xea3   : > { %v3444_v9 = vadd.f32 %v3443_v6, %v3349_v4  ;;  %v3487_v10 = vadd.f32 %v3486_v7, %v3357_v5  ;;  %v3445_v11 = vpop.f32.mrb[85].mxu1  ;;  %v3488_v12 = vpop.f32.mrb[89].mxu0 }
 0xea4   : > { %v3446_v14 = vadd.f32 %v3445_v11, %v3353_v23  ;;  %v3489_v15 = vadd.f32 %v3488_v12, %v3361_v19  ;;  %v3447_v17 = vpop.f32.mrb[86].mxu1  ;;  %v3490_v18 = vpop.f32.mrb[90].mxu0  ;;  %v6584_v11 = vld [vmem:[%s6983_s30] sm:$0xff]  }
 0xea5   : > { %v3448_v26 = vadd.f32 %v3447_v17, %v3349_v4  ;;  %v3491_v28 = vadd.f32 %v3490_v18, %v3357_v5  ;;  %v3449_v29 = vpop.f32.mrb[87].mxu1  ;;  %v3492_v30 = vpop.f32.mrb[91].mxu0  ;;  %v3495_v27 = vmax.f32 %v3444_v9, 0.0  ;;  %v3497_v35 = vmax.f32 %v3487_v10, 0.0  ;;  %v6585_v12 = vld [vmem:[%s6983_s30 + $0x80] sm:$0xff]   ;;  %v6588_v17 = vld [vmem:[%s6983_s30 + $0x8] sm:$0xff]  }
 0xea6   : > { %v3450_v32 = vadd.f32 %v3449_v29, %v3353_v23  ;;  %v3493_v33 = vadd.f32 %v3492_v30, %v3361_v19  ;;  %v3496_v39 = vmax.f32 %v3446_v14, 0.0  ;;  %v3498_v38 = vmax.f32 %v3489_v15, 0.0  ;;  %v6586_v14 = vld [vmem:[%s6983_s30 + $0x48] sm:$0xff]   ;;  %v6592_v29 = vld [vmem:[%s6983_s30 + $0x10] sm:$0xff]  }
 0xea7   : > { %v3499_v36 = vmax.f32 %v3448_v26, 0.0  ;;  %v3501_v37 = vmax.f32 %v3491_v28, 0.0  ;;  %v6587_v15 = vld [vmem:[%s6983_s30 + $0xc8] sm:$0xff]   ;;  %v6590_v26 = vld [vmem:[%s6983_s30 + $0x50] sm:$0xff]  }
 0xea8   : > { %v3500_v40 = vmax.f32 %v3450_v32, 0.0  ;;  %v3502_v24 = vmax.f32 %v3493_v33, 0.0  ;;  %v6589_v18 = vld [vmem:[%s6983_s30 + $0x88] sm:$0xff]   ;;  %v6591_v28 = vld [vmem:[%s6983_s30 + $0xd0] sm:$0xff]   ;;  %v6596_v32 = vld [vmem:[%s6983_s30 + $0x18] sm:$0xff]  }
 0xea9   : > { %v7583_v41 = vpack.c.bf16 %v3499_v36, %v3495_v27  ;;  %v7585_v42 = vpack.c.bf16 %v3501_v37, %v3497_v35  ;;  %v6593_v30 = vld [vmem:[%s6983_s30 + $0x90] sm:$0xff]   ;;  %v6597_v33 = vld [vmem:[%s6983_s30 + $0x98] sm:$0xff]   ;;  %v6600_v27 = vld [vmem:[%s6983_s30 + $0x20] sm:$0xff]  }
 0xeaa   : > { %v3568_v43 = vpack.c.bf16 %v3500_v40, %v3496_v39  ;;  %v3570_v45 = vpack.c.bf16 %v3502_v24, %v3498_v38  ;;  %v3675_v16 = vpop.f32.mrb[88].mxu1  ;;  %v3718_v20 = vpop.f32.mrb[92].mxu0  ;;  %v6601_v35 = vld [vmem:[%s6983_s30 + $0xa0] sm:$0xff]   ;;  %v6602_v36 = vld [vmem:[%s6983_s30 + $0x68] sm:$0xff]   ;;  %v6606_v40 = vld [vmem:[%s6983_s30 + $0x70] sm:$0xff]  }
 0xeab   : > { %v3676_v46 = vadd.f32 %v3675_v16, %v3584_v31  ;;  %v3719_v13 = vadd.f32 %v3718_v20, %v3592_v55  ;;  %v3677_v50 = vpop.f32.mrb[89].mxu1  ;;  %v3720_v47 = vpop.f32.mrb[93].mxu0  ;;  %v6603_v37 = vld [vmem:[%s6983_s30 + $0xe8] sm:$0xff]   ;;  %v6607_v24 = vld [vmem:[%s6983_s30 + $0xf0] sm:$0xff]   ;;  %v6610_v16 = vld [vmem:[%s6983_s30 + $0x78] sm:$0xff]  }
 0xeac   : > { %v3678_v48 = vadd.f32 %v3677_v50, %v3588_v56  ;;  %v3721_v52 = vadd.f32 %v3720_v47, %v3596_v34  ;;  %v3679_v1 = vpop.f32.mrb[90].mxu1  ;;  %v3722_v53 = vpop.f32.mrb[94].mxu0  ;;  %v6604_v39 = vld [vmem:[%s6983_s30 + $0x28] sm:$0xff]   ;;  %v6611_v20 = vld [vmem:[%s6983_s30 + $0xf8] sm:$0xff]  }
 0xead   : > { %v3680_v54 = vadd.f32 %v3679_v1, %v3584_v31  ;;  %v3723_v57 = vadd.f32 %v3722_v53, %v3592_v55  ;;  %v3681_v58 = vpop.f32.mrb[91].mxu1  ;;  %v3724_v59 = vpop.f32.mrb[95].mxu0  ;;  %v3727_v0 = vmax.f32 %v3676_v46, 0.0  ;;  %v3729_v49 = vmax.f32 %v3719_v13, 0.0  ;;  %v6594_v31 = vld [vmem:[%s6983_s30 + $0x58] sm:$0xff]   ;;  %v6605_v38 = vld [vmem:[%s6983_s30 + $0xa8] sm:$0xff]  }
 0xeae   : > { %v3682_v60 = vadd.f32 %v3681_v58, %v3588_v56  ;;  %v3725_v63 = vadd.f32 %v3724_v59, %v3596_v34  ;;  %v3728_v5 = vmax.f32 %v3678_v48, 0.0  ;;  %v3730_v23 = vmax.f32 %v3721_v52, 0.0  ;;  %v6595_v55 = vld [vmem:[%s6983_s30 + $0xd8] sm:$0xff]   ;;  %v6598_v56 = vld [vmem:[%s6983_s30 + $0x60] sm:$0xff]   ;;  %v4352_v50 = vld [vmem:[%s6977_s27 + $0x28] sm:$0xff] }
 0xeaf   : > { %v3731_v2 = vmax.f32 %v3680_v54, 0.0  ;;  %v3733_v4 = vmax.f32 %v3723_v57, 0.0  ;;  %v6599_v34 = vld [vmem:[%s6983_s30 + $0xe0] sm:$0xff]   ;;  %v4354_v47 = vld [vmem:[%s6977_s27 + $0x68] sm:$0xff]  ;;  %v6612_v48 = vld [vmem:[%s6983_s30 + $0x38] sm:$0xff]  }
 0xeb0   : > { %v3732_v19 = vmax.f32 %v3682_v60, 0.0  ;;  %v3734_v6 = vmax.f32 %v3725_v63, 0.0  ;;  %v4351_v46 = vld [vmem:[%s6977_s27 + $0x20] sm:$0xff]  ;;  %v6613_v52 = vld [vmem:[%s6983_s30 + $0xb8] sm:$0xff]   ;;  %v5871_v53 = vcombine.high %v4352_v50, %v4354_v47  ;;  %v4356_v58 = vld [vmem:[%s6977_s27 + $0xa8] sm:$0xff]  ;;  %v5870_v63 = vcombine.low %v4352_v50, %v4354_v47 }
 0xeb1   : > { %v3799_v7 = vpack.c.bf16 %v3731_v2, %v3727_v0  ;;  %v3801_v8 = vpack.c.bf16 %v3733_v4, %v3729_v49  ;;  %v4353_v13 = vld [vmem:[%s6977_s27 + $0x60] sm:$0xff]  ;;  %v4358_v59 = vld [vmem:[%s6977_s27 + $0xe8] sm:$0xff] }
 0xeb2   : > { %v3800_v9 = vpack.c.bf16 %v3732_v19, %v3728_v5  ;;  %v3802_v10 = vpack.c.bf16 %v3734_v6, %v3730_v23  ;;  %v5869_v1 = vcombine.high %v4351_v46, %v4353_v13  ;;  %v4355_v54 = vld [vmem:[%s6977_s27 + $0xa0] sm:$0xff]  ;;  %v5868_v60 = vcombine.low %v4351_v46, %v4353_v13  ;;  %v6618_v19 = vld [vmem:[%s6983_s30 + $0x248] sm:$0xff]  }
 0xeb3   : > { %v4357_v57 = vld [vmem:[%s6977_s27 + $0xe0] sm:$0xff]  ;;  %v5875_v49 = vcombine.high %v4356_v58, %v4358_v59  ;;  %v5874_v4 = vcombine.low %v4356_v58, %v4358_v59  ;;  %v6619_v6 = vld [vmem:[%s6983_s30 + $0x2c8] sm:$0xff]  }
 0xeb4   : > { %4027 = vmatprep.mubr.bf16.mxu1 %v3800_v9  ;;  %4068 = vmatprep.mubr.bf16.mxu0 %v3802_v10  ;;  %v5873_v0 = vcombine.high %v4355_v54, %v4357_v57  ;;  %v5872_v2 = vcombine.low %v4355_v54, %v4357_v57  ;;  %v6616_v5 = vld [vmem:[%s6983_s30 + $0x200] sm:$0xff]   ;;  %v6622_v9 = vld [vmem:[%s6983_s30 + $0x250] sm:$0xff]  }
 0xeb5   : > { %4028 = vmatmul.mubr.bf16.vlgmr.msra.gmra.mrb[92].mxu1 %v3799_v7  ;;  %4069 = vmatmul.mubr.bf16.vlgmr.msra.gmra.mrb[96].mxu0 %v3801_v8  ;;  %v6617_v23 = vld [vmem:[%s6983_s30 + $0x280] sm:$0xff]   ;;  %v6620_v7 = vld [vmem:[%s6983_s30 + $0x208] sm:$0xff]   ;;  %v6623_v10 = vld [vmem:[%s6983_s30 + $0x2d0] sm:$0xff]  }
 0xeb6   : > { %6111 = vmatpush3.bf16.msra.mxu1 %v6584_v11  ;;  %6133 = vmatpush3.bf16.msra.mxu0 %v6585_v12  ;;  %v6621_v8 = vld [vmem:[%s6983_s30 + $0x288] sm:$0xff]   ;;  %v6624_v11 = vld [vmem:[%s6983_s30 + $0x210] sm:$0xff]  }
 0xeb7   : > { %4301 = vmatprep.mubr.bf16.mxu1 %v3568_v43  ;;  %4342 = vmatprep.mubr.bf16.mxu0 %v3570_v45  ;;  %v6608_v43 = vld [vmem:[%s6983_s30 + $0x30] sm:$0xff]  }
 0xeb8   : > { %6112 = vmatprep.subr.bf16.mxu1 %v6586_v14  ;;  %6134 = vmatprep.subr.bf16.mxu0 %v6587_v15  ;;  %v6609_v45 = vld [vmem:[%s6983_s30 + $0xb0] sm:$0xff]   ;;  %v6626_v14 = vld [vmem:[%s6983_s30 + $0x258] sm:$0xff]  }
 0xeb9   : > { %v6625_v12 = vld [vmem:[%s6983_s30 + $0x290] sm:$0xff]   ;;  %v6627_v15 = vld [vmem:[%s6983_s30 + $0x2d8] sm:$0xff]  }
 0xeba   : > { %6113 = vmatpush3.bf16.msra.mxu1 %v6588_v17  ;;  %6135 = vmatpush3.bf16.msra.mxu0 %v6589_v18  ;;  %v6628_v17 = vld [vmem:[%s6983_s30 + $0x218] sm:$0xff]  }
 0xebb   : > { %6114 = vmatprep.subr.bf16.mxu1 %v6590_v26  ;;  %6136 = vmatprep.subr.bf16.mxu0 %v6591_v28  ;;  %v6629_v18 = vld [vmem:[%s6983_s30 + $0x298] sm:$0xff]   ;;  %v6630_v26 = vld [vmem:[%s6983_s30 + $0x260] sm:$0xff]  }
 0xebc   : > { %v6631_v28 = vld [vmem:[%s6983_s30 + $0x2e0] sm:$0xff]  }
 0xebe   : > { %6115 = vmatpush3.bf16.msra.mxu1 %v6592_v29  ;;  %6137 = vmatpush3.bf16.msra.mxu0 %v6593_v30  ;;  %v6632_v29 = vld [vmem:[%s6983_s30 + $0x220] sm:$0xff]  }
 0xebf   : > { %6116 = vmatprep.subr.bf16.mxu1 %v6594_v31  ;;  %6138 = vmatprep.subr.bf16.mxu0 %v6595_v55  ;;  %v6633_v30 = vld [vmem:[%s6983_s30 + $0x2a0] sm:$0xff]   ;;  %v6634_v31 = vld [vmem:[%s6983_s30 + $0x268] sm:$0xff]  }
 0xec0   : > { %v6635_v55 = vld [vmem:[%s6983_s30 + $0x2e8] sm:$0xff]  }
 0xec2   : > { %6117 = vmatpush3.bf16.msra.mxu1 %v6596_v32  ;;  %6139 = vmatpush3.bf16.msra.mxu0 %v6597_v33  ;;  %v6636_v32 = vld [vmem:[%s6983_s30 + $0x228] sm:$0xff]  }
 0xec3   : > { %6118 = vmatprep.subr.bf16.mxu1 %v6598_v56  ;;  %6140 = vmatprep.subr.bf16.mxu0 %v6599_v34  ;;  %v6637_v33 = vld [vmem:[%s6983_s30 + $0x2a8] sm:$0xff]   ;;  %v6638_v56 = vld [vmem:[%s6983_s30 + $0x270] sm:$0xff]  }
 0xec4   : > { %v6639_v34 = vld [vmem:[%s6983_s30 + $0x2f0] sm:$0xff]  }
 0xec6   : > { %6119 = vmatpush3.bf16.msra.mxu1 %v6600_v27  ;;  %6141 = vmatpush3.bf16.msra.mxu0 %v6601_v35  ;;  %v6640_v27 = vld [vmem:[%s6983_s30 + $0x230] sm:$0xff]  }
 0xec7   : > { %6120 = vmatprep.subr.bf16.mxu1 %v6602_v36  ;;  %6142 = vmatprep.subr.bf16.mxu0 %v6603_v37  ;;  %v6641_v35 = vld [vmem:[%s6983_s30 + $0x2b0] sm:$0xff]   ;;  %v6642_v36 = vld [vmem:[%s6983_s30 + $0x278] sm:$0xff]  }
 0xec8   : > { %v6643_v37 = vld [vmem:[%s6983_s30 + $0x2f8] sm:$0xff]  }
 0xeca   : > { %6121 = vmatpush3.bf16.msra.mxu1 %v6604_v39  ;;  %6143 = vmatpush3.bf16.msra.mxu0 %v6605_v38  ;;  %v6644_v39 = vld [vmem:[%s6983_s30 + $0x238] sm:$0xff]  }
 0xecb   : > { %6122 = vmatprep.subr.bf16.mxu1 %v6606_v40  ;;  %6144 = vmatprep.subr.bf16.mxu0 %v6607_v24  ;;  %v6645_v38 = vld [vmem:[%s6983_s30 + $0x2b8] sm:$0xff]   ;;  %v7666_v40 = vld [vmem:[%s6977_s27 + $0x30] sm:$0xff] }
 0xecc   : > { %v7669_v24 = vld [vmem:[%s6977_s27 + $0x70] sm:$0xff] }
 0xece   : > { %6123 = vmatpush3.bf16.msra.mxu1 %v6608_v43  ;;  %6145 = vmatpush3.bf16.msra.mxu0 %v6609_v45  ;;  %v7672_v43 = vld [vmem:[%s6977_s27 + $0x38] sm:$0xff]  ;;  %v5911_v45 = vcombine.high %v7666_v40, %v7669_v24 }
 0xecf   : > { %6124 = vmatprep.subr.bf16.mxu1 %v6610_v16  ;;  %6146 = vmatprep.subr.bf16.mxu0 %v6611_v20  ;;  %v7677_v16 = vld [vmem:[%s6977_s27 + $0x78] sm:$0xff]  ;;  %v5910_v20 = vcombine.low %v7666_v40, %v7669_v24  ;;  %v6648_v40 = vld [vmem:[%s6983_s30 + $0x300] sm:$0xff]  }
 0xed0   : > { %v5912_v46 = vcombine.low %v7672_v43, %v7677_v16  ;;  %v5913_v13 = vcombine.high %v7672_v43, %v7677_v16  ;;  %v6649_v24 = vld [vmem:[%s6983_s30 + $0x380] sm:$0xff]   ;;  %v6650_v43 = vld [vmem:[%s6983_s30 + $0x348] sm:$0xff]  }
 0xed1   : > { %v6651_v16 = vld [vmem:[%s6983_s30 + $0x3c8] sm:$0xff]  }
 0xed2   : > { %6125 = vmatpush3.bf16.msra.mxu1 %v6612_v48  ;;  %6147 = vmatpush3.bf16.msra.mxu0 %v6613_v52 }
 0xed3   : > { %4421 = vmatprep.subr.bf16.mxu1 %v5869_v1  ;;  %4464 = vmatprep.subr.bf16.mxu0 %v5871_v53 }
 0xed5   : > { %4302 = vmatmul.mubr.bf16.vlgmr.msra.gmra.mrb[96].mxu1 %v7583_v41  ;;  %4343 = vmatmul.mubr.bf16.vlgmr.msra.gmra.mrb[100].mxu0 %v7585_v42  ;;  %v6614_v41 = vld [vmem:[%s6983_s30 + $0x240] sm:$0xff]  }
 0xed6   : > { %4422 = vmatpush1.bf16.msra.mxu1 %v5868_v60  ;;  %4465 = vmatpush1.bf16.msra.mxu0 %v5870_v63  ;;  %v6615_v42 = vld [vmem:[%s6983_s30 + $0x2c0] sm:$0xff]  }
 0xed7   : > { %4423 = vmatprep.subr.bf16.mxu1 %v5873_v0  ;;  %4466 = vmatprep.subr.bf16.mxu0 %v5875_v49 }
 0xed8   : > { %4453 = vmatprep.mubr.bf16.mxu1 %v6803_v61  ;;  %4496 = vmatprep.mubr.bf16.mxu0 %v6803_v61 }
 0xeda   : > { %4424 = vmatpush1.bf16.msra.mxu1 %v5872_v2  ;;  %4467 = vmatpush1.bf16.msra.mxu0 %v5874_v4 }
 0xedb   : > { %6154 = vmatprep.subr.bf16.mxu1 %v6614_v41  ;;  %6176 = vmatprep.subr.bf16.mxu0 %v6615_v42 }
 0xedd   : > { %5876 = vmatmul.mubr.msk.bf16.vlgmr.msra.gmra.mrb[100].mxu1 %vm881_vm2, %v7519_v25  ;;  %5877 = vmatmul.mubr.msk.bf16.vlgmr.msra.gmra.mrb[104].mxu0 %vm881_vm2, %v7519_v25 }
 0xede   : > { %6155 = vmatpush3.bf16.msra.mxu1 %v6616_v5  ;;  %6177 = vmatpush3.bf16.msra.mxu0 %v6617_v23 }
 0xedf   : > { %6156 = vmatprep.subr.bf16.mxu1 %v6618_v19  ;;  %6178 = vmatprep.subr.bf16.mxu0 %v6619_v6 }
 0xee2   : > { %6157 = vmatpush3.bf16.msra.mxu1 %v6620_v7  ;;  %6179 = vmatpush3.bf16.msra.mxu0 %v6621_v8  ;;  %v4359_v7 = vld [vmem:[%s6972_s3 + $0x8] sm:$0xf] }
 0xee3   : > { %6158 = vmatprep.subr.bf16.mxu1 %v6622_v9  ;;  %6180 = vmatprep.subr.bf16.mxu0 %v6623_v10 }
 0xee6   : > { %6159 = vmatpush3.bf16.msra.mxu1 %v6624_v11  ;;  %6181 = vmatpush3.bf16.msra.mxu0 %v6625_v12 }
 0xee7   : > { %6160 = vmatprep.subr.bf16.mxu1 %v6626_v14  ;;  %6182 = vmatprep.subr.bf16.mxu0 %v6627_v15  ;;  %v4364_v14 = vrot.slane %v4359_v7, %v7565_v62  ;;  %v4372_v15 = vrot.slane %v4359_v7, %v7567_v51 }
 0xeea   : > { %6161 = vmatpush3.bf16.msra.mxu1 %v6628_v17  ;;  %6183 = vmatpush3.bf16.msra.mxu0 %v6629_v18 }
 0xeeb   : > { %6162 = vmatprep.subr.bf16.mxu1 %v6630_v26  ;;  %6184 = vmatprep.subr.bf16.mxu0 %v6631_v28  ;;  %v4368_v26 = vrot.slane %v4359_v7, %v7570_v44  ;;  %v4376_v28 = vrot.slane %v4359_v7, %v7572_v3  ;;  %v6647_v7 = vld [vmem:[%s6983_s30 + $0x3c0] sm:$0xff]  }
 0xeee   : > { %6163 = vmatpush3.bf16.msra.mxu1 %v6632_v29  ;;  %6185 = vmatpush3.bf16.msra.mxu0 %v6633_v30 }
 0xeef   : > { %6164 = vmatprep.subr.bf16.mxu1 %v6634_v31  ;;  %6186 = vmatprep.subr.bf16.mxu0 %v6635_v55 }
 0xef2   : > { %6165 = vmatpush3.bf16.msra.mxu1 %v6636_v32  ;;  %6187 = vmatpush3.bf16.msra.mxu0 %v6637_v33 }
 0xef3   : > { %6166 = vmatprep.subr.bf16.mxu1 %v6638_v56  ;;  %6188 = vmatprep.subr.bf16.mxu0 %v6639_v34 }
 0xef6   : > { %6167 = vmatpush3.bf16.msra.mxu1 %v6640_v27  ;;  %6189 = vmatpush3.bf16.msra.mxu0 %v6641_v35 }
 0xef7   : > { %6168 = vmatprep.subr.bf16.mxu1 %v6642_v36  ;;  %6190 = vmatprep.subr.bf16.mxu0 %v6643_v37 }
 0xefa   : > { %6169 = vmatpush3.bf16.msra.mxu1 %v6644_v39  ;;  %6191 = vmatpush3.bf16.msra.mxu0 %v6645_v38 }
 0xefb   : > { %4929 = vmatprep.subr.bf16.mxu1 %v5911_v45  ;;  %4972 = vmatprep.subr.bf16.mxu0 %v5913_v13 }
 0xf88   : > { %v6082_v50 = vpop.f32.mrb[92].mxu1  ;;  %v6104_v47 = vpop.f32.mrb[96].mxu0 }
 0xf89   : > { %v6083_v48 = vpop.f32.mrb[93].mxu1  ;;  %v6105_v52 = vpop.f32.mrb[97].mxu0 }
 0xf8a   : > { %v6084_v1 = vadd.f32 %v6083_v48, %v6082_v50  ;;  %v6106_v53 = vadd.f32 %v6105_v52, %v6104_v47  ;;  %v6085_v54 = vpop.f32.mrb[94].mxu1  ;;  %v6107_v57 = vpop.f32.mrb[98].mxu0 }
 0xf8b   : > { %v6086_v58 = vpop.f32.mrb[95].mxu1  ;;  %v6108_v59 = vpop.f32.mrb[99].mxu0 }
 0xf8c   : > { %v4071_v60 = vadd.f32 %v6106_v53, %v6084_v1  ;;  %v6087_v63 = vadd.f32 %v6086_v58, %v6085_v54  ;;  %v6109_v0 = vadd.f32 %v6108_v59, %v6107_v57  ;;  %v4863_v53 = vld [vmem:[%s6977_s27 + $0xb0] sm:$0xff] }
 0xf8d   : > { %v4865_v54 = vld [vmem:[%s6977_s27 + $0xf0] sm:$0xff] }
 0xf8e   : > { %v4074_v49 = vadd.f32 %v6109_v0, %v6087_v63  ;;  %v4864_v63 = vld [vmem:[%s6977_s27 + $0xb8] sm:$0xff] }
 0xf8f   : > { %v4866_v0 = vld [vmem:[%s6977_s27 + $0xf8] sm:$0xff] }
 0xfa8   : > { %v6126_v2 = vpop.f32.mrb[96].mxu1  ;;  %v6148_v4 = vpop.f32.mrb[100].mxu0 }
 0xfa9   : > { %v6127_v41 = vpop.f32.mrb[97].mxu1  ;;  %v6149_v42 = vpop.f32.mrb[101].mxu0 }
 0xfaa   : > { %v6128_v5 = vadd.f32 %v6127_v41, %v6126_v2  ;;  %v6150_v23 = vadd.f32 %v6149_v42, %v6148_v4  ;;  %v6129_v19 = vpop.f32.mrb[98].mxu1  ;;  %v6151_v6 = vpop.f32.mrb[102].mxu0  ;;  %v5915_v42 = vcombine.high %v4863_v53, %v4865_v54 }
 0xfab   : > { %v6130_v8 = vpop.f32.mrb[99].mxu1  ;;  %v6152_v9 = vpop.f32.mrb[103].mxu0 }
 0xfac   : > { %v4304_v10 = vadd.f32 %v6128_v5, %v4071_v60  ;;  %v6131_v11 = vadd.f32 %v6130_v8, %v6129_v19  ;;  %v6153_v12 = vadd.f32 %v6152_v9, %v6151_v6  ;;  %v5917_v5 = vcombine.high %v4864_v63, %v4866_v0  ;;  %v6646_v6 = vld [vmem:[%s6983_s30 + $0x340] sm:$0xff]   ;;  %v6655_v8 = vld [vmem:[%s6983_s30 + $0x3d0] sm:$0xff]  }
 0xfad   : > { %v5916_v19 = vcombine.low %v4864_v63, %v4866_v0  ;;  %v6656_v9 = vld [vmem:[%s6983_s30 + $0x310] sm:$0xff]  }
 0xfae   : > { %v7688_v17 = vadd.f32 %v6150_v23, %v4304_v10  ;;  %v4307_v18 = vadd.f32 %v6131_v11, %v4074_v49  ;;  %v5914_v23 = vcombine.low %v4863_v53, %v4865_v54  ;;  %v6657_v10 = vld [vmem:[%s6983_s30 + $0x390] sm:$0xff]   ;;  %v6659_v11 = vld [vmem:[%s6983_s30 + $0x3d8] sm:$0xff]   ;;  %v4867_v53 = vld [vmem:[%s6972_s3 + $0xc] sm:$0xf] }
 0xfaf   : > { %v4872_v63 = vrot.slane %v4867_v53, %v7565_v62  ;;  %v4880_v0 = vrot.slane %v4867_v53, %v7567_v51 }
 0xfb0   : > { %v7692_v29 = vadd.f32 %v6153_v12, %v4307_v18  ;;  %v4455_v30 = vpop.f32.mrb[100].mxu1  ;;  %v4498_v31 = vpop.f32.mrb[104].mxu0  ;;  %v6660_v12 = vld [vmem:[%s6983_s30 + $0x318] sm:$0xff]   ;;  %v6663_v18 = vld [vmem:[%s6983_s30 + $0x3e0] sm:$0xff]  }
 0xfb1   : > { %v4456_v55 = vadd.f32 %v4455_v30, %v4364_v14  ;;  %v4499_v32 = vadd.f32 %v4498_v31, %v4372_v15  ;;  %v4457_v33 = vpop.f32.mrb[101].mxu1  ;;  %v4500_v56 = vpop.f32.mrb[105].mxu0  ;;  %v6666_v30 = vld [vmem:[%s6983_s30 + $0x368] sm:$0xff]  }
 0xfb2   : > { %v4458_v34 = vadd.f32 %v4457_v33, %v4368_v26  ;;  %v4501_v27 = vadd.f32 %v4500_v56, %v4376_v28  ;;  %v4459_v35 = vpop.f32.mrb[102].mxu1  ;;  %v4502_v36 = vpop.f32.mrb[106].mxu0  ;;  %v6667_v31 = vld [vmem:[%s6983_s30 + $0x3e8] sm:$0xff]   ;;  %v6670_v33 = vld [vmem:[%s6983_s30 + $0x370] sm:$0xff]  }
 0xfb3   : > { %v4460_v37 = vadd.f32 %v4459_v35, %v4364_v14  ;;  %v4503_v39 = vadd.f32 %v4502_v36, %v4372_v15  ;;  %v4461_v38 = vpop.f32.mrb[103].mxu1  ;;  %v4504_v45 = vpop.f32.mrb[107].mxu0  ;;  %v4507_v47 = vmax.f32 %v4456_v55, 0.0  ;;  %v4509_v48 = vmax.f32 %v4499_v32, 0.0  ;;  %v6661_v14 = vld [vmem:[%s6983_s30 + $0x398] sm:$0xff]   ;;  %v6662_v15 = vld [vmem:[%s6983_s30 + $0x360] sm:$0xff]  }
 0xfb4   : > { %v4462_v13 = vadd.f32 %v4461_v38, %v4368_v26  ;;  %v4505_v50 = vadd.f32 %v4504_v45, %v4376_v28  ;;  %v4508_v57 = vmax.f32 %v4458_v34, 0.0  ;;  %v4510_v58 = vmax.f32 %v4501_v27, 0.0  ;;  %v6664_v26 = vld [vmem:[%s6983_s30 + $0x320] sm:$0xff]   ;;  %v6668_v55 = vld [vmem:[%s6983_s30 + $0x328] sm:$0xff]   ;;  %v6671_v56 = vld [vmem:[%s6983_s30 + $0x3f0] sm:$0xff]  }
 0xfb5   : > { %v4511_v52 = vmax.f32 %v4460_v37, 0.0  ;;  %v4513_v1 = vmax.f32 %v4503_v39, 0.0  ;;  %v6665_v28 = vld [vmem:[%s6983_s30 + $0x3a0] sm:$0xff]   ;;  %v6669_v32 = vld [vmem:[%s6983_s30 + $0x3a8] sm:$0xff]   ;;  %v6672_v34 = vld [vmem:[%s6983_s30 + $0x330] sm:$0xff]  }
 0xfb6   : > { %v4512_v59 = vmax.f32 %v4462_v13, 0.0  ;;  %v4514_v60 = vmax.f32 %v4505_v50, 0.0  ;;  %v6673_v27 = vld [vmem:[%s6983_s30 + $0x3b0] sm:$0xff]   ;;  %v6674_v35 = vld [vmem:[%s6983_s30 + $0x378] sm:$0xff]  }
 0xfb7   : > { %v4579_v49 = vpack.c.bf16 %v4511_v52, %v4507_v47  ;;  %v4581_v2 = vpack.c.bf16 %v4513_v1, %v4509_v48  ;;  %v6675_v36 = vld [vmem:[%s6983_s30 + $0x3f8] sm:$0xff]  }
 0xfb8   : > { %v4580_v4 = vpack.c.bf16 %v4512_v59, %v4508_v57  ;;  %v4582_v41 = vpack.c.bf16 %v4514_v60, %v4510_v58  ;;  %v6676_v37 = vld [vmem:[%s6983_s30 + $0x338] sm:$0xff]  }
 0xfb9   : > { %v6677_v39 = vld [vmem:[%s6983_s30 + $0x3b8] sm:$0xff]  }
 0xfba   : > { %4807 = vmatprep.mubr.bf16.mxu1 %v4580_v4  ;;  %4848 = vmatprep.mubr.bf16.mxu0 %v4582_v41  ;;  %v4876_v4 = vrot.slane %v4867_v53, %v7570_v44  ;;  %v4884_v41 = vrot.slane %v4867_v53, %v7572_v3 }
 0xfbb   : > { %4808 = vmatmul.mubr.bf16.vlgmr.msra.gmra.mrb[104].mxu1 %v4579_v49  ;;  %4849 = vmatmul.mubr.bf16.vlgmr.msra.gmra.mrb[108].mxu0 %v4581_v2 }
 0xfbc   : > { %4930 = vmatpush1.bf16.msra.mxu1 %v5910_v20  ;;  %4973 = vmatpush1.bf16.msra.mxu0 %v5912_v46  ;;  %v6653_v20 = vld [vmem:[%s6983_s30 + $0x388] sm:$0xff]   ;;  %v6654_v46 = vld [vmem:[%s6983_s30 + $0x350] sm:$0xff]  }
 0xfbd   : > { %4931 = vmatprep.subr.bf16.mxu1 %v5915_v42  ;;  %4974 = vmatprep.subr.bf16.mxu0 %v5917_v5 }
 0xfbe   : > { %4961 = vmatprep.mubr.bf16.mxu1 %v6803_v61  ;;  %5004 = vmatprep.mubr.bf16.mxu0 %v6803_v61  ;;  %v6652_v61 = vld [vmem:[%s6983_s30 + $0x308] sm:$0xff]  }
 0xfc0   : > { %4932 = vmatpush1.bf16.msra.mxu1 %v5914_v23  ;;  %4975 = vmatpush1.bf16.msra.mxu0 %v5916_v19 }
 0xfc1   : > { %6198 = vmatprep.subr.bf16.mxu1 %v6646_v6  ;;  %6220 = vmatprep.subr.bf16.mxu0 %v6647_v7 }
 0xfc3   : > { %5918 = vmatmul.mubr.msk.bf16.vlgmr.msra.gmra.mrb[108].mxu1 %vm881_vm2, %v7519_v25  ;;  %5919 = vmatmul.mubr.msk.bf16.vlgmr.msra.gmra.mrb[112].mxu0 %vm881_vm2, %v7519_v25  ;;  %v6658_v25 = vld [vmem:[%s6983_s30 + $0x358] sm:$0xff]  }
 0xfc4   : > { %6199 = vmatpush3.bf16.msra.mxu1 %v6648_v40  ;;  %6221 = vmatpush3.bf16.msra.mxu0 %v6649_v24 }
 0xfc5   : > { %6200 = vmatprep.subr.bf16.mxu1 %v6650_v43  ;;  %6222 = vmatprep.subr.bf16.mxu0 %v6651_v16 }
 0xfc8   : > { %6201 = vmatpush3.bf16.msra.mxu1 %v6652_v61  ;;  %6223 = vmatpush3.bf16.msra.mxu0 %v6653_v20 }
 0xfc9   : > { %6202 = vmatprep.subr.bf16.mxu1 %v6654_v46  ;;  %6224 = vmatprep.subr.bf16.mxu0 %v6655_v8 }
 0xfcc   : > { %6203 = vmatpush3.bf16.msra.mxu1 %v6656_v9  ;;  %6225 = vmatpush3.bf16.msra.mxu0 %v6657_v10 }
 0xfcd   : > { %6204 = vmatprep.subr.bf16.mxu1 %v6658_v25  ;;  %6226 = vmatprep.subr.bf16.mxu0 %v6659_v11 }
 0xfd0   : > { %6205 = vmatpush3.bf16.msra.mxu1 %v6660_v12  ;;  %6227 = vmatpush3.bf16.msra.mxu0 %v6661_v14 }
 0xfd1   : > { %6206 = vmatprep.subr.bf16.mxu1 %v6662_v15  ;;  %6228 = vmatprep.subr.bf16.mxu0 %v6663_v18 }
 0xfd4   : > { %6207 = vmatpush3.bf16.msra.mxu1 %v6664_v26  ;;  %6229 = vmatpush3.bf16.msra.mxu0 %v6665_v28 }
 0xfd5   : > { %6208 = vmatprep.subr.bf16.mxu1 %v6666_v30  ;;  %6230 = vmatprep.subr.bf16.mxu0 %v6667_v31 }
 0xfd8   : > { %6209 = vmatpush3.bf16.msra.mxu1 %v6668_v55  ;;  %6231 = vmatpush3.bf16.msra.mxu0 %v6669_v32 }
 0xfd9   : > { %6210 = vmatprep.subr.bf16.mxu1 %v6670_v33  ;;  %6232 = vmatprep.subr.bf16.mxu0 %v6671_v56 }
 0xfdc   : > { %6211 = vmatpush3.bf16.msra.mxu1 %v6672_v34  ;;  %6233 = vmatpush3.bf16.msra.mxu0 %v6673_v27 }
 0xfdd   : > { %6212 = vmatprep.subr.bf16.mxu1 %v6674_v35  ;;  %6234 = vmatprep.subr.bf16.mxu0 %v6675_v36 }
 0xfe0   : > { %6213 = vmatpush3.bf16.msra.mxu1 %v6676_v37  ;;  %6235 = vmatpush3.bf16.msra.mxu0 %v6677_v39 }
0x108e   : > { %v6170_v38 = vpop.f32.mrb[104].mxu1  ;;  %v6192_v45 = vpop.f32.mrb[108].mxu0 }
0x108f   : > { %v6171_v13 = vpop.f32.mrb[105].mxu1  ;;  %v6193_v50 = vpop.f32.mrb[109].mxu0 }
0x1090   : > { %v6172_v47 = vadd.f32 %v6171_v13, %v6170_v38  ;;  %v6194_v48 = vadd.f32 %v6193_v50, %v6192_v45  ;;  %v6173_v52 = vpop.f32.mrb[106].mxu1  ;;  %v6195_v1 = vpop.f32.mrb[110].mxu0  ;;  %v5952_v38 = vld [vmem:[%s844_s1] ss:$0 sm:$0xff] }
0x1091   : > { %v6174_v54 = vpop.f32.mrb[107].mxu1  ;;  %v6196_v57 = vpop.f32.mrb[111].mxu0 }
0x1092   : > { %v4851_v58 = vadd.f32 %v6194_v48, %v6172_v47  ;;  %v6175_v59 = vadd.f32 %v6174_v54, %v6173_v52  ;;  %v6197_v60 = vadd.f32 %v6196_v57, %v6195_v1 }
0x1094   : > { %v4857_v49 = vadd.f32 %v4851_v58, %v7688_v17  ;;  %v4854_v2 = vadd.f32 %v6197_v60, %v6175_v59 }
0x1096   : > { %v4858_v42 = vadd.f32 %v4854_v2, %v7692_v29  ;;  %v4963_v5 = vpop.f32.mrb[108].mxu1  ;;  %v5006_v23 = vpop.f32.mrb[112].mxu0 }
0x1097   : > { %v4964_v19 = vadd.f32 %v4963_v5, %v4872_v63  ;;  %v5007_v6 = vadd.f32 %v5006_v23, %v4880_v0  ;;  %v4965_v7 = vpop.f32.mrb[109].mxu1  ;;  %v5008_v40 = vpop.f32.mrb[113].mxu0 }
0x1098   : > { %v4966_v24 = vadd.f32 %v4965_v7, %v4876_v4  ;;  %v5009_v43 = vadd.f32 %v5008_v40, %v4884_v41  ;;  %v4967_v62 = vpop.f32.mrb[110].mxu1  ;;  %v5010_v16 = vpop.f32.mrb[114].mxu0  ;;  %v5953_v7 = vld [vmem:[%s847_s6] ss:$0 sm:$0xff] }
0x1099   : > { %v4968_v51 = vadd.f32 %v4967_v62, %v4872_v63  ;;  %v5011_v61 = vadd.f32 %v5010_v16, %v4880_v0  ;;  %v4969_v17 = vpop.f32.mrb[111].mxu1  ;;  %v5012_v20 = vpop.f32.mrb[115].mxu0  ;;  %v5015_v8 = vmax.f32 %v4964_v19, 0.0  ;;  %v5017_v3 = vmax.f32 %v5007_v6, 0.0 }
0x109a   : > { %v4970_v46 = vadd.f32 %v4969_v17, %v4876_v4  ;;  %v5013_v44 = vadd.f32 %v5012_v20, %v4884_v41  ;;  %v5016_v10 = vmax.f32 %v4966_v24, 0.0  ;;  %v5018_v25 = vmax.f32 %v5009_v43, 0.0  ;;  %v5954_v43 = vld [vmem:[%s850_s8] ss:$0 sm:$0xff] }
0x109b   : > { %v5019_v9 = vmax.f32 %v4968_v51, 0.0  ;;  %v5021_v29 = vmax.f32 %v5011_v61, 0.0  ;;  %v6756_v20 = vld [vmem:[%s7872_s7] sm:$0xff] (!%p5955_p5)  }
0x109c   : > { %v5020_v11 = vmax.f32 %v4970_v46, 0.0  ;;  %v5022_v12 = vmax.f32 %v5013_v44, 0.0  ;;  %v6804_v46 = vmov (!%p5955_p5), 0.0   ;;  %v6757_v44 = vld [vmem:[%s7872_s7 + $0x8] sm:$0xff] (!%p5955_p5)  }
0x109d   : > { %v5087_v14 = vpack.c.bf16 %v5019_v9, %v5015_v8  ;;  %v5089_v15 = vpack.c.bf16 %v5021_v29, %v5017_v3  ;;  %6509 = vmatprep.subr.bf16.mxu0 (!%p5955_p5), %v6804_v46  ;;  %v5956_v3 = vld [vmem:[%s7873_s12] ss:$0 sm:$0xff] (!%p5955_p5) }
0x109e   : > { %v5088_v18 = vpack.c.bf16 %v5020_v11, %v5016_v10  ;;  %v5090_v26 = vpack.c.bf16 %v5022_v12, %v5018_v25 }
0x10a0   : > { %5315 = vmatprep.mubr.bf16.mxu1 %v5088_v18  ;;  %5356 = vmatprep.mubr.bf16.mxu0 %v5090_v26 }
0x10a1   : > { %5316 = vmatmul.mubr.bf16.vlgmr.msra.gmra.mrb[112].mxu1 %v5087_v14  ;;  %5357 = vmatmul.mubr.bf16.vlgmr.msra.gmra.mrb[116].mxu0 %v5089_v15 }
0x10a2   : > { %6510 = vmatpush3.bf16.msra.mxu0 (!%p5955_p5), %v6756_v20  ;;  %6513 = vmatprep.mubr.msk.bf16.mxu0 (!%p5955_p5), %vm6805_vm5, %v6804_v46 }
0x10a3   : > { %6511 = vmatprep.subr.bf16.mxu0 (!%p5955_p5), %v6804_v46 }
0x10a6   : > { %6512 = vmatpush3.bf16.msra.mxu0 (!%p5955_p5), %v6757_v44 }
0x1174   : > { %v6214_v28 = vpop.f32.mrb[112].mxu1  ;;  %v6236_v30 = vpop.f32.mrb[116].mxu0 }
0x1175   : > { %v6215_v31 = vpop.f32.mrb[113].mxu1  ;;  %v6237_v55 = vpop.f32.mrb[117].mxu0 }
0x1176   : > { %v6216_v32 = vadd.f32 %v6215_v31, %v6214_v28  ;;  %v6238_v33 = vadd.f32 %v6237_v55, %v6236_v30  ;;  %v6217_v56 = vpop.f32.mrb[114].mxu1  ;;  %v6239_v34 = vpop.f32.mrb[118].mxu0 }
0x1177   : > { %v6218_v27 = vpop.f32.mrb[115].mxu1  ;;  %v6240_v35 = vpop.f32.mrb[119].mxu0 }
0x1178   : > { %v5359_v36 = vadd.f32 %v6238_v33, %v6216_v32  ;;  %v6219_v37 = vadd.f32 %v6218_v27, %v6217_v56  ;;  %v6241_v39 = vadd.f32 %v6240_v35, %v6239_v34 }
0x117a   : > { %v5365_v45 = vadd.f32 %v5359_v36, %v4857_v49  ;;  %v5362_v13 = vadd.f32 %v6241_v39, %v6219_v37 }
0x117c   : > { %v5366_v50 = vadd.f32 %v5362_v13, %v4858_v42  ;;  %v5374_v47 = vadd.f32 %v5952_v38, %v5365_v45 }
0x117e   : > { %v5378_v48 = vadd.f32 %v5374_v47, %v7513_v21  ;;  %v5375_v52 = vadd.f32 %v5952_v38, %v5366_v50 }
0x1180   : > { %v5380_v1 = vsel %vm881_vm2, %v5378_v48, 0.0  ;;  %v5379_v53 = vadd.f32 %v5375_v52, %v7515_v22 }
0x1181   : > { %5381 = vadd.xlane.f32.xlu1 %v5380_v1 }
0x1182   : > { %v5383_v54 = vsel %vm881_vm2, %v5379_v53, 0.0 }
0x1183   : > { %5384 = vadd.xlane.f32.xlu0 %v5383_v54 }
0x120e   : > { %v5382_v57 = vpop.xlane.xlu1 %5381 }
0x120f   : > { %v5386_v58 = vmul.f32 0.03125, %v5382_v57 }
0x1210   : > { %v5385_v59 = vpop.xlane.xlu0 %5384 }
0x1211   : > { %v5388_v60 = vsub.f32 %v5378_v48, %v5386_v58  ;;  %v5387_v63 = vmul.f32 0.03125, %v5385_v59 }
0x1213   : > { %v5389_v0 = vsub.f32 %v5379_v53, %v5387_v63  ;;  %v5390_v49 = vmul.f32 %v5388_v60, %v5388_v60 }
0x1215   : > { %v5392_v2 = vsel %vm881_vm2, %v5390_v49, 0.0  ;;  %v5391_v21 = vmul.f32 %v5389_v0, %v5389_v0 }
0x1216   : > { %5393 = vadd.xlane.f32.xlu1 %v5392_v2 }
0x1217   : > { %v5395_v4 = vsel %vm881_vm2, %v5391_v21, 0.0 }
0x1218   : > { %5396 = vadd.xlane.f32.xlu0 %v5395_v4 }
0x12a3   : > { %v5394_v22 = vpop.xlane.xlu1 %5393 }
0x12a4   : > { %v5398_v41 = vmul.f32 0.03125, %v5394_v22 }
0x12a5   : > { %v5397_v42 = vpop.xlane.xlu0 %5396 }
0x12a6   : > { %v5400_v5 = vadd.f32 1e-05, %v5398_v41  ;;  %v5399_v23 = vmul.f32 0.03125, %v5397_v42 }
0x12a8   : > { %6750 = vrsqrt.f32 %v5400_v5  ;;  %v5401_v19 = vadd.f32 1e-05, %v5399_v23 }
0x12aa   : > { %6752 = vrsqrt.f32 %v5401_v19 }
0x12b2   : > { %v6751_v6 = vpop.eup %6750 }
0x12b3   : > { %v5404_v40 = vmul.f32 %v6751_v6, %v5388_v60 }
0x12b4   : > { %v6753_v24 = vpop.eup %6752 }
0x12b5   : > { %v5412_v62 = vmul.f32 %v5953_v7, %v5404_v40  ;;  %v5405_v16 = vmul.f32 %v6753_v24, %v5389_v0  ;;  %5427 = sbr.rel (%p5955_p5) target bundleno = 5014 (0x1396), region = 108 }
0x12b7   : > { %v5420_v51 = vadd.f32 %v5954_v43, %v5412_v62  ;;  %v5413_v61 = vmul.f32 %v5953_v7, %v5405_v16 }
0x12b9   : > { %5422 = vst.msk [vmem:[#allocation2] sm:$0xff] %vm881_vm2, %v5420_v51  ;;  %v5421_v17 = vadd.f32 %v5954_v43, %v5413_v61 }
0x12bb   : > { %5423 = vst.msk [vmem:[#allocation2 + $0x8] sm:$0xff] %vm881_vm2, %v5421_v17  ;;  %v5428_v8 = vpack.c.bf16 (!%p5955_p5), %v5421_v17, %v5420_v51 }
0x12bd   : > { %6514 = vmatmul.mubr.msk.bf16.vlgmr.msra.gmra.mrb[0].mxu0 %vm881_vm2, %v5428_v8 }
0x1390   : > { %v5489_v9 = vpop.f32.mrb[0].mxu0 }
0x1391   : > { %v5490_v29 = vadd.f32 %v5956_v3, %v5489_v9  ;;  %v6515_v10 = vpop.f32.mrb[1].mxu0 }
0x1392   : > { %v5492_v25 = vpop.f32.mrb[2].mxu0 }
0x1393   : > { %5496 = vst [vmem:[#allocation3] sm:$0xff] %v5490_v29  ;;  %v5493_v11 = vadd.f32 %v5956_v3, %v5492_v25  ;;  %v6516_v12 = vpop.f32.mrb[3].mxu0 }
0x1395   : > { %5497 = vst [vmem:[#allocation3 + $0x8] sm:$0xff] %v5493_v11 }
0x1396 PF: > { %s7874_s4 = sld [smem:[#allocation7_spill]]  ;;  %s6806_s20 = smov [#allocation3]  }
0x1397   : > { %s5504_s18 = sshll.u32 %s6806_s20, 4  ;;  %s5505_s18 = int_to_ptr.vmem [resolvable:$true] %s5504_s18 }
0x1398   : > { %s6758_s22 = scalar_lea.vmem %s5505_s18, 256  ;;  %p6765_p10 = scmp.lt.s32.totalorder %s5505_s18, %s5505_s18 }
0x1399   : > { %p6759_p7 = scmp.ne.s32.totalorder %s5505_s18, %s6758_s22  ;;  %p6766_p11 = scmp.lt.s32.totalorder %s6758_s22, %s6758_s22 }
0x139b   : > { %p6767_p12 = por %p6766_p11, %p6765_p10 }
0x139c   : > { %p6521_p6 = scmp.eq.s32.totalorder %s7874_s4, 5 }
0x139e   : > { %p6760_p8 = pnand %p6759_p7, %p6521_p6 }
0x13a0   : > { %p6761_p9 = pneg %p6760_p8 }
0x13a2   : > { %p6768_p13 = pnand %p6767_p12, %p6761_p9 }
0x13a4   : > { %6771 = shalt.err (!%p6768_p13)
}
0x13a5   : > { %s7875_s3 = sld [smem:[#allocation21_spill]] }
0x13ab   : > { %s6772_s27 = scalar_lea.hbm %s7875_s3, 256 }
0x13ac   : > { %p6773_p0 = scmp.ne.s32.totalorder %s7875_s3, %s6772_s27  ;;  %p6778_p3 = scmp.lt.u32.totalorder %s6772_s27, %s7875_s3 }
0x13ae   : > { %p6774_p1 = pnand %p6773_p0, %p6521_p6 }
0x13b0   : > { %p6775_p2 = pneg %p6774_p1 }
0x13b2   : > { %p6780_p4 = pnand %p6778_p3, %p6775_p2 }
0x13b4   : > { %6783 = shalt.err (!%p6780_p4)
}
0x13b5   : > { %s6807_s2 = smov 128   ;;  %s6808_s6 = smov 8  }
0x13b6   : > { %6518 = dma.vmem_to_hbm [thread:$0]  (%p6521_p6), %s5505_s18, 256, %s7875_s3, [#allocation4], %s6807_s2, %s6807_s2, %s6808_s6  }
0x13b7   : > { %6789 = dma.done.wait (%p6521_p6), [#allocation4], 256  }
0x13b8   : > { %6791 = vsyncadd (%p6521_p6), [#allocation4], 4294967040 }
0x13b9 PF: > { %s7876_s8 = sld [smem:[#allocation6_spill]] }
0x13bf   : > { %s31_s1 = sadd.s32 1, %s7876_s8  }
0x13c0   : > { %p28_p5 = scmp.ge.s32.totalorder %s31_s1, 8  }
0x13c2   :  { %30 = sbr.rel (!%p28_p5) target bundleno = 15 (0xf), region = 177 }
0x13c9   :  { %5520 = vsyncpa [#allocation4], 1 }
0x13ca   :  { %5522 = vsyncpa [#allocation4 + $0x1], 1 }

</bundles_post_ra>
